<compile_context>
chip_gen: v7x
topology: tpu7x:2x2x1
jax: 0.10.0
libtpu: 0.0.40
codegen_flags: <defaults>
</compile_context>

<pallas_src>
import jax
import jax.numpy as jnp
from jax.experimental import pallas as pl
from jax.experimental.pallas import tpu as pltpu

NUM_PLAN_TYPES = 5
HEAD_CHANNELS = NUM_PLAN_TYPES + 23     # 28 real head channels
HEAD_PAD = 128                          # lane-dense head width inside the kernel
BN_EPS = 1e-5
NUM_BLOCKS = 21


# ------------------------------ fused kernel ------------------------------- #

def _fused_actor_kernel(x_ref, w1_ref, s1_ref, b1_ref, w2_ref, s2_ref, b2_ref,
                        wh_ref, sh_ref, bh_ref, out_ref, act_ref, pad_ref):
    """One ResConvBlock per grid step; 1x1-conv head fused into the last step.

    act_ref : (N, H, W, C)      f32  running activation (persists across steps)
    pad_ref : (N, H+2, 2W, C)   f32  circular-padded copy; W is written twice so
                                     every 3x3 tap is a plain contiguous slice.
    """
    k = pl.program_id(0)
    nblocks = pl.num_programs(0)
    N, H, W, C = act_ref.shape
    M = N * H * W

    @pl.when(k == 0)
    def _():
        act_ref[...] = x_ref[...]

    def fill_pad(a):                     # a: (N, H, W, C) f32 value
        # rows 1..H hold a, row 0 = a[H-1], row H+1 = a[0]; columns duplicated.
        pad_ref[:, 1:H + 1, 0:W, :] = a
        pad_ref[:, 1:H + 1, W:2 * W, :] = a
        pad_ref[:, 0:1, 0:W, :] = a[:, H - 1:H]
        pad_ref[:, 0:1, W:2 * W, :] = a[:, H - 1:H]
        pad_ref[:, H + 1:H + 2, 0:W, :] = a[:, 0:1]
        pad_ref[:, H + 1:H + 2, W:2 * W, :] = a[:, 0:1]

    def conv3x3(w_ref, s_ref, b_ref):    # -> (M, C) f32, folded BN (+bias) applied
        acc = None
        for dy in range(3):
            for dx in range(3):
                cs = (dx - 1) % W        # column start in the doubled-W buffer
                tap = pad_ref[:, dy:dy + H, cs:cs + W, :]
                tap = tap.reshape(M, C).astype(jnp.bfloat16)
                part = jnp.dot(tap, w_ref[dy * 3 + dx],
                               preferred_element_type=jnp.float32)
                acc = part if acc is None else acc + part
        return acc * s_ref[...] + b_ref[...]

    res = act_ref[...]                                        # (N, H, W, C)
    fill_pad(res)
    h = jnp.maximum(conv3x3(w1_ref, s1_ref, b1_ref), 0.0)     # conv1 + BN + ReLU
    fill_pad(h.reshape(N, H, W, C))
    y = conv3x3(w2_ref, s2_ref, b2_ref) + res.reshape(M, C)   # conv2 + BN + res
    y = jnp.maximum(y, 0.0)                                   # closing ReLU
    act_ref[...] = y.reshape(N, H, W, C)

    @pl.when(k == nblocks - 1)
    def _():
        CP = out_ref.shape[-1]                                # 128 (lane padded)
        raw = jnp.dot(y.astype(jnp.bfloat16), wh_ref[...],
                      preferred_element_type=jnp.float32)     # (M, CP)
        raw = raw * sh_ref[...] + bh_ref[...]                 # folded head BN
        cols = jax.lax.broadcasted_iota(jnp.int32, raw.shape, 1)

        def seg_softmax(lo, hi):
            mask = (cols >= lo) & (cols < hi)
            zm = jnp.where(mask, raw, -jnp.inf)
            m = jnp.max(zm, axis=-1, keepdims=True)
            e = jnp.exp(zm - m)                               # 0 outside segment
            return e / jnp.sum(e, axis=-1, keepdims=True)

        sm_move = seg_softmax(0, 12)
        sig = 1.0 / (1.0 + jnp.exp(-raw))
        sm_plan = seg_softmax(15, 15 + NUM_PLAN_TYPES)
        sm_rest = seg_softmax(15 + NUM_PLAN_TYPES, HEAD_CHANNELS)

        out = jnp.where(cols < 12, sm_move,
              jnp.where(cols < 15, sig,
              jnp.where(cols < 15 + NUM_PLAN_TYPES, sm_plan, sm_rest)))
        out_ref[...] = out.reshape(N, H, W, CP)


# --------------------------------- forward --------------------------------- #

def actor_forward(x_nchw, params):
    N, C, H, W = x_nchw.shape
    x = jnp.transpose(x_nchw, (0, 2, 3, 1)).astype(jnp.float32)   # NCHW -> NHWC
    NB = params["w1"].shape[0]
    CP = params["wh"].shape[1]

    out = pl.pallas_call(
        _fused_actor_kernel,
        out_shape=jax.ShapeDtypeStruct((N, H, W, CP), jnp.float32),
        grid=(NB,),
        in_specs=[
            pl.BlockSpec((N, H, W, C), lambda k: (0, 0, 0, 0)),        # x (resident)
            pl.BlockSpec((None, 9, C, C), lambda k: (k, 0, 0, 0)),     # w1[k] (bf16)
            pl.BlockSpec((None, 1, C), lambda k: (k, 0, 0)),           # s1[k]
            pl.BlockSpec((None, 1, C), lambda k: (k, 0, 0)),           # b1[k]
            pl.BlockSpec((None, 9, C, C), lambda k: (k, 0, 0, 0)),     # w2[k] (bf16)
            pl.BlockSpec((None, 1, C), lambda k: (k, 0, 0)),           # s2[k]
            pl.BlockSpec((None, 1, C), lambda k: (k, 0, 0)),           # b2[k]
            pl.BlockSpec((C, CP), lambda k: (0, 0)),                   # head W (bf16)
            pl.BlockSpec((1, CP), lambda k: (0, 0)),                   # head scale
            pl.BlockSpec((1, CP), lambda k: (0, 0)),                   # head shift
        ],
        out_specs=pl.BlockSpec((N, H, W, CP), lambda k: (0, 0, 0, 0)),
        scratch_shapes=[
            pltpu.VMEM((N, H, W, C), jnp.float32),           # running activation
            pltpu.VMEM((N, H + 2, 2 * W, C), jnp.float32),   # circular-padded buf
        ],
        compiler_params=pltpu.CompilerParams(dimension_semantics=("arbitrary",)),
    )(x, params["w1"], params["s1"], params["b1"],
      params["w2"], params["s2"], params["b2"],
      params["wh"], params["sh"], params["bh"])

    out = out[..., :HEAD_CHANNELS]                       # drop lane padding
    return jnp.transpose(out, (0, 3, 1, 2))              # NHWC -> NCHW


# ------------------------------- parameters -------------------------------- #

def _conv_bn_fold(key, kh, kw, cin, cout):
    kw_, kb, kg, kbe, km, kv = jax.random.split(key, 6)
    w = jax.random.normal(kw_, (kh, kw, cin, cout), jnp.float32) / jnp.sqrt(kh * kw * cin)
    conv_bias = 0.05 * jax.random.normal(kb, (cout,), jnp.float32)
    gamma = 1.0 + 0.1 * jax.random.normal(kg, (cout,), jnp.float32)
    beta = 0.1 * jax.random.normal(kbe, (cout,), jnp.float32)
    mean = 0.05 * jax.random.normal(km, (cout,), jnp.float32)
    var = jax.random.uniform(kv, (cout,), jnp.float32, minval=0.5, maxval=1.5)
    s = gamma / jnp.sqrt(var + BN_EPS)          # eval-mode BN fold
    b = s * (conv_bias - mean) + beta           # conv bias folded in
    return w, s, b


def init_params(key, width, num_blocks=NUM_BLOCKS):
    C = width
    keys = jax.random.split(key, 2 * num_blocks + 1)
    w1, s1, b1, w2, s2, b2 = [], [], [], [], [], []
    for i in range(num_blocks):
        w, s, b = _conv_bn_fold(keys[2 * i], 3, 3, C, C)
        w1.append(w.reshape(9, C, C)); s1.append(s); b1.append(b)
        w, s, b = _conv_bn_fold(keys[2 * i + 1], 3, 3, C, C)
        w2.append(w.reshape(9, C, C)); s2.append(s); b2.append(b)
    wh, sh, bh = _conv_bn_fold(keys[-1], 1, 1, C, HEAD_CHANNELS)

    wh_p = jnp.zeros((C, HEAD_PAD), jnp.float32).at[:, :HEAD_CHANNELS].set(
        wh.reshape(C, HEAD_CHANNELS))
    sh_p = jnp.ones((1, HEAD_PAD), jnp.float32).at[:, :HEAD_CHANNELS].set(sh[None, :])
    bh_p = jnp.zeros((1, HEAD_PAD), jnp.float32).at[:, :HEAD_CHANNELS].set(bh[None, :])

    return dict(
        w1=jnp.stack(w1).astype(jnp.bfloat16),   # (NB, 9, C, C) streamed per block
        s1=jnp.stack(s1)[:, None, :],            # (NB, 1, C) f32
        b1=jnp.stack(b1)[:, None, :],
        w2=jnp.stack(w2).astype(jnp.bfloat16),
        s2=jnp.stack(s2)[:, None, :],
        b2=jnp.stack(b2)[:, None, :],
        wh=wh_p.astype(jnp.bfloat16),            # (C, 128) lane-padded head
        sh=sh_p, bh=bh_p,                        # (1, 128) f32
    )


# ----------------------- pure-JAX reference (for check) --------------------- #

def _conv3x3_ref(a, w9, s, b):
    """Circular 3x3 conv with the same bf16-matmul / f32-accum numerics."""
    N, H, W, C = a.shape
    acc = None
    for dy in range(3):
        for dx in range(3):
            t = jnp.roll(a, (1 - dy, 1 - dx), axis=(1, 2))
            t = t.reshape(N * H * W, C).astype(jnp.bfloat16)
            p = jnp.dot(t, w9[dy * 3 + dx], preferred_element_type=jnp.float32)
            acc = p if acc is None else acc + p
    return (acc * s + b).reshape(N, H, W, C)


def actor_reference(x_nchw, params):
    x = jnp.transpose(x_nchw, (0, 2, 3, 1)).astype(jnp.float32)
    NB = params["w1"].shape[0]
    for k in range(NB):
        res = x
        h = jnp.maximum(_conv3x3_ref(x, params["w1"][k], params["s1"][k],
                                     params["b1"][k]), 0.0)
        y = _conv3x3_ref(h, params["w2"][k], params["s2"][k], params["b2"][k]) + res
        x = jnp.maximum(y, 0.0)
    N, H, W, C = x.shape
    raw = jnp.dot(x.reshape(-1, C).astype(jnp.bfloat16), params["wh"],
                  preferred_element_type=jnp.float32)
    raw = (raw * params["sh"] + params["bh"])[:, :HEAD_CHANNELS]

    def smax(z):
        e = jnp.exp(z - jnp.max(z, axis=-1, keepdims=True))
        return e / jnp.sum(e, axis=-1, keepdims=True)

    out = jnp.concatenate([
        smax(raw[:, :12]),
        jax.nn.sigmoid(raw[:, 12:15]),
        smax(raw[:, 15:15 + NUM_PLAN_TYPES]),
        smax(raw[:, 15 + NUM_PLAN_TYPES:]),
    ], axis=-1).reshape(N, H, W, HEAD_CHANNELS)
    return jnp.transpose(out, (0, 3, 1, 2))


# ----------------------------------- main ----------------------------------- #

if __name__ == "__main__":
    key = jax.random.PRNGKey(0)
    k_params, k_x = jax.random.split(key)

    N, WIDTH, H, W = 2, 32, 8, 8          # small test shapes (module default width=256)
    params = init_params(k_params, WIDTH, num_blocks=NUM_BLOCKS)
    x = jax.random.normal(k_x, (N, WIDTH, H, W), jnp.float32)     # NCHW input

    fwd = jax.jit(actor_forward)
    out = jax.block_until_ready(fwd(x, params))

    assert out.shape == (N, HEAD_CHANNELS, H, W), out.shape
    # softmax segments sum to 1 over channels; sigmoid segment stays in [0, 1]
    assert jnp.allclose(jnp.sum(out[:, :12], axis=1), 1.0, atol=1e-4)
    assert jnp.allclose(jnp.sum(out[:, 15:15 + NUM_PLAN_TYPES], axis=1), 1.0, atol=1e-4)
    assert jnp.allclose(jnp.sum(out[:, 15 + NUM_PLAN_TYPES:], axis=1), 1.0, atol=1e-4)
    assert bool(jnp.all((out[:, 12:15] >= 0.0) & (out[:, 12:15] <= 1.0)))

    # cross-check against a pure-JAX reference with identical numerics
    ref = actor_reference(x, params)
    assert jnp.allclose(out, ref, atol=2e-3, rtol=2e-3), \
        float(jnp.max(jnp.abs(out - ref)))

    print("KERNEL_OK")
</pallas_src>

<mosaic_0001>
module attributes {stable_mosaic.version = 11 : i64} {
  func.func @_fused_actor_kernel(%arg0: i32, %arg1: memref<2x8x8x32xf32, #tpu.memory_space<vmem>>, %arg2: memref<1x9x32x32xbf16, #tpu.memory_space<vmem>>, %arg3: memref<1x1x32xf32, #tpu.memory_space<vmem>>, %arg4: memref<1x1x32xf32, #tpu.memory_space<vmem>>, %arg5: memref<1x9x32x32xbf16, #tpu.memory_space<vmem>>, %arg6: memref<1x1x32xf32, #tpu.memory_space<vmem>>, %arg7: memref<1x1x32xf32, #tpu.memory_space<vmem>>, %arg8: memref<32x128xbf16, #tpu.memory_space<vmem>>, %arg9: memref<1x128xf32, #tpu.memory_space<vmem>>, %arg10: memref<1x128xf32, #tpu.memory_space<vmem>>, %arg11: memref<2x8x8x128xf32, #tpu.memory_space<vmem>>, %arg12: memref<2x8x8x32xf32, #tpu.memory_space<vmem>>, %arg13: memref<2x10x16x32xf32, #tpu.memory_space<vmem>>) attributes {dimension_semantics = [#tpu.dimension_semantics<arbitrary>], iteration_bounds = array<i64: 21>, scalar_prefetch = 0 : i64, scratch_operands = 2 : i64, tpu.core_type = #tpu.core_type<tc>, window_params = [{pipeline_mode = #tpu.pipeline_mode<synchronous>, transform_indices = @transform_0, window_bounds = array<i64: 2, 8, 8, 32>}, {transform_indices = @transform_1, window_bounds = array<i64: 1, 9, 32, 32>}, {transform_indices = @transform_2, window_bounds = array<i64: 1, 1, 32>}, {transform_indices = @transform_3, window_bounds = array<i64: 1, 1, 32>}, {transform_indices = @transform_4, window_bounds = array<i64: 1, 9, 32, 32>}, {transform_indices = @transform_5, window_bounds = array<i64: 1, 1, 32>}, {transform_indices = @transform_6, window_bounds = array<i64: 1, 1, 32>}, {pipeline_mode = #tpu.pipeline_mode<synchronous>, transform_indices = @transform_7, window_bounds = array<i64: 32, 128>}, {pipeline_mode = #tpu.pipeline_mode<synchronous>, transform_indices = @transform_8, window_bounds = array<i64: 1, 128>}, {pipeline_mode = #tpu.pipeline_mode<synchronous>, transform_indices = @transform_9, window_bounds = array<i64: 1, 128>}, {pipeline_mode = #tpu.pipeline_mode<synchronous>, transform_indices = @transform_10, window_bounds = array<i64: 2, 8, 8, 128>}]} {
    %c0_i32 = arith.constant 0 : i32
    %0 = arith.cmpi eq, %arg0, %c0_i32 : i32
    %1 = arith.extui %0 : i1 to i32
    %c0_i32_0 = arith.constant 0 : i32
    %2 = arith.cmpi ne, %1, %c0_i32_0 : i32
    scf.if %2 {
      %c0_223 = arith.constant 0 : index
      %c0_224 = arith.constant 0 : index
      %c0_225 = arith.constant 0 : index
      %c0_226 = arith.constant 0 : index
      %176 = vector.load %arg1[%c0_223, %c0_224, %c0_225, %c0_226] : memref<2x8x8x32xf32, #tpu.memory_space<vmem>>, vector<2x8x8x32xf32>
      %c0_227 = arith.constant 0 : index
      %c0_228 = arith.constant 0 : index
      %c0_229 = arith.constant 0 : index
      %c0_230 = arith.constant 0 : index
      %177 = vector.load %arg12[%c0_227, %c0_228, %c0_229, %c0_230] : memref<2x8x8x32xf32, #tpu.memory_space<vmem>>, vector<2x8x8x32xf32>
      tpu.vector_store %arg12[%c0_227, %c0_228, %c0_229, %c0_230], %176 {strides = array<i32>} : memref<2x8x8x32xf32, #tpu.memory_space<vmem>>, vector<2x8x8x32xf32>,
    } else {
    }
    %c0 = arith.constant 0 : index
    %c0_1 = arith.constant 0 : index
    %c0_2 = arith.constant 0 : index
    %c0_3 = arith.constant 0 : index
    %3 = vector.load %arg12[%c0, %c0_1, %c0_2, %c0_3] : memref<2x8x8x32xf32, #tpu.memory_space<vmem>>, vector<2x8x8x32xf32>
    %c0_4 = arith.constant 0 : index
    %c1 = arith.constant 1 : index
    %c0_5 = arith.constant 0 : index
    %c0_6 = arith.constant 0 : index
    %4 = vector.load %arg13[%c0_4, %c1, %c0_5, %c0_6] : memref<2x10x16x32xf32, #tpu.memory_space<vmem>>, vector<2x8x8x32xf32>
    tpu.vector_store %arg13[%c0_4, %c1, %c0_5, %c0_6], %3 {strides = array<i32>} : memref<2x10x16x32xf32, #tpu.memory_space<vmem>>, vector<2x8x8x32xf32>,
    %c0_7 = arith.constant 0 : index
    %c1_8 = arith.constant 1 : index
    %c8 = arith.constant 8 : index
    %c0_9 = arith.constant 0 : index
    %5 = vector.load %arg13[%c0_7, %c1_8, %c8, %c0_9] : memref<2x10x16x32xf32, #tpu.memory_space<vmem>>, vector<2x8x8x32xf32>
    tpu.vector_store %arg13[%c0_7, %c1_8, %c8, %c0_9], %3 {strides = array<i32>} : memref<2x10x16x32xf32, #tpu.memory_space<vmem>>, vector<2x8x8x32xf32>,
    %6 = vector.extract_strided_slice %3 {offsets = [0, 7, 0, 0], sizes = [2, 1, 8, 32], strides = [1, 1, 1, 1]} : vector<2x8x8x32xf32> to vector<2x1x8x32xf32>
    %c0_10 = arith.constant 0 : index
    %c0_11 = arith.constant 0 : index
    %c0_12 = arith.constant 0 : index
    %c0_13 = arith.constant 0 : index
    %7 = vector.load %arg13[%c0_10, %c0_11, %c0_12, %c0_13] : memref<2x10x16x32xf32, #tpu.memory_space<vmem>>, vector<2x1x8x32xf32>
    tpu.vector_store %arg13[%c0_10, %c0_11, %c0_12, %c0_13], %6 {strides = array<i32>} : memref<2x10x16x32xf32, #tpu.memory_space<vmem>>, vector<2x1x8x32xf32>,
    %8 = vector.extract_strided_slice %3 {offsets = [0, 7, 0, 0], sizes = [2, 1, 8, 32], strides = [1, 1, 1, 1]} : vector<2x8x8x32xf32> to vector<2x1x8x32xf32>
    %c0_14 = arith.constant 0 : index
    %c0_15 = arith.constant 0 : index
    %c8_16 = arith.constant 8 : index
    %c0_17 = arith.constant 0 : index
    %9 = vector.load %arg13[%c0_14, %c0_15, %c8_16, %c0_17] : memref<2x10x16x32xf32, #tpu.memory_space<vmem>>, vector<2x1x8x32xf32>
    tpu.vector_store %arg13[%c0_14, %c0_15, %c8_16, %c0_17], %8 {strides = array<i32>} : memref<2x10x16x32xf32, #tpu.memory_space<vmem>>, vector<2x1x8x32xf32>,
    %10 = vector.extract_strided_slice %3 {offsets = [0, 0, 0, 0], sizes = [2, 1, 8, 32], strides = [1, 1, 1, 1]} : vector<2x8x8x32xf32> to vector<2x1x8x32xf32>
    %c0_18 = arith.constant 0 : index
    %c9 = arith.constant 9 : index
    %c0_19 = arith.constant 0 : index
    %c0_20 = arith.constant 0 : index
    %11 = vector.load %arg13[%c0_18, %c9, %c0_19, %c0_20] : memref<2x10x16x32xf32, #tpu.memory_space<vmem>>, vector<2x1x8x32xf32>
    tpu.vector_store %arg13[%c0_18, %c9, %c0_19, %c0_20], %10 {strides = array<i32>} : memref<2x10x16x32xf32, #tpu.memory_space<vmem>>, vector<2x1x8x32xf32>,
    %12 = vector.extract_strided_slice %3 {offsets = [0, 0, 0, 0], sizes = [2, 1, 8, 32], strides = [1, 1, 1, 1]} : vector<2x8x8x32xf32> to vector<2x1x8x32xf32>
    %c0_21 = arith.constant 0 : index
    %c9_22 = arith.constant 9 : index
    %c8_23 = arith.constant 8 : index
    %c0_24 = arith.constant 0 : index
    %13 = vector.load %arg13[%c0_21, %c9_22, %c8_23, %c0_24] : memref<2x10x16x32xf32, #tpu.memory_space<vmem>>, vector<2x1x8x32xf32>
    tpu.vector_store %arg13[%c0_21, %c9_22, %c8_23, %c0_24], %12 {strides = array<i32>} : memref<2x10x16x32xf32, #tpu.memory_space<vmem>>, vector<2x1x8x32xf32>,
    %c0_25 = arith.constant 0 : index
    %c0_26 = arith.constant 0 : index
    %c7 = arith.constant 7 : index
    %c0_27 = arith.constant 0 : index
    %14 = vector.load %arg13[%c0_25, %c0_26, %c7, %c0_27] : memref<2x10x16x32xf32, #tpu.memory_space<vmem>>, vector<2x8x8x32xf32>
    %15 = vector.shape_cast %14 : vector<2x8x8x32xf32> to vector<128x32xf32>
    %16 = arith.truncf %15 : vector<128x32xf32> to vector<128x32xbf16>
    %c0_28 = arith.constant 0 : index
    %c0_29 = arith.constant 0 : index
    %c0_30 = arith.constant 0 : index
    %c0_31 = arith.constant 0 : index
    %17 = vector.load %arg2[%c0_28, %c0_29, %c0_30, %c0_31] : memref<1x9x32x32xbf16, #tpu.memory_space<vmem>>, vector<1x1x32x32xbf16>
    %18 = vector.shape_cast %17 : vector<1x1x32x32xbf16> to vector<32x32xbf16>
    %cst = arith.constant dense<0.000000e+00> : vector<128x32xf32>
    %19 = tpu.matmul %16, %18, %cst {dimension_numbers = #tpu.dot_dimension_numbers<[1], [0], [0], [1], [0, 0, 1, 1], [], []>} : vector<128x32xbf16>, vector<32x32xbf16>, vector<128x32xf32> -> vector<128x32xf32>
    %c0_32 = arith.constant 0 : index
    %c0_33 = arith.constant 0 : index
    %c0_34 = arith.constant 0 : index
    %c0_35 = arith.constant 0 : index
    %20 = vector.load %arg13[%c0_32, %c0_33, %c0_34, %c0_35] : memref<2x10x16x32xf32, #tpu.memory_space<vmem>>, vector<2x8x8x32xf32>
    %21 = vector.shape_cast %20 : vector<2x8x8x32xf32> to vector<128x32xf32>
    %22 = arith.truncf %21 : vector<128x32xf32> to vector<128x32xbf16>
    %c0_36 = arith.constant 0 : index
    %c1_37 = arith.constant 1 : index
    %c0_38 = arith.constant 0 : index
    %c0_39 = arith.constant 0 : index
    %23 = vector.load %arg2[%c0_36, %c1_37, %c0_38, %c0_39] : memref<1x9x32x32xbf16, #tpu.memory_space<vmem>>, vector<1x1x32x32xbf16>
    %24 = vector.shape_cast %23 : vector<1x1x32x32xbf16> to vector<32x32xbf16>
    %cst_40 = arith.constant dense<0.000000e+00> : vector<128x32xf32>
    %25 = tpu.matmul %22, %24, %cst_40 {dimension_numbers = #tpu.dot_dimension_numbers<[1], [0], [0], [1], [0, 0, 1, 1], [], []>} : vector<128x32xbf16>, vector<32x32xbf16>, vector<128x32xf32> -> vector<128x32xf32>
    %26 = arith.addf %19, %25 : vector<128x32xf32>
    %c0_41 = arith.constant 0 : index
    %c0_42 = arith.constant 0 : index
    %c1_43 = arith.constant 1 : index
    %c0_44 = arith.constant 0 : index
    %27 = vector.load %arg13[%c0_41, %c0_42, %c1_43, %c0_44] : memref<2x10x16x32xf32, #tpu.memory_space<vmem>>, vector<2x8x8x32xf32>
    %28 = vector.shape_cast %27 : vector<2x8x8x32xf32> to vector<128x32xf32>
    %29 = arith.truncf %28 : vector<128x32xf32> to vector<128x32xbf16>
    %c0_45 = arith.constant 0 : index
    %c2 = arith.constant 2 : index
    %c0_46 = arith.constant 0 : index
    %c0_47 = arith.constant 0 : index
    %30 = vector.load %arg2[%c0_45, %c2, %c0_46, %c0_47] : memref<1x9x32x32xbf16, #tpu.memory_space<vmem>>, vector<1x1x32x32xbf16>
    %31 = vector.shape_cast %30 : vector<1x1x32x32xbf16> to vector<32x32xbf16>
    %cst_48 = arith.constant dense<0.000000e+00> : vector<128x32xf32>
    %32 = tpu.matmul %29, %31, %cst_48 {dimension_numbers = #tpu.dot_dimension_numbers<[1], [0], [0], [1], [0, 0, 1, 1], [], []>} : vector<128x32xbf16>, vector<32x32xbf16>, vector<128x32xf32> -> vector<128x32xf32>
    %33 = arith.addf %26, %32 : vector<128x32xf32>
    %c0_49 = arith.constant 0 : index
    %c1_50 = arith.constant 1 : index
    %c7_51 = arith.constant 7 : index
    %c0_52 = arith.constant 0 : index
    %34 = vector.load %arg13[%c0_49, %c1_50, %c7_51, %c0_52] : memref<2x10x16x32xf32, #tpu.memory_space<vmem>>, vector<2x8x8x32xf32>
    %35 = vector.shape_cast %34 : vector<2x8x8x32xf32> to vector<128x32xf32>
    %36 = arith.truncf %35 : vector<128x32xf32> to vector<128x32xbf16>
    %c0_53 = arith.constant 0 : index
    %c3 = arith.constant 3 : index
    %c0_54 = arith.constant 0 : index
    %c0_55 = arith.constant 0 : index
    %37 = vector.load %arg2[%c0_53, %c3, %c0_54, %c0_55] : memref<1x9x32x32xbf16, #tpu.memory_space<vmem>>, vector<1x1x32x32xbf16>
    %38 = vector.shape_cast %37 : vector<1x1x32x32xbf16> to vector<32x32xbf16>
    %cst_56 = arith.constant dense<0.000000e+00> : vector<128x32xf32>
    %39 = tpu.matmul %36, %38, %cst_56 {dimension_numbers = #tpu.dot_dimension_numbers<[1], [0], [0], [1], [0, 0, 1, 1], [], []>} : vector<128x32xbf16>, vector<32x32xbf16>, vector<128x32xf32> -> vector<128x32xf32>
    %40 = arith.addf %33, %39 : vector<128x32xf32>
    %c0_57 = arith.constant 0 : index
    %c1_58 = arith.constant 1 : index
    %c0_59 = arith.constant 0 : index
    %c0_60 = arith.constant 0 : index
    %41 = vector.load %arg13[%c0_57, %c1_58, %c0_59, %c0_60] : memref<2x10x16x32xf32, #tpu.memory_space<vmem>>, vector<2x8x8x32xf32>
    %42 = vector.shape_cast %41 : vector<2x8x8x32xf32> to vector<128x32xf32>
    %43 = arith.truncf %42 : vector<128x32xf32> to vector<128x32xbf16>
    %c0_61 = arith.constant 0 : index
    %c4 = arith.constant 4 : index
    %c0_62 = arith.constant 0 : index
    %c0_63 = arith.constant 0 : index
    %44 = vector.load %arg2[%c0_61, %c4, %c0_62, %c0_63] : memref<1x9x32x32xbf16, #tpu.memory_space<vmem>>, vector<1x1x32x32xbf16>
    %45 = vector.shape_cast %44 : vector<1x1x32x32xbf16> to vector<32x32xbf16>
    %cst_64 = arith.constant dense<0.000000e+00> : vector<128x32xf32>
    %46 = tpu.matmul %43, %45, %cst_64 {dimension_numbers = #tpu.dot_dimension_numbers<[1], [0], [0], [1], [0, 0, 1, 1], [], []>} : vector<128x32xbf16>, vector<32x32xbf16>, vector<128x32xf32> -> vector<128x32xf32>
    %47 = arith.addf %40, %46 : vector<128x32xf32>
    %c0_65 = arith.constant 0 : index
    %c1_66 = arith.constant 1 : index
    %c1_67 = arith.constant 1 : index
    %c0_68 = arith.constant 0 : index
    %48 = vector.load %arg13[%c0_65, %c1_66, %c1_67, %c0_68] : memref<2x10x16x32xf32, #tpu.memory_space<vmem>>, vector<2x8x8x32xf32>
    %49 = vector.shape_cast %48 : vector<2x8x8x32xf32> to vector<128x32xf32>
    %50 = arith.truncf %49 : vector<128x32xf32> to vector<128x32xbf16>
    %c0_69 = arith.constant 0 : index
    %c5 = arith.constant 5 : index
    %c0_70 = arith.constant 0 : index
    %c0_71 = arith.constant 0 : index
    %51 = vector.load %arg2[%c0_69, %c5, %c0_70, %c0_71] : memref<1x9x32x32xbf16, #tpu.memory_space<vmem>>, vector<1x1x32x32xbf16>
    %52 = vector.shape_cast %51 : vector<1x1x32x32xbf16> to vector<32x32xbf16>
    %cst_72 = arith.constant dense<0.000000e+00> : vector<128x32xf32>
    %53 = tpu.matmul %50, %52, %cst_72 {dimension_numbers = #tpu.dot_dimension_numbers<[1], [0], [0], [1], [0, 0, 1, 1], [], []>} : vector<128x32xbf16>, vector<32x32xbf16>, vector<128x32xf32> -> vector<128x32xf32>
    %54 = arith.addf %47, %53 : vector<128x32xf32>
    %c0_73 = arith.constant 0 : index
    %c2_74 = arith.constant 2 : index
    %c7_75 = arith.constant 7 : index
    %c0_76 = arith.constant 0 : index
    %55 = vector.load %arg13[%c0_73, %c2_74, %c7_75, %c0_76] : memref<2x10x16x32xf32, #tpu.memory_space<vmem>>, vector<2x8x8x32xf32>
    %56 = vector.shape_cast %55 : vector<2x8x8x32xf32> to vector<128x32xf32>
    %57 = arith.truncf %56 : vector<128x32xf32> to vector<128x32xbf16>
    %c0_77 = arith.constant 0 : index
    %c6 = arith.constant 6 : index
    %c0_78 = arith.constant 0 : index
    %c0_79 = arith.constant 0 : index
    %58 = vector.load %arg2[%c0_77, %c6, %c0_78, %c0_79] : memref<1x9x32x32xbf16, #tpu.memory_space<vmem>>, vector<1x1x32x32xbf16>
    %59 = vector.shape_cast %58 : vector<1x1x32x32xbf16> to vector<32x32xbf16>
    %cst_80 = arith.constant dense<0.000000e+00> : vector<128x32xf32>
    %60 = tpu.matmul %57, %59, %cst_80 {dimension_numbers = #tpu.dot_dimension_numbers<[1], [0], [0], [1], [0, 0, 1, 1], [], []>} : vector<128x32xbf16>, vector<32x32xbf16>, vector<128x32xf32> -> vector<128x32xf32>
    %61 = arith.addf %54, %60 : vector<128x32xf32>
    %c0_81 = arith.constant 0 : index
    %c2_82 = arith.constant 2 : index
    %c0_83 = arith.constant 0 : index
    %c0_84 = arith.constant 0 : index
    %62 = vector.load %arg13[%c0_81, %c2_82, %c0_83, %c0_84] : memref<2x10x16x32xf32, #tpu.memory_space<vmem>>, vector<2x8x8x32xf32>
    %63 = vector.shape_cast %62 : vector<2x8x8x32xf32> to vector<128x32xf32>
    %64 = arith.truncf %63 : vector<128x32xf32> to vector<128x32xbf16>
    %c0_85 = arith.constant 0 : index
    %c7_86 = arith.constant 7 : index
    %c0_87 = arith.constant 0 : index
    %c0_88 = arith.constant 0 : index
    %65 = vector.load %arg2[%c0_85, %c7_86, %c0_87, %c0_88] : memref<1x9x32x32xbf16, #tpu.memory_space<vmem>>, vector<1x1x32x32xbf16>
    %66 = vector.shape_cast %65 : vector<1x1x32x32xbf16> to vector<32x32xbf16>
    %cst_89 = arith.constant dense<0.000000e+00> : vector<128x32xf32>
    %67 = tpu.matmul %64, %66, %cst_89 {dimension_numbers = #tpu.dot_dimension_numbers<[1], [0], [0], [1], [0, 0, 1, 1], [], []>} : vector<128x32xbf16>, vector<32x32xbf16>, vector<128x32xf32> -> vector<128x32xf32>
    %68 = arith.addf %61, %67 : vector<128x32xf32>
    %c0_90 = arith.constant 0 : index
    %c2_91 = arith.constant 2 : index
    %c1_92 = arith.constant 1 : index
    %c0_93 = arith.constant 0 : index
    %69 = vector.load %arg13[%c0_90, %c2_91, %c1_92, %c0_93] : memref<2x10x16x32xf32, #tpu.memory_space<vmem>>, vector<2x8x8x32xf32>
    %70 = vector.shape_cast %69 : vector<2x8x8x32xf32> to vector<128x32xf32>
    %71 = arith.truncf %70 : vector<128x32xf32> to vector<128x32xbf16>
    %c0_94 = arith.constant 0 : index
    %c8_95 = arith.constant 8 : index
    %c0_96 = arith.constant 0 : index
    %c0_97 = arith.constant 0 : index
    %72 = vector.load %arg2[%c0_94, %c8_95, %c0_96, %c0_97] : memref<1x9x32x32xbf16, #tpu.memory_space<vmem>>, vector<1x1x32x32xbf16>
    %73 = vector.shape_cast %72 : vector<1x1x32x32xbf16> to vector<32x32xbf16>
    %cst_98 = arith.constant dense<0.000000e+00> : vector<128x32xf32>
    %74 = tpu.matmul %71, %73, %cst_98 {dimension_numbers = #tpu.dot_dimension_numbers<[1], [0], [0], [1], [0, 0, 1, 1], [], []>} : vector<128x32xbf16>, vector<32x32xbf16>, vector<128x32xf32> -> vector<128x32xf32>
    %75 = arith.addf %68, %74 : vector<128x32xf32>
    %c0_99 = arith.constant 0 : index
    %c0_100 = arith.constant 0 : index
    %c0_101 = arith.constant 0 : index
    %76 = vector.load %arg3[%c0_99, %c0_100, %c0_101] : memref<1x1x32xf32, #tpu.memory_space<vmem>>, vector<1x1x32xf32>
    %77 = vector.shape_cast %76 : vector<1x1x32xf32> to vector<1x32xf32>
    %78 = vector.broadcast %77 : vector<1x32xf32> to vector<128x32xf32>
    %79 = arith.mulf %75, %78 : vector<128x32xf32>
    %c0_102 = arith.constant 0 : index
    %c0_103 = arith.constant 0 : index
    %c0_104 = arith.constant 0 : index
    %80 = vector.load %arg4[%c0_102, %c0_103, %c0_104] : memref<1x1x32xf32, #tpu.memory_space<vmem>>, vector<1x1x32xf32>
    %81 = vector.shape_cast %80 : vector<1x1x32xf32> to vector<1x32xf32>
    %82 = vector.broadcast %81 : vector<1x32xf32> to vector<128x32xf32>
    %83 = arith.addf %79, %82 : vector<128x32xf32>
    %cst_105 = arith.constant 0.000000e+00 : f32
    %84 = vector.broadcast %cst_105 : f32 to vector<128x32xf32>
    %85 = arith.maximumf %83, %84 : vector<128x32xf32>
    %86 = vector.shape_cast %85 : vector<128x32xf32> to vector<2x8x8x32xf32>
    %c0_106 = arith.constant 0 : index
    %c1_107 = arith.constant 1 : index
    %c0_108 = arith.constant 0 : index
    %c0_109 = arith.constant 0 : index
    %87 = vector.load %arg13[%c0_106, %c1_107, %c0_108, %c0_109] : memref<2x10x16x32xf32, #tpu.memory_space<vmem>>, vector<2x8x8x32xf32>
    tpu.vector_store %arg13[%c0_106, %c1_107, %c0_108, %c0_109], %86 {strides = array<i32>} : memref<2x10x16x32xf32, #tpu.memory_space<vmem>>, vector<2x8x8x32xf32>,
    %c0_110 = arith.constant 0 : index
    %c1_111 = arith.constant 1 : index
    %c8_112 = arith.constant 8 : index
    %c0_113 = arith.constant 0 : index
    %88 = vector.load %arg13[%c0_110, %c1_111, %c8_112, %c0_113] : memref<2x10x16x32xf32, #tpu.memory_space<vmem>>, vector<2x8x8x32xf32>
    tpu.vector_store %arg13[%c0_110, %c1_111, %c8_112, %c0_113], %86 {strides = array<i32>} : memref<2x10x16x32xf32, #tpu.memory_space<vmem>>, vector<2x8x8x32xf32>,
    %89 = vector.extract_strided_slice %86 {offsets = [0, 7, 0, 0], sizes = [2, 1, 8, 32], strides = [1, 1, 1, 1]} : vector<2x8x8x32xf32> to vector<2x1x8x32xf32>
    %c0_114 = arith.constant 0 : index
    %c0_115 = arith.constant 0 : index
    %c0_116 = arith.constant 0 : index
    %c0_117 = arith.constant 0 : index
    %90 = vector.load %arg13[%c0_114, %c0_115, %c0_116, %c0_117] : memref<2x10x16x32xf32, #tpu.memory_space<vmem>>, vector<2x1x8x32xf32>
    tpu.vector_store %arg13[%c0_114, %c0_115, %c0_116, %c0_117], %89 {strides = array<i32>} : memref<2x10x16x32xf32, #tpu.memory_space<vmem>>, vector<2x1x8x32xf32>,
    %91 = vector.extract_strided_slice %86 {offsets = [0, 7, 0, 0], sizes = [2, 1, 8, 32], strides = [1, 1, 1, 1]} : vector<2x8x8x32xf32> to vector<2x1x8x32xf32>
    %c0_118 = arith.constant 0 : index
    %c0_119 = arith.constant 0 : index
    %c8_120 = arith.constant 8 : index
    %c0_121 = arith.constant 0 : index
    %92 = vector.load %arg13[%c0_118, %c0_119, %c8_120, %c0_121] : memref<2x10x16x32xf32, #tpu.memory_space<vmem>>, vector<2x1x8x32xf32>
    tpu.vector_store %arg13[%c0_118, %c0_119, %c8_120, %c0_121], %91 {strides = array<i32>} : memref<2x10x16x32xf32, #tpu.memory_space<vmem>>, vector<2x1x8x32xf32>,
    %93 = vector.extract_strided_slice %86 {offsets = [0, 0, 0, 0], sizes = [2, 1, 8, 32], strides = [1, 1, 1, 1]} : vector<2x8x8x32xf32> to vector<2x1x8x32xf32>
    %c0_122 = arith.constant 0 : index
    %c9_123 = arith.constant 9 : index
    %c0_124 = arith.constant 0 : index
    %c0_125 = arith.constant 0 : index
    %94 = vector.load %arg13[%c0_122, %c9_123, %c0_124, %c0_125] : memref<2x10x16x32xf32, #tpu.memory_space<vmem>>, vector<2x1x8x32xf32>
    tpu.vector_store %arg13[%c0_122, %c9_123, %c0_124, %c0_125], %93 {strides = array<i32>} : memref<2x10x16x32xf32, #tpu.memory_space<vmem>>, vector<2x1x8x32xf32>,
    %95 = vector.extract_strided_slice %86 {offsets = [0, 0, 0, 0], sizes = [2, 1, 8, 32], strides = [1, 1, 1, 1]} : vector<2x8x8x32xf32> to vector<2x1x8x32xf32>
    %c0_126 = arith.constant 0 : index
    %c9_127 = arith.constant 9 : index
    %c8_128 = arith.constant 8 : index
    %c0_129 = arith.constant 0 : index
    %96 = vector.load %arg13[%c0_126, %c9_127, %c8_128, %c0_129] : memref<2x10x16x32xf32, #tpu.memory_space<vmem>>, vector<2x1x8x32xf32>
    tpu.vector_store %arg13[%c0_126, %c9_127, %c8_128, %c0_129], %95 {strides = array<i32>} : memref<2x10x16x32xf32, #tpu.memory_space<vmem>>, vector<2x1x8x32xf32>,
    %c0_130 = arith.constant 0 : index
    %c0_131 = arith.constant 0 : index
    %c7_132 = arith.constant 7 : index
    %c0_133 = arith.constant 0 : index
    %97 = vector.load %arg13[%c0_130, %c0_131, %c7_132, %c0_133] : memref<2x10x16x32xf32, #tpu.memory_space<vmem>>, vector<2x8x8x32xf32>
    %98 = vector.shape_cast %97 : vector<2x8x8x32xf32> to vector<128x32xf32>
    %99 = arith.truncf %98 : vector<128x32xf32> to vector<128x32xbf16>
    %c0_134 = arith.constant 0 : index
    %c0_135 = arith.constant 0 : index
    %c0_136 = arith.constant 0 : index
    %c0_137 = arith.constant 0 : index
    %100 = vector.load %arg5[%c0_134, %c0_135, %c0_136, %c0_137] : memref<1x9x32x32xbf16, #tpu.memory_space<vmem>>, vector<1x1x32x32xbf16>
    %101 = vector.shape_cast %100 : vector<1x1x32x32xbf16> to vector<32x32xbf16>
    %cst_138 = arith.constant dense<0.000000e+00> : vector<128x32xf32>
    %102 = tpu.matmul %99, %101, %cst_138 {dimension_numbers = #tpu.dot_dimension_numbers<[1], [0], [0], [1], [0, 0, 1, 1], [], []>} : vector<128x32xbf16>, vector<32x32xbf16>, vector<128x32xf32> -> vector<128x32xf32>
    %c0_139 = arith.constant 0 : index
    %c0_140 = arith.constant 0 : index
    %c0_141 = arith.constant 0 : index
    %c0_142 = arith.constant 0 : index
    %103 = vector.load %arg13[%c0_139, %c0_140, %c0_141, %c0_142] : memref<2x10x16x32xf32, #tpu.memory_space<vmem>>, vector<2x8x8x32xf32>
    %104 = vector.shape_cast %103 : vector<2x8x8x32xf32> to vector<128x32xf32>
    %105 = arith.truncf %104 : vector<128x32xf32> to vector<128x32xbf16>
    %c0_143 = arith.constant 0 : index
    %c1_144 = arith.constant 1 : index
    %c0_145 = arith.constant 0 : index
    %c0_146 = arith.constant 0 : index
    %106 = vector.load %arg5[%c0_143, %c1_144, %c0_145, %c0_146] : memref<1x9x32x32xbf16, #tpu.memory_space<vmem>>, vector<1x1x32x32xbf16>
    %107 = vector.shape_cast %106 : vector<1x1x32x32xbf16> to vector<32x32xbf16>
    %cst_147 = arith.constant dense<0.000000e+00> : vector<128x32xf32>
    %108 = tpu.matmul %105, %107, %cst_147 {dimension_numbers = #tpu.dot_dimension_numbers<[1], [0], [0], [1], [0, 0, 1, 1], [], []>} : vector<128x32xbf16>, vector<32x32xbf16>, vector<128x32xf32> -> vector<128x32xf32>
    %109 = arith.addf %102, %108 : vector<128x32xf32>
    %c0_148 = arith.constant 0 : index
    %c0_149 = arith.constant 0 : index
    %c1_150 = arith.constant 1 : index
    %c0_151 = arith.constant 0 : index
    %110 = vector.load %arg13[%c0_148, %c0_149, %c1_150, %c0_151] : memref<2x10x16x32xf32, #tpu.memory_space<vmem>>, vector<2x8x8x32xf32>
    %111 = vector.shape_cast %110 : vector<2x8x8x32xf32> to vector<128x32xf32>
    %112 = arith.truncf %111 : vector<128x32xf32> to vector<128x32xbf16>
    %c0_152 = arith.constant 0 : index
    %c2_153 = arith.constant 2 : index
    %c0_154 = arith.constant 0 : index
    %c0_155 = arith.constant 0 : index
    %113 = vector.load %arg5[%c0_152, %c2_153, %c0_154, %c0_155] : memref<1x9x32x32xbf16, #tpu.memory_space<vmem>>, vector<1x1x32x32xbf16>
    %114 = vector.shape_cast %113 : vector<1x1x32x32xbf16> to vector<32x32xbf16>
    %cst_156 = arith.constant dense<0.000000e+00> : vector<128x32xf32>
    %115 = tpu.matmul %112, %114, %cst_156 {dimension_numbers = #tpu.dot_dimension_numbers<[1], [0], [0], [1], [0, 0, 1, 1], [], []>} : vector<128x32xbf16>, vector<32x32xbf16>, vector<128x32xf32> -> vector<128x32xf32>
    %116 = arith.addf %109, %115 : vector<128x32xf32>
    %c0_157 = arith.constant 0 : index
    %c1_158 = arith.constant 1 : index
    %c7_159 = arith.constant 7 : index
    %c0_160 = arith.constant 0 : index
    %117 = vector.load %arg13[%c0_157, %c1_158, %c7_159, %c0_160] : memref<2x10x16x32xf32, #tpu.memory_space<vmem>>, vector<2x8x8x32xf32>
    %118 = vector.shape_cast %117 : vector<2x8x8x32xf32> to vector<128x32xf32>
    %119 = arith.truncf %118 : vector<128x32xf32> to vector<128x32xbf16>
    %c0_161 = arith.constant 0 : index
    %c3_162 = arith.constant 3 : index
    %c0_163 = arith.constant 0 : index
    %c0_164 = arith.constant 0 : index
    %120 = vector.load %arg5[%c0_161, %c3_162, %c0_163, %c0_164] : memref<1x9x32x32xbf16, #tpu.memory_space<vmem>>, vector<1x1x32x32xbf16>
    %121 = vector.shape_cast %120 : vector<1x1x32x32xbf16> to vector<32x32xbf16>
    %cst_165 = arith.constant dense<0.000000e+00> : vector<128x32xf32>
    %122 = tpu.matmul %119, %121, %cst_165 {dimension_numbers = #tpu.dot_dimension_numbers<[1], [0], [0], [1], [0, 0, 1, 1], [], []>} : vector<128x32xbf16>, vector<32x32xbf16>, vector<128x32xf32> -> vector<128x32xf32>
    %123 = arith.addf %116, %122 : vector<128x32xf32>
    %c0_166 = arith.constant 0 : index
    %c1_167 = arith.constant 1 : index
    %c0_168 = arith.constant 0 : index
    %c0_169 = arith.constant 0 : index
    %124 = vector.load %arg13[%c0_166, %c1_167, %c0_168, %c0_169] : memref<2x10x16x32xf32, #tpu.memory_space<vmem>>, vector<2x8x8x32xf32>
    %125 = vector.shape_cast %124 : vector<2x8x8x32xf32> to vector<128x32xf32>
    %126 = arith.truncf %125 : vector<128x32xf32> to vector<128x32xbf16>
    %c0_170 = arith.constant 0 : index
    %c4_171 = arith.constant 4 : index
    %c0_172 = arith.constant 0 : index
    %c0_173 = arith.constant 0 : index
    %127 = vector.load %arg5[%c0_170, %c4_171, %c0_172, %c0_173] : memref<1x9x32x32xbf16, #tpu.memory_space<vmem>>, vector<1x1x32x32xbf16>
    %128 = vector.shape_cast %127 : vector<1x1x32x32xbf16> to vector<32x32xbf16>
    %cst_174 = arith.constant dense<0.000000e+00> : vector<128x32xf32>
    %129 = tpu.matmul %126, %128, %cst_174 {dimension_numbers = #tpu.dot_dimension_numbers<[1], [0], [0], [1], [0, 0, 1, 1], [], []>} : vector<128x32xbf16>, vector<32x32xbf16>, vector<128x32xf32> -> vector<128x32xf32>
    %130 = arith.addf %123, %129 : vector<128x32xf32>
    %c0_175 = arith.constant 0 : index
    %c1_176 = arith.constant 1 : index
    %c1_177 = arith.constant 1 : index
    %c0_178 = arith.constant 0 : index
    %131 = vector.load %arg13[%c0_175, %c1_176, %c1_177, %c0_178] : memref<2x10x16x32xf32, #tpu.memory_space<vmem>>, vector<2x8x8x32xf32>
    %132 = vector.shape_cast %131 : vector<2x8x8x32xf32> to vector<128x32xf32>
    %133 = arith.truncf %132 : vector<128x32xf32> to vector<128x32xbf16>
    %c0_179 = arith.constant 0 : index
    %c5_180 = arith.constant 5 : index
    %c0_181 = arith.constant 0 : index
    %c0_182 = arith.constant 0 : index
    %134 = vector.load %arg5[%c0_179, %c5_180, %c0_181, %c0_182] : memref<1x9x32x32xbf16, #tpu.memory_space<vmem>>, vector<1x1x32x32xbf16>
    %135 = vector.shape_cast %134 : vector<1x1x32x32xbf16> to vector<32x32xbf16>
    %cst_183 = arith.constant dense<0.000000e+00> : vector<128x32xf32>
    %136 = tpu.matmul %133, %135, %cst_183 {dimension_numbers = #tpu.dot_dimension_numbers<[1], [0], [0], [1], [0, 0, 1, 1], [], []>} : vector<128x32xbf16>, vector<32x32xbf16>, vector<128x32xf32> -> vector<128x32xf32>
    %137 = arith.addf %130, %136 : vector<128x32xf32>
    %c0_184 = arith.constant 0 : index
    %c2_185 = arith.constant 2 : index
    %c7_186 = arith.constant 7 : index
    %c0_187 = arith.constant 0 : index
    %138 = vector.load %arg13[%c0_184, %c2_185, %c7_186, %c0_187] : memref<2x10x16x32xf32, #tpu.memory_space<vmem>>, vector<2x8x8x32xf32>
    %139 = vector.shape_cast %138 : vector<2x8x8x32xf32> to vector<128x32xf32>
    %140 = arith.truncf %139 : vector<128x32xf32> to vector<128x32xbf16>
    %c0_188 = arith.constant 0 : index
    %c6_189 = arith.constant 6 : index
    %c0_190 = arith.constant 0 : index
    %c0_191 = arith.constant 0 : index
    %141 = vector.load %arg5[%c0_188, %c6_189, %c0_190, %c0_191] : memref<1x9x32x32xbf16, #tpu.memory_space<vmem>>, vector<1x1x32x32xbf16>
    %142 = vector.shape_cast %141 : vector<1x1x32x32xbf16> to vector<32x32xbf16>
    %cst_192 = arith.constant dense<0.000000e+00> : vector<128x32xf32>
    %143 = tpu.matmul %140, %142, %cst_192 {dimension_numbers = #tpu.dot_dimension_numbers<[1], [0], [0], [1], [0, 0, 1, 1], [], []>} : vector<128x32xbf16>, vector<32x32xbf16>, vector<128x32xf32> -> vector<128x32xf32>
    %144 = arith.addf %137, %143 : vector<128x32xf32>
    %c0_193 = arith.constant 0 : index
    %c2_194 = arith.constant 2 : index
    %c0_195 = arith.constant 0 : index
    %c0_196 = arith.constant 0 : index
    %145 = vector.load %arg13[%c0_193, %c2_194, %c0_195, %c0_196] : memref<2x10x16x32xf32, #tpu.memory_space<vmem>>, vector<2x8x8x32xf32>
    %146 = vector.shape_cast %145 : vector<2x8x8x32xf32> to vector<128x32xf32>
    %147 = arith.truncf %146 : vector<128x32xf32> to vector<128x32xbf16>
    %c0_197 = arith.constant 0 : index
    %c7_198 = arith.constant 7 : index
    %c0_199 = arith.constant 0 : index
    %c0_200 = arith.constant 0 : index
    %148 = vector.load %arg5[%c0_197, %c7_198, %c0_199, %c0_200] : memref<1x9x32x32xbf16, #tpu.memory_space<vmem>>, vector<1x1x32x32xbf16>
    %149 = vector.shape_cast %148 : vector<1x1x32x32xbf16> to vector<32x32xbf16>
    %cst_201 = arith.constant dense<0.000000e+00> : vector<128x32xf32>
    %150 = tpu.matmul %147, %149, %cst_201 {dimension_numbers = #tpu.dot_dimension_numbers<[1], [0], [0], [1], [0, 0, 1, 1], [], []>} : vector<128x32xbf16>, vector<32x32xbf16>, vector<128x32xf32> -> vector<128x32xf32>
    %151 = arith.addf %144, %150 : vector<128x32xf32>
    %c0_202 = arith.constant 0 : index
    %c2_203 = arith.constant 2 : index
    %c1_204 = arith.constant 1 : index
    %c0_205 = arith.constant 0 : index
    %152 = vector.load %arg13[%c0_202, %c2_203, %c1_204, %c0_205] : memref<2x10x16x32xf32, #tpu.memory_space<vmem>>, vector<2x8x8x32xf32>
    %153 = vector.shape_cast %152 : vector<2x8x8x32xf32> to vector<128x32xf32>
    %154 = arith.truncf %153 : vector<128x32xf32> to vector<128x32xbf16>
    %c0_206 = arith.constant 0 : index
    %c8_207 = arith.constant 8 : index
    %c0_208 = arith.constant 0 : index
    %c0_209 = arith.constant 0 : index
    %155 = vector.load %arg5[%c0_206, %c8_207, %c0_208, %c0_209] : memref<1x9x32x32xbf16, #tpu.memory_space<vmem>>, vector<1x1x32x32xbf16>
    %156 = vector.shape_cast %155 : vector<1x1x32x32xbf16> to vector<32x32xbf16>
    %cst_210 = arith.constant dense<0.000000e+00> : vector<128x32xf32>
    %157 = tpu.matmul %154, %156, %cst_210 {dimension_numbers = #tpu.dot_dimension_numbers<[1], [0], [0], [1], [0, 0, 1, 1], [], []>} : vector<128x32xbf16>, vector<32x32xbf16>, vector<128x32xf32> -> vector<128x32xf32>
    %158 = arith.addf %151, %157 : vector<128x32xf32>
    %c0_211 = arith.constant 0 : index
    %c0_212 = arith.constant 0 : index
    %c0_213 = arith.constant 0 : index
    %159 = vector.load %arg6[%c0_211, %c0_212, %c0_213] : memref<1x1x32xf32, #tpu.memory_space<vmem>>, vector<1x1x32xf32>
    %160 = vector.shape_cast %159 : vector<1x1x32xf32> to vector<1x32xf32>
    %161 = vector.broadcast %160 : vector<1x32xf32> to vector<128x32xf32>
    %162 = arith.mulf %158, %161 : vector<128x32xf32>
    %c0_214 = arith.constant 0 : index
    %c0_215 = arith.constant 0 : index
    %c0_216 = arith.constant 0 : index
    %163 = vector.load %arg7[%c0_214, %c0_215, %c0_216] : memref<1x1x32xf32, #tpu.memory_space<vmem>>, vector<1x1x32xf32>
    %164 = vector.shape_cast %163 : vector<1x1x32xf32> to vector<1x32xf32>
    %165 = vector.broadcast %164 : vector<1x32xf32> to vector<128x32xf32>
    %166 = arith.addf %162, %165 : vector<128x32xf32>
    %167 = vector.shape_cast %3 : vector<2x8x8x32xf32> to vector<128x32xf32>
    %168 = arith.addf %166, %167 : vector<128x32xf32>
    %cst_217 = arith.constant 0.000000e+00 : f32
    %169 = vector.broadcast %cst_217 : f32 to vector<128x32xf32>
    %170 = arith.maximumf %168, %169 : vector<128x32xf32>
    %171 = vector.shape_cast %170 : vector<128x32xf32> to vector<2x8x8x32xf32>
    %c0_218 = arith.constant 0 : index
    %c0_219 = arith.constant 0 : index
    %c0_220 = arith.constant 0 : index
    %c0_221 = arith.constant 0 : index
    %172 = vector.load %arg12[%c0_218, %c0_219, %c0_220, %c0_221] : memref<2x8x8x32xf32, #tpu.memory_space<vmem>>, vector<2x8x8x32xf32>
    tpu.vector_store %arg12[%c0_218, %c0_219, %c0_220, %c0_221], %171 {strides = array<i32>} : memref<2x8x8x32xf32, #tpu.memory_space<vmem>>, vector<2x8x8x32xf32>,
    %c20_i32 = arith.constant 20 : i32
    %173 = arith.cmpi eq, %arg0, %c20_i32 : i32
    %174 = arith.extui %173 : i1 to i32
    %c0_i32_222 = arith.constant 0 : i32
    %175 = arith.cmpi ne, %174, %c0_i32_222 : i32
    scf.if %175 {
      %176 = arith.truncf %170 : vector<128x32xf32> to vector<128x32xbf16>
      %c0_223 = arith.constant 0 : index
      %c0_224 = arith.constant 0 : index
      %177 = vector.load %arg8[%c0_223, %c0_224] : memref<32x128xbf16, #tpu.memory_space<vmem>>, vector<32x128xbf16>
      %cst_225 = arith.constant dense<0.000000e+00> : vector<128x128xf32>
      %178 = tpu.matmul %176, %177, %cst_225 {dimension_numbers = #tpu.dot_dimension_numbers<[1], [0], [0], [1], [0, 0, 1, 1], [], []>} : vector<128x32xbf16>, vector<32x128xbf16>, vector<128x128xf32> -> vector<128x128xf32>
      %c0_226 = arith.constant 0 : index
      %c0_227 = arith.constant 0 : index
      %179 = vector.load %arg9[%c0_226, %c0_227] : memref<1x128xf32, #tpu.memory_space<vmem>>, vector<1x128xf32>
      %180 = vector.broadcast %179 : vector<1x128xf32> to vector<128x128xf32>
      %181 = arith.mulf %178, %180 : vector<128x128xf32>
      %c0_228 = arith.constant 0 : index
      %c0_229 = arith.constant 0 : index
      %182 = vector.load %arg10[%c0_228, %c0_229] : memref<1x128xf32, #tpu.memory_space<vmem>>, vector<1x128xf32>
      %183 = vector.broadcast %182 : vector<1x128xf32> to vector<128x128xf32>
      %184 = arith.addf %181, %183 : vector<128x128xf32>
      %185 = tpu.iota {dimensions = array<i32: 1>} : vector<128x128xi32>
      %c0_i32_230 = arith.constant 0 : i32
      %186 = vector.broadcast %c0_i32_230 : i32 to vector<128x128xi32>
      %187 = arith.cmpi sge, %185, %186 : vector<128x128xi32>
      %c12_i32 = arith.constant 12 : i32
      %188 = vector.broadcast %c12_i32 : i32 to vector<128x128xi32>
      %189 = arith.cmpi slt, %185, %188 : vector<128x128xi32>
      %190 = arith.andi %187, %189 : vector<128x128xi1>
      %cst_231 = arith.constant 0xFF800000 : f32
      %191 = vector.broadcast %cst_231 : f32 to vector<128x128xf32>
      %192 = arith.select %190, %184, %191 : vector<128x128xi1>, vector<128x128xf32>
      %cst_232 = arith.constant dense<0xFF800000> : vector<128xf32>
      %193 = vector.multi_reduction <maximumf>, %192, %cst_232 [1] : vector<128x128xf32> to vector<128xf32>
      %194 = vector.shape_cast %193 : vector<128xf32> to vector<128x1xf32>
      %195 = vector.broadcast %194 : vector<128x1xf32> to vector<128x128xf32>
      %196 = arith.subf %192, %195 : vector<128x128xf32>
      %197 = math.exp %196 : vector<128x128xf32>
      %cst_233 = arith.constant dense<0.000000e+00> : vector<128xf32>
      %198 = vector.multi_reduction <add>, %197, %cst_233 [1] : vector<128x128xf32> to vector<128xf32>
      %199 = vector.shape_cast %198 : vector<128xf32> to vector<128x1xf32>
      %200 = vector.broadcast %199 : vector<128x1xf32> to vector<128x128xf32>
      %201 = arith.divf %197, %200 : vector<128x128xf32>
      %cst_234 = arith.constant 0.000000e+00 : f32
      %202 = vector.broadcast %cst_234 : f32 to vector<128x128xf32>
      %203 = arith.subf %202, %184 : vector<128x128xf32>
      %204 = math.exp %203 : vector<128x128xf32>
      %cst_235 = arith.constant 1.000000e+00 : f32
      %205 = vector.broadcast %cst_235 : f32 to vector<128x128xf32>
      %206 = arith.addf %205, %204 : vector<128x128xf32>
      %cst_236 = arith.constant 1.000000e+00 : f32
      %207 = vector.broadcast %cst_236 : f32 to vector<128x128xf32>
      %208 = arith.divf %207, %206 : vector<128x128xf32>
      %c15_i32 = arith.constant 15 : i32
      %209 = vector.broadcast %c15_i32 : i32 to vector<128x128xi32>
      %210 = arith.cmpi sge, %185, %209 : vector<128x128xi32>
      %c20_i32_237 = arith.constant 20 : i32
      %211 = vector.broadcast %c20_i32_237 : i32 to vector<128x128xi32>
      %212 = arith.cmpi slt, %185, %211 : vector<128x128xi32>
      %213 = arith.andi %210, %212 : vector<128x128xi1>
      %cst_238 = arith.constant 0xFF800000 : f32
      %214 = vector.broadcast %cst_238 : f32 to vector<128x128xf32>
      %215 = arith.select %213, %184, %214 : vector<128x128xi1>, vector<128x128xf32>
      %cst_239 = arith.constant dense<0xFF800000> : vector<128xf32>
      %216 = vector.multi_reduction <maximumf>, %215, %cst_239 [1] : vector<128x128xf32> to vector<128xf32>
      %217 = vector.shape_cast %216 : vector<128xf32> to vector<128x1xf32>
      %218 = vector.broadcast %217 : vector<128x1xf32> to vector<128x128xf32>
      %219 = arith.subf %215, %218 : vector<128x128xf32>
      %220 = math.exp %219 : vector<128x128xf32>
      %cst_240 = arith.constant dense<0.000000e+00> : vector<128xf32>
      %221 = vector.multi_reduction <add>, %220, %cst_240 [1] : vector<128x128xf32> to vector<128xf32>
      %222 = vector.shape_cast %221 : vector<128xf32> to vector<128x1xf32>
      %223 = vector.broadcast %222 : vector<128x1xf32> to vector<128x128xf32>
      %224 = arith.divf %220, %223 : vector<128x128xf32>
      %c20_i32_241 = arith.constant 20 : i32
      %225 = vector.broadcast %c20_i32_241 : i32 to vector<128x128xi32>
      %226 = arith.cmpi sge, %185, %225 : vector<128x128xi32>
      %c28_i32 = arith.constant 28 : i32
      %227 = vector.broadcast %c28_i32 : i32 to vector<128x128xi32>
      %228 = arith.cmpi slt, %185, %227 : vector<128x128xi32>
      %229 = arith.andi %226, %228 : vector<128x128xi1>
      %cst_242 = arith.constant 0xFF800000 : f32
      %230 = vector.broadcast %cst_242 : f32 to vector<128x128xf32>
      %231 = arith.select %229, %184, %230 : vector<128x128xi1>, vector<128x128xf32>
      %cst_243 = arith.constant dense<0xFF800000> : vector<128xf32>
      %232 = vector.multi_reduction <maximumf>, %231, %cst_243 [1] : vector<128x128xf32> to vector<128xf32>
      %233 = vector.shape_cast %232 : vector<128xf32> to vector<128x1xf32>
      %234 = vector.broadcast %233 : vector<128x1xf32> to vector<128x128xf32>
      %235 = arith.subf %231, %234 : vector<128x128xf32>
      %236 = math.exp %235 : vector<128x128xf32>
      %cst_244 = arith.constant dense<0.000000e+00> : vector<128xf32>
      %237 = vector.multi_reduction <add>, %236, %cst_244 [1] : vector<128x128xf32> to vector<128xf32>
      %238 = vector.shape_cast %237 : vector<128xf32> to vector<128x1xf32>
      %239 = vector.broadcast %238 : vector<128x1xf32> to vector<128x128xf32>
      %240 = arith.divf %236, %239 : vector<128x128xf32>
      %c12_i32_245 = arith.constant 12 : i32
      %241 = vector.broadcast %c12_i32_245 : i32 to vector<128x128xi32>
      %242 = arith.cmpi slt, %185, %241 : vector<128x128xi32>
      %c15_i32_246 = arith.constant 15 : i32
      %243 = vector.broadcast %c15_i32_246 : i32 to vector<128x128xi32>
      %244 = arith.cmpi slt, %185, %243 : vector<128x128xi32>
      %c20_i32_247 = arith.constant 20 : i32
      %245 = vector.broadcast %c20_i32_247 : i32 to vector<128x128xi32>
      %246 = arith.cmpi slt, %185, %245 : vector<128x128xi32>
      %247 = arith.select %246, %224, %240 : vector<128x128xi1>, vector<128x128xf32>
      %248 = arith.select %244, %208, %247 : vector<128x128xi1>, vector<128x128xf32>
      %249 = arith.select %242, %201, %248 : vector<128x128xi1>, vector<128x128xf32>
      %250 = vector.shape_cast %249 : vector<128x128xf32> to vector<2x8x8x128xf32>
      %c0_248 = arith.constant 0 : index
      %c0_249 = arith.constant 0 : index
      %c0_250 = arith.constant 0 : index
      %c0_251 = arith.constant 0 : index
      %251 = vector.load %arg11[%c0_248, %c0_249, %c0_250, %c0_251] : memref<2x8x8x128xf32, #tpu.memory_space<vmem>>, vector<2x8x8x128xf32>
      tpu.vector_store %arg11[%c0_248, %c0_249, %c0_250, %c0_251], %250 {strides = array<i32>} : memref<2x8x8x128xf32, #tpu.memory_space<vmem>>, vector<2x8x8x128xf32>,
    } else {
    }
    return
  }
  func.func @transform_0(%arg0: i32) -> (i32, i32, i32, i32) {
    %c0_i32 = arith.constant 0 : i32
    %c0_i32_0 = arith.constant 0 : i32
    %c0_i32_1 = arith.constant 0 : i32
    %c0_i32_2 = arith.constant 0 : i32
    %c0_i32_3 = arith.constant 0 : i32
    return %c0_i32, %c0_i32_0, %c0_i32_1, %c0_i32_2 : i32, i32, i32, i32
  }
  func.func @transform_1(%arg0: i32) -> (i32, i32, i32, i32) {
    %c0_i32 = arith.constant 0 : i32
    %c0_i32_0 = arith.constant 0 : i32
    %c0_i32_1 = arith.constant 0 : i32
    %c0_i32_2 = arith.constant 0 : i32
    return %arg0, %c0_i32, %c0_i32_0, %c0_i32_1 : i32, i32, i32, i32
  }
  func.func @transform_2(%arg0: i32) -> (i32, i32, i32) {
    %c0_i32 = arith.constant 0 : i32
    %c0_i32_0 = arith.constant 0 : i32
    %c0_i32_1 = arith.constant 0 : i32
    return %arg0, %c0_i32, %c0_i32_0 : i32, i32, i32
  }
  func.func @transform_3(%arg0: i32) -> (i32, i32, i32) {
    %c0_i32 = arith.constant 0 : i32
    %c0_i32_0 = arith.constant 0 : i32
    %c0_i32_1 = arith.constant 0 : i32
    return %arg0, %c0_i32, %c0_i32_0 : i32, i32, i32
  }
  func.func @transform_4(%arg0: i32) -> (i32, i32, i32, i32) {
    %c0_i32 = arith.constant 0 : i32
    %c0_i32_0 = arith.constant 0 : i32
    %c0_i32_1 = arith.constant 0 : i32
    %c0_i32_2 = arith.constant 0 : i32
    return %arg0, %c0_i32, %c0_i32_0, %c0_i32_1 : i32, i32, i32, i32
  }
  func.func @transform_5(%arg0: i32) -> (i32, i32, i32) {
    %c0_i32 = arith.constant 0 : i32
    %c0_i32_0 = arith.constant 0 : i32
    %c0_i32_1 = arith.constant 0 : i32
    return %arg0, %c0_i32, %c0_i32_0 : i32, i32, i32
  }
  func.func @transform_6(%arg0: i32) -> (i32, i32, i32) {
    %c0_i32 = arith.constant 0 : i32
    %c0_i32_0 = arith.constant 0 : i32
    %c0_i32_1 = arith.constant 0 : i32
    return %arg0, %c0_i32, %c0_i32_0 : i32, i32, i32
  }
  func.func @transform_7(%arg0: i32) -> (i32, i32) {
    %c0_i32 = arith.constant 0 : i32
    %c0_i32_0 = arith.constant 0 : i32
    %c0_i32_1 = arith.constant 0 : i32
    return %c0_i32, %c0_i32_0 : i32, i32
  }
  func.func @transform_8(%arg0: i32) -> (i32, i32) {
    %c0_i32 = arith.constant 0 : i32
    %c0_i32_0 = arith.constant 0 : i32
    %c0_i32_1 = arith.constant 0 : i32
    return %c0_i32, %c0_i32_0 : i32, i32
  }
  func.func @transform_9(%arg0: i32) -> (i32, i32) {
    %c0_i32 = arith.constant 0 : i32
    %c0_i32_0 = arith.constant 0 : i32
    %c0_i32_1 = arith.constant 0 : i32
    return %c0_i32, %c0_i32_0 : i32, i32
  }
  func.func @transform_10(%arg0: i32) -> (i32, i32, i32, i32) {
    %c0_i32 = arith.constant 0 : i32
    %c0_i32_0 = arith.constant 0 : i32
    %c0_i32_1 = arith.constant 0 : i32
    %c0_i32_2 = arith.constant 0 : i32
    %c0_i32_3 = arith.constant 0 : i32
    return %c0_i32, %c0_i32_0, %c0_i32_1, %c0_i32_2 : i32, i32, i32, i32
  }
}

</mosaic_0001>

<bundles_post_ra>
// kernel: actor_forward.1
= control target key start
LH: loop header
LB: loop body
LE: loop exit
PB: predicated region body
PF: predicated region fallthrough
CT: control target
= control target key end

     0   :  { %s9225_s0 = inlined_call_operand.hbm [shape: f32[2,8,8,32], index: 0, kind: input, shape index: {}]   ;;  %s9226_s1 = inlined_call_operand.hbm [shape: bf16[21,9,32,32], index: 1, kind: input, shape index: {}]   ;;  %s9227_s2 = inlined_call_operand.hbm [shape: f32[21,1,32], index: 2, kind: input, shape index: {}]   ;;  %s9228_s3 = inlined_call_operand.hbm [shape: f32[21,1,32], index: 3, kind: input, shape index: {}]   ;;  %s9229_s4 = inlined_call_operand.hbm [shape: bf16[21,9,32,32], index: 4, kind: input, shape index: {}]   ;;  %s9230_s5 = inlined_call_operand.hbm [shape: f32[21,1,32], index: 5, kind: input, shape index: {}]   ;;  %s9231_s6 = inlined_call_operand.hbm [shape: f32[21,1,32], index: 6, kind: input, shape index: {}]   ;;  %s9232_s7 = inlined_call_operand.hbm [shape: bf16[32,128], index: 7, kind: input, shape index: {}]   ;;  %s9233_s8 = inlined_call_operand.hbm [shape: f32[1,128], index: 8, kind: input, shape index: {}]   ;;  %s9234_s9 = inlined_call_operand.hbm [shape: f32[1,128], index: 9, kind: input, shape index: {}]   ;;  %s9235_s10 = inlined_call_operand.vmem [shape: f32[2,8,8,128], index: 10, kind: output, shape index: {}]  }
   0x1   :  { %9302 = sst [smem:[#allocation68_spill]] %s9226_s1 }
   0x2   :  { %9303 = sst [smem:[#allocation69_spill]] %s9228_s3 }
   0x3   :  { %9304 = sst [smem:[#allocation70_spill]] %s9230_s5 }
   0x4   :  { %9305 = sst [smem:[#allocation71_spill]] %s9232_s7 }
   0x5   :  { %9306 = sst [smem:[#allocation72_spill]] %s9235_s10 }
   0x6   :  { %15 = vsyncpa [#allocation5], 0 }
   0x7   :  { %16 = vsyncpa [#allocation7], 0 }
   0x8   :  { %18 = vsyncpa [#allocation7 + $0x1], 0 }
   0x9   :  { %19 = vsyncpa [#allocation10], 0 }
   0xa   :  { %21 = vsyncpa [#allocation10 + $0x1], 0 }
   0xb   :  { %22 = vsyncpa [#allocation13], 0 }
   0xc   :  { %24 = vsyncpa [#allocation13 + $0x1], 0 }
   0xd   :  { %25 = vsyncpa [#allocation16], 0 }
   0xe   :  { %26 = vsyncpa [#allocation19], 0  ;;  %s6977_s13 = smov 0   ;;  %s6979_s14 = smov 0  }
   0xf   :  { %s6981_s15 = smov 0   ;;  %s6983_s16 = smov 0  }
  0x10 LB: > { %9307 = sst [smem:[#allocation26_spill]] %s6898_s14  ;;  %s6996_s17 = sadd.s32 4294967295, %s6906_s16   ;;  %s6906_s16 = sphi %s6983_s16, %s9446_s16   ;;  %s6902_s15 = sphi %s6981_s15, %s9449_s15   ;;  %s6898_s14 = sphi %s6979_s14, %s9448_s14   ;;  %s6894_s13 = sphi %s6977_s13, %s9447_s13  }
  0x11   : > { %9308 = sst [smem:[#allocation27_spill]] %s6902_s15  ;;  %s6999_s18 = sadd.s32 1, %s6906_s16  }
  0x12   : > { %9309 = sst [smem:[#allocation28_spill]] %s6999_s18  ;;  %s57_s19 = ssub.s32 %s6906_s16, %s6999_s18 }
  0x13   : > { %s60_s20 = sadd.s32 1, %s6902_s15  ;;  %p58_p0 = scmp.eq.s32.totalorder %s57_s19, 0 }
  0x14   : > { %p67_p1 = scmp.ne.s32.totalorder %s6902_s15, %s6898_s14  ;;  %p68_p2 = scmp.eq.s32.totalorder %s6906_s16, 0 }
  0x15   : > { %p73_p3 = scmp.ne.s32.totalorder %s6898_s14, %s6894_s13  ;;  %p9236_p5 = scmp.eq.s32.totalorder %s6996_s17, 0 }
  0x16   : > { %s7009_s21 = scalar_select %p58_p0, %s6902_s15, %s60_s20  }
  0x17   : > { %p7011_p4 = por %p68_p2, %p67_p1  ;;  %p5041_p6 = scmp.ge.s32.totalorder %s6906_s16, 1 }
  0x18   : > { %9310 = sst [smem:[#allocation29_spill]] %s7009_s21  ;;  %p298_p7 = scmp.lt.s32.totalorder %s6906_s16, 22 }
  0x19   : > { %s9311_s22 = scalar_select %p7011_p4, 1, 0 }
  0x1a   : > { %p7020_p8 = por %p9236_p5, %p73_p3  ;;  %p7025_p10 = pnand %p5041_p6, %p298_p7 }
  0x1b   : > { %s6908_s25 = smov [#allocation15]   ;;  %s7039_s28 = sand.u32 1, %s6906_s16  }
  0x1c   : > { %s9312_s23 = scalar_select %p7020_p8, 1, 0 }
  0x1d   : > { %s9314_s24 = scalar_select %p7025_p10, 1, 0 }
  0x1e   : > { %9313 = sst [smem:[#allocation30_spill]] %s9312_s23  ;;  %s323_s26 = sshll.u32 %s6908_s25, 4  ;;  %s324_s26 = int_to_ptr.vmem [resolvable:$true] %s323_s26 }
  0x1f   : > { %p6185_p11 = pneg %p7025_p10  ;;  %s7042_s29 = sand.u32 1, %s6902_s15  }
  0x20   : > { %s9316_s7 = sld [smem:[#allocation71_spill]] }
  0x21   : > { %p7033_p12 = pnand %p6185_p11, %p9236_p5 }
  0x23   : > { %s9315_s27 = scalar_select %p7033_p12, 1, 0 }
  0x24   : > { %p7052_p1 = pneg %p7033_p12 }
  0x26   : > { %s6560_s12 = scalar_lea.hbm %s9316_s7, 256 }
  0x27   : > { %p6561_p0 = scmp.ne.s32.totalorder %s9316_s7, %s6560_s12  ;;  %p6567_p6 = scmp.lt.u32.totalorder %s6560_s12, %s9316_s7 }
  0x28   : > { %s9317_s20 = scalar_select %p7052_p1, 1, 0 }
  0x29   : > { %p6563_p2 = pnand %p7052_p1, %p6561_p0 }
  0x2b   : > { %p6564_p3 = pneg %p6563_p2 }
  0x2d   : > { %p6569_p7 = pnand %p6567_p6, %p6564_p3 }
  0x2f   : > { %6572 = shalt.err (!%p6569_p7)
}
  0x30   : > { %s6573_s30 = scalar_lea.vmem %s324_s26, 256  ;;  %p6581_p13 = scmp.lt.s32.totalorder %s324_s26, %s324_s26 }
  0x31   : > { %p6574_p11 = scmp.ne.s32.totalorder %s324_s26, %s6573_s30  ;;  %p6582_p8 = scmp.lt.s32.totalorder %s6573_s30, %s6573_s30 }
  0x33   : > { %p6576_p9 = pnand %p6574_p11, %p7052_p1  ;;  %p6583_p10 = por %p6582_p8, %p6581_p13 }
  0x35   : > { %p6577_p5 = pneg %p6576_p9 }
  0x37   : > { %p6584_p4 = pnand %p6583_p10, %p6577_p5 }
  0x39   : > { %6587 = shalt.err (!%p6584_p4)
}
  0x3a   : > { %s9245_s11 = smov 64   ;;  %s9254_s21 = smov 4  }
  0x3b   : > { %6191 = dma.hbm_to_vmem [thread:$0]  (!%p7033_p12), %s9316_s7, 256, %s324_s26, [#allocation16], %s9245_s11, %s9245_s11, %s9254_s21  }
  0x3c   : > { %s9248_s19 = smul.u32 144, %s7042_s29  ;;  %p9318_p4 = scmp.ne.s32.totalorder %s9311_s22, 0 }
  0x3d   : > { %p9319_p5 = scmp.lt.s32.totalorder %s6906_s16, 21  ;;  %s9247_s30 = smul.u32 2304, %s6906_s16 }
  0x3e   : > { %s7082_s15 = sshll.u32 %s6906_s16, 4  ;;  %s9321_s1 = sld [smem:[#allocation68_spill]] }
  0x3f   : > { %p7076_p8 = pnand %p9319_p5, %p9318_p4  ;;  %s363_s22 = scalar_lea.vmem [#allocation6], %s9248_s19 }
  0x40   : > { %s370_s26 = sshll.u32 %s363_s22, 4  ;;  %s7093_s26 = int_to_ptr.vmem [resolvable:$true] %s370_s26 }
  0x41   : > { %s9320_s25 = scalar_select %p7076_p8, 1, 0 }
  0x42   : > { %p7100_p10 = pneg %p7076_p8 }
  0x44   : > { %s7089_s23 = scalar_lea.hbm %s9321_s1, %s9247_s30  ;;  %s6593_s30 = scalar_lea.hbm %s9321_s1, 48384 }
  0x45   : > { %s6588_s13 = scalar_lea.hbm %s7089_s23, 2304  ;;  %p6594_p2 = scmp.lt.u32.totalorder %s7089_s23, %s9321_s1 }
  0x46   : > { %p6589_p9 = scmp.ne.s32.totalorder %s7089_s23, %s6588_s13  ;;  %p6595_p3 = scmp.lt.u32.totalorder %s6593_s30, %s6588_s13 }
  0x47   : > { %s9322_s11 = scalar_select %p7100_p10, 1, 0 }
  0x48   : > { %p6591_p13 = pnand %p7100_p10, %p6589_p9  ;;  %p6596_p6 = por %p6595_p3, %p6594_p2 }
  0x49   : > { %p6597_p7 = scmp.lt.u32.totalorder %s6588_s13, %s7089_s23 }
  0x4a   : > { %p6592_p0 = pneg %p6591_p13 }
  0x4b   : > { %p6598_p11 = por %p6597_p7, %p6596_p6 }
  0x4d   : > { %p6599_p4 = pnand %p6598_p11, %p6592_p0 }
  0x4f   : > { %6602 = shalt.err (!%p6599_p4)
}
  0x50   : > { %s6603_s12 = scalar_lea.vmem %s7093_s26, 2304  ;;  %s6911_s10 = smov [#allocation6]  }
  0x51   : > { %p6604_p5 = scmp.ne.s32.totalorder %s7093_s26, %s6603_s12  ;;  %s6608_s18 = sshll.u32 %s6911_s10, 4  ;;  %s6609_s18 = int_to_ptr.vmem [resolvable:$false] %s6608_s18 }
  0x52   : > { %s6610_s19 = scalar_lea.vmem %s6609_s18, 4608  ;;  %p6611_p12 = scmp.lt.s32.totalorder %s7093_s26, %s6609_s18 }
  0x53   : > { %p6606_p9 = pnand %p6604_p5, %p7100_p10  ;;  %p6612_p1 = scmp.lt.s32.totalorder %s6610_s19, %s6603_s12 }
  0x55   : > { %p6607_p13 = pneg %p6606_p9  ;;  %p6613_p2 = por %p6612_p1, %p6611_p12 }
  0x57   : > { %p6614_p3 = pnand %p6613_p2, %p6607_p13 }
  0x59   : > { %6617 = shalt.err (!%p6614_p3)
}
  0x5a   : > { %s9323_s30 = smov 64   ;;  %s9324_s13 = scalar_lea.sflag [#allocation7], %s7039_s28 }
  0x5b   : > { %6201 = dma.hbm_to_vmem [thread:$0]  (!%p7076_p8), %s7089_s23, 2304, %s7093_s26, %s9324_s13, %s9323_s30, %s9323_s30, %s9254_s21  }
  0x5c   : > { %s9325_s3 = sld [smem:[#allocation69_spill]]  ;;  %s400_s18 = scalar_lea.vmem [#allocation9], %s7042_s29 }
  0x5d   : > { %s407_s19 = sshll.u32 %s400_s18, 4  ;;  %s9257_s1 = scalar_lea.sflag [#allocation10], %s7039_s28  ;;  %s408_s19 = int_to_ptr.vmem [resolvable:$true] %s407_s19 }
  0x62   : > { %s7132_s12 = scalar_lea.hbm %s9325_s3, %s7082_s15  ;;  %s6623_s26 = scalar_lea.hbm %s9325_s3, 336 }
  0x63   : > { %s6618_s7 = scalar_lea.hbm %s7132_s12, 16  ;;  %p6624_p6 = scmp.lt.u32.totalorder %s7132_s12, %s9325_s3 }
  0x64   : > { %p6619_p12 = scmp.ne.s32.totalorder %s7132_s12, %s6618_s7  ;;  %p6625_p7 = scmp.lt.u32.totalorder %s6623_s26, %s6618_s7 }
  0x65   : > { %p6627_p4 = scmp.lt.u32.totalorder %s6618_s7, %s7132_s12 }
  0x66   : > { %p6621_p1 = pnand %p6619_p12, %p7100_p10  ;;  %p6626_p11 = por %p6625_p7, %p6624_p6 }
  0x68   : > { %p6622_p0 = pneg %p6621_p1  ;;  %p6628_p5 = por %p6627_p4, %p6626_p11 }
  0x6a   : > { %p6629_p9 = pnand %p6628_p5, %p6622_p0 }
  0x6c   : > { %6632 = shalt.err (!%p6629_p9)
}
  0x6d   : > { %s6633_s10 = scalar_lea.vmem %s408_s19, 16  ;;  %s6912_s18 = smov [#allocation9]  }
  0x6e   : > { %p6634_p13 = scmp.ne.s32.totalorder %s408_s19, %s6633_s10  ;;  %s6638_s21 = sshll.u32 %s6912_s18, 4  ;;  %s6639_s21 = int_to_ptr.vmem [resolvable:$false] %s6638_s21 }
  0x6f   : > { %s6640_s14 = scalar_lea.vmem %s6639_s21, 32  ;;  %p6641_p12 = scmp.lt.s32.totalorder %s408_s19, %s6639_s21 }
  0x70   : > { %p6636_p2 = pnand %p6634_p13, %p7100_p10  ;;  %p6642_p1 = scmp.lt.s32.totalorder %s6640_s14, %s6633_s10 }
  0x72   : > { %p6637_p3 = pneg %p6636_p2  ;;  %p6643_p8 = por %p6642_p1, %p6641_p12 }
  0x74   : > { %p6644_p6 = pnand %p6643_p8, %p6637_p3 }
  0x76   : > { %6647 = shalt.err (!%p6644_p6)
}
  0x77   : > { %p9326_p7 = scmp.ne.s32.totalorder %s9320_s25, 0  ;;  %s9327_s5 = sld [smem:[#allocation70_spill]] }
  0x78   : > { %s438_s21 = scalar_lea.vmem [#allocation12], %s7042_s29  ;;  %s9258_s22 = scalar_lea.sflag [#allocation13], %s7039_s28 }
  0x79   : > { %6207 = dma.hbm_to_vmem [thread:$0]  (!%p9326_p7), %s7132_s12, 16, %s408_s19, %s9257_s1  }
  0x7a   : > { %s445_s13 = sshll.u32 %s438_s21, 4  ;;  %s446_s13 = int_to_ptr.vmem [resolvable:$true] %s445_s13 }
  0x7d   : > { %s7159_s26 = scalar_lea.hbm %s9327_s5, %s7082_s15  ;;  %s6653_s19 = scalar_lea.hbm %s9327_s5, 336 }
  0x7e   : > { %s6648_s10 = scalar_lea.hbm %s7159_s26, 16  ;;  %p6654_p4 = scmp.lt.u32.totalorder %s7159_s26, %s9327_s5 }
  0x7f   : > { %p6649_p8 = scmp.ne.s32.totalorder %s7159_s26, %s6648_s10  ;;  %p6655_p5 = scmp.lt.u32.totalorder %s6653_s19, %s6648_s10 }
  0x80   : > { %p6657_p13 = scmp.lt.u32.totalorder %s6648_s10, %s7159_s26 }
  0x81   : > { %p6651_p0 = pnand %p6649_p8, %p7100_p10  ;;  %p6656_p9 = por %p6655_p5, %p6654_p4 }
  0x83   : > { %p6652_p11 = pneg %p6651_p0  ;;  %p6658_p2 = por %p6657_p13, %p6656_p9 }
  0x85   : > { %p6659_p3 = pnand %p6658_p2, %p6652_p11 }
  0x87   : > { %6662 = shalt.err (!%p6659_p3)
}
  0x88   : > { %s6663_s23 = scalar_lea.vmem %s446_s13, 16  ;;  %s6913_s21 = smov [#allocation12]  }
  0x89   : > { %p6664_p12 = scmp.ne.s32.totalorder %s446_s13, %s6663_s23  ;;  %s6668_s1 = sshll.u32 %s6913_s21, 4  ;;  %s6669_s1 = int_to_ptr.vmem [resolvable:$false] %s6668_s1 }
  0x8a   : > { %s6670_s18 = scalar_lea.vmem %s6669_s1, 32  ;;  %p6671_p8 = scmp.lt.s32.totalorder %s446_s13, %s6669_s1 }
  0x8b   : > { %p6666_p1 = pnand %p6664_p12, %p7100_p10  ;;  %p6672_p0 = scmp.lt.s32.totalorder %s6670_s18, %s6663_s23 }
  0x8d   : > { %p6667_p6 = pneg %p6666_p1  ;;  %p6673_p7 = por %p6672_p0, %p6671_p8 }
  0x8f   : > { %p6674_p4 = pnand %p6673_p7, %p6667_p6 }
  0x91   : > { %6677 = shalt.err (!%p6674_p4)
}
  0x92   : > { %p9328_p5 = scmp.ne.s32.totalorder %s9320_s25, 0  ;;  %s6914_s10 = smov [#allocation4]  }
  0x93   : > { %s310_s12 = sshll.u32 %s6914_s10, 4  ;;  %s6678_s7 = scalar_lea.hbm %s9225_s0, 2048  ;;  %s311_s12 = int_to_ptr.vmem [resolvable:$true] %s310_s12 }
  0x94   : > { %6213 = dma.hbm_to_vmem [thread:$0]  (!%p9328_p5), %s7159_s26, 16, %s446_s13, %s9258_s22  }
  0x95   : > { %p6679_p11 = scmp.ne.s32.totalorder %s9225_s0, %s6678_s7  ;;  %p9329_p7 = scmp.ne.s32.totalorder %s9317_s20, 0 }
  0x96   : > { %p6685_p2 = scmp.lt.u32.totalorder %s6678_s7, %s9225_s0 }
  0x97   : > { %p6681_p9 = pnand %p6679_p11, %p9329_p7 }
  0x99   : > { %p6682_p13 = pneg %p6681_p9 }
  0x9b   : > { %p6687_p3 = pnand %p6685_p2, %p6682_p13 }
  0x9d   : > { %6690 = shalt.err (!%p6687_p3)
}
  0x9e   : > { %s6691_s26 = scalar_lea.vmem %s311_s12, 2048  ;;  %p6699_p8 = scmp.lt.s32.totalorder %s311_s12, %s311_s12 }
  0x9f   : > { %p6692_p12 = scmp.ne.s32.totalorder %s311_s12, %s6691_s26  ;;  %p6700_p0 = scmp.lt.s32.totalorder %s6691_s26, %s6691_s26 }
  0xa1   : > { %p6694_p1 = pnand %p6692_p12, %p9329_p7  ;;  %p6701_p4 = por %p6700_p0, %p6699_p8 }
  0xa3   : > { %p6695_p6 = pneg %p6694_p1 }
  0xa5   : > { %p6702_p5 = pnand %p6701_p4, %p6695_p6 }
  0xa7   : > { %6705 = shalt.err (!%p6702_p5)
}
  0xa8   : > { %s6915_s13 = smov 128   ;;  %s6916_s10 = smov 8  }
  0xa9   : > { %p9330_p11 = scmp.ne.s32.totalorder %s9315_s27, 0  ;;  %s6917_s7 = smov [#allocation17]  }
  0xaa   : > { %s337_s21 = sshll.u32 %s6917_s7, 4  ;;  %s6918_s1 = smov [#allocation18]   ;;  %s338_s21 = int_to_ptr.vmem [resolvable:$true] %s337_s21 }
  0xab   : > { %6188 = dma.hbm_to_vmem [thread:$0]  (!%p9330_p11), %s9225_s0, 2048, %s311_s12, [#allocation5], %s6915_s13, %s6915_s13, %s6916_s10  }
  0xac   : > { %s348_s23 = sshll.u32 %s6918_s1, 4  ;;  %s6706_s22 = scalar_lea.hbm %s9233_s8, 16  ;;  %s7200_s23 = int_to_ptr.vmem [resolvable:$true] %s348_s23 }
  0xad   : > { %p6707_p5 = scmp.ne.s32.totalorder %s9233_s8, %s6706_s22  ;;  %p6713_p2 = scmp.lt.u32.totalorder %s6706_s22, %s9233_s8 }
  0xaf   : > { %p6709_p9 = pnand %p6707_p5, %p9329_p7 }
  0xb1   : > { %p6710_p13 = pneg %p6709_p9 }
  0xb3   : > { %p6715_p3 = pnand %p6713_p2, %p6710_p13 }
  0xb5   : > { %6718 = shalt.err (!%p6715_p3)
}
  0xb6   : > { %s6719_s13 = scalar_lea.vmem %s338_s21, 16  ;;  %s6726_s10 = scalar_lea.vmem %s338_s21, 32 }
  0xb7   : > { %p6720_p12 = scmp.ne.s32.totalorder %s338_s21, %s6719_s13  ;;  %p6727_p8 = scmp.lt.s32.totalorder %s338_s21, %s338_s21 }
  0xb8   : > { %p6728_p0 = scmp.lt.s32.totalorder %s6726_s10, %s6719_s13 }
  0xb9   : > { %p6722_p1 = pnand %p6720_p12, %p9329_p7 }
  0xba   : > { %p6729_p4 = por %p6728_p0, %p6727_p8 }
  0xbb   : > { %p6723_p6 = pneg %p6722_p1 }
  0xbd   : > { %p6730_p10 = pnand %p6729_p4, %p6723_p6 }
  0xbf   : > { %6733 = shalt.err (!%p6730_p10)
}
  0xc0   : > { %6194 = dma.hbm_to_vmem [thread:$0]  (!%p9330_p11), %s9233_s8, 16, %s338_s21, [#allocation16]  }
  0xc1   : > { %s6734_s7 = scalar_lea.hbm %s9234_s9, 16 }
  0xc2   : > { %p6735_p5 = scmp.ne.s32.totalorder %s9234_s9, %s6734_s7  ;;  %p6741_p10 = scmp.lt.u32.totalorder %s6734_s7, %s9234_s9 }
  0xc4   : > { %p6737_p9 = pnand %p6735_p5, %p9329_p7 }
  0xc6   : > { %p6738_p13 = pneg %p6737_p9 }
  0xc8   : > { %p6743_p2 = pnand %p6741_p10, %p6738_p13 }
  0xca   : > { %6746 = shalt.err (!%p6743_p2)
}
  0xcb   : > { %s6747_s21 = scalar_lea.vmem %s7200_s23, 16  ;;  %s6754_s12 = scalar_lea.vmem %s7200_s23, 32 }
  0xcc   : > { %p6748_p3 = scmp.ne.s32.totalorder %s7200_s23, %s6747_s21  ;;  %p6755_p6 = scmp.lt.s32.totalorder %s7200_s23, %s7200_s23 }
  0xcd   : > { %p6756_p8 = scmp.lt.s32.totalorder %s6754_s12, %s6747_s21 }
  0xce   : > { %p6750_p12 = pnand %p6748_p3, %p9329_p7 }
  0xcf   : > { %p6757_p0 = por %p6756_p8, %p6755_p6 }
  0xd0   : > { %p6751_p1 = pneg %p6750_p12 }
  0xd2   : > { %p6758_p4 = pnand %p6757_p0, %p6751_p1 }
  0xd4   : > { %6761 = shalt.err (!%p6758_p4)
}
  0xd5   : > { %6197 = dma.hbm_to_vmem [thread:$0]  (!%p9330_p11), %s9234_s9, 16, %s7200_s23, [#allocation19]  }
  0xd6   : > { %s7248_s5 = scalar_lea.hbm %s9227_s2, %s7082_s15  ;;  %s383_s22 = scalar_lea.vmem [#allocation8], %s7042_s29 }
  0xd7   : > { %s390_s27 = sshll.u32 %s383_s22, 4  ;;  %s9331_s14 = smul.u32 2304, %s6906_s16  ;;  %s391_s27 = int_to_ptr.vmem [resolvable:$true] %s390_s27 }
  0xd8   : > { %s6762_s26 = scalar_lea.hbm %s7248_s5, 16  ;;  %p9332_p11 = scmp.ne.s32.totalorder %s9322_s11, 0 }
  0xd9   : > { %s7256_s18 = scalar_lea.hbm %s9229_s4, %s9331_s14  ;;  %p6763_p7 = scmp.ne.s32.totalorder %s7248_s5, %s6762_s26 }
  0xda   : > { %s6767_s21 = scalar_lea.hbm %s9227_s2, 336  ;;  %p6768_p13 = scmp.lt.u32.totalorder %s7248_s5, %s9227_s2 }
  0xdb   : > { %p6765_p5 = pnand %p6763_p7, %p9332_p11  ;;  %p6769_p10 = scmp.lt.u32.totalorder %s6767_s21, %s6762_s26 }
  0xdc   : > { %p6771_p3 = scmp.lt.u32.totalorder %s6762_s26, %s7248_s5 }
  0xdd   : > { %p6766_p9 = pneg %p6765_p5  ;;  %p6770_p2 = por %p6769_p10, %p6768_p13 }
  0xdf   : > { %p6772_p12 = por %p6771_p3, %p6770_p2 }
  0xe1   : > { %p6773_p1 = pnand %p6772_p12, %p6766_p9 }
  0xe3   : > { %6776 = shalt.err (!%p6773_p1)
}
  0xe4   : > { %s6777_s16 = scalar_lea.vmem %s391_s27, 16  ;;  %s6919_s10 = smov [#allocation8]  }
  0xe5   : > { %p6778_p6 = scmp.ne.s32.totalorder %s391_s27, %s6777_s16  ;;  %s6782_s20 = sshll.u32 %s6919_s10, 4  ;;  %s6783_s20 = int_to_ptr.vmem [resolvable:$false] %s6782_s20 }
  0xe6   : > { %s6784_s3 = scalar_lea.vmem %s6783_s20, 32  ;;  %p6785_p4 = scmp.lt.s32.totalorder %s391_s27, %s6783_s20 }
  0xe7   : > { %p6780_p8 = pnand %p6778_p6, %p9332_p11  ;;  %p6786_p7 = scmp.lt.s32.totalorder %s6784_s3, %s6777_s16 }
  0xe9   : > { %p6781_p0 = pneg %p6780_p8  ;;  %p6787_p5 = por %p6786_p7, %p6785_p4 }
  0xeb   : > { %p6788_p10 = pnand %p6787_p5, %p6781_p0 }
  0xed   : > { %6791 = shalt.err (!%p6788_p10)
}
  0xee   : > { %p9333_p13 = scmp.ne.s32.totalorder %s9320_s25, 0  ;;  %s9334_s22 = scalar_lea.sflag [#allocation7], %s7039_s28 }
  0xef   : > { %s9335_s14 = smul.u32 144, %s7042_s29  ;;  %s7285_s19 = scalar_lea.hbm %s9231_s6, %s7082_s15 }
  0xf0   : > { %6204 = dma.hbm_to_vmem [thread:$0]  (!%p9333_p13), %s7248_s5, 16, %s391_s27, %s9334_s22  }
  0xf1   : > { %s418_s7 = scalar_lea.vmem [#allocation11], %s9335_s14  ;;  %s6792_s21 = scalar_lea.hbm %s7256_s18, 2304 }
  0xf2   : > { %s425_s1 = sshll.u32 %s418_s7, 4  ;;  %p6793_p9 = scmp.ne.s32.totalorder %s7256_s18, %s6792_s21  ;;  %s7279_s1 = int_to_ptr.vmem [resolvable:$true] %s425_s1 }
  0xf3   : > { %s6797_s16 = scalar_lea.hbm %s9229_s4, 48384  ;;  %p6798_p12 = scmp.lt.u32.totalorder %s7256_s18, %s9229_s4 }
  0xf4   : > { %p6795_p2 = pnand %p6793_p9, %p9332_p11  ;;  %p6799_p1 = scmp.lt.u32.totalorder %s6797_s16, %s6792_s21 }
  0xf5   : > { %p6801_p8 = scmp.lt.u32.totalorder %s6792_s21, %s7256_s18 }
  0xf6   : > { %p6796_p3 = pneg %p6795_p2  ;;  %p6800_p6 = por %p6799_p1, %p6798_p12 }
  0xf8   : > { %p6802_p0 = por %p6801_p8, %p6800_p6 }
  0xfa   : > { %p6803_p4 = pnand %p6802_p0, %p6796_p3 }
  0xfc   : > { %6806 = shalt.err (!%p6803_p4)
}
  0xfd   : > { %s6807_s15 = scalar_lea.vmem %s7279_s1, 2304  ;;  %s6920_s10 = smov [#allocation11]  }
  0xfe   : > { %p6808_p7 = scmp.ne.s32.totalorder %s7279_s1, %s6807_s15  ;;  %s6812_s20 = sshll.u32 %s6920_s10, 4  ;;  %s6813_s20 = int_to_ptr.vmem [resolvable:$false] %s6812_s20 }
  0xff   : > { %s6814_s3 = scalar_lea.vmem %s6813_s20, 4608  ;;  %p6815_p9 = scmp.lt.s32.totalorder %s7279_s1, %s6813_s20 }
 0x100   : > { %p6810_p5 = pnand %p6808_p7, %p9332_p11  ;;  %p6816_p2 = scmp.lt.s32.totalorder %s6814_s3, %s6807_s15 }
 0x102   : > { %p6811_p10 = pneg %p6810_p5  ;;  %p6817_p12 = por %p6816_p2, %p6815_p9 }
 0x104   : > { %p6818_p1 = pnand %p6817_p12, %p6811_p10 }
 0x106   : > { %6821 = shalt.err (!%p6818_p1)
}
 0x107   : > { %s9336_s22 = smov 4   ;;  %s9337_s14 = scalar_lea.sflag [#allocation10], %s7039_s28 }
 0x108   : > { %6210 = dma.hbm_to_vmem [thread:$0]  (!%p9333_p13), %s7256_s18, 2304, %s7279_s1, %s9337_s14, %s9323_s30, %s9323_s30, %s9336_s22  }
 0x109   : > { %s455_s7 = scalar_lea.vmem [#allocation14], %s7042_s29  ;;  %s6822_s23 = scalar_lea.hbm %s7285_s19, 16 }
 0x10a   : > { %s462_s26 = sshll.u32 %s455_s7, 4  ;;  %p6823_p3 = scmp.ne.s32.totalorder %s7285_s19, %s6822_s23  ;;  %s463_s26 = int_to_ptr.vmem [resolvable:$true] %s462_s26 }
 0x10b   : > { %s6827_s13 = scalar_lea.hbm %s9231_s6, 336  ;;  %p6828_p0 = scmp.lt.u32.totalorder %s7285_s19, %s9231_s6 }
 0x10c   : > { %p6825_p6 = pnand %p6823_p3, %p9332_p11  ;;  %p6829_p4 = scmp.lt.u32.totalorder %s6827_s13, %s6822_s23 }
 0x10d   : > { %p6831_p5 = scmp.lt.u32.totalorder %s6822_s23, %s7285_s19 }
 0x10e   : > { %p6826_p8 = pneg %p6825_p6  ;;  %p6830_p7 = por %p6829_p4, %p6828_p0 }
 0x110   : > { %p6832_p10 = por %p6831_p5, %p6830_p7 }
 0x112   : > { %p6833_p9 = pnand %p6832_p10, %p6826_p8 }
 0x114   : > { %6836 = shalt.err (!%p6833_p9)
}
 0x115   : > { %s6837_s29 = scalar_lea.vmem %s463_s26, 16  ;;  %s6921_s30 = smov [#allocation14]  }
 0x116   : > { %p6838_p2 = scmp.ne.s32.totalorder %s463_s26, %s6837_s29  ;;  %s6842_s18 = sshll.u32 %s6921_s30, 4  ;;  %s6843_s18 = int_to_ptr.vmem [resolvable:$false] %s6842_s18 }
 0x117   : > { %s6844_s1 = scalar_lea.vmem %s6843_s18, 32  ;;  %p6845_p3 = scmp.lt.s32.totalorder %s463_s26, %s6843_s18 }
 0x118   : > { %p6840_p12 = pnand %p6838_p2, %p9332_p11  ;;  %p6846_p6 = scmp.lt.s32.totalorder %s6844_s1, %s6837_s29 }
 0x11a   : > { %p6841_p1 = pneg %p6840_p12  ;;  %p6847_p13 = por %p6846_p6, %p6845_p3 }
 0x11c   : > { %p6848_p0 = pnand %p6847_p13, %p6841_p1 }
 0x11e   : > { %6851 = shalt.err (!%p6848_p0)
}
 0x11f   : > { %p9338_p4 = scmp.ne.s32.totalorder %s9320_s25, 0  ;;  %s9339_s27 = scalar_lea.sflag [#allocation13], %s7039_s28 }
 0x120   : > { %p9340_p8 = scmp.ne.s32.totalorder %s9314_s24, 0 }
 0x121   : > { %6216 = dma.hbm_to_vmem [thread:$0]  (!%p9338_p4), %s7285_s19, 16, %s463_s26, %s9339_s27  }
 0x122   : > { %471 = sbr.rel (%p9340_p8) target bundleno = 2021 (0x7e5), region = 60 }
 0x129   : > { %p9341_p11 = scmp.eq.s32.totalorder %s6996_s17, 0 }
 0x12b   : > { %6869 = dma.done.wait (%p9341_p11), [#allocation5], 2048   ;;  %p9342_p7 = pmov %p9341_p11 }
 0x12c   : > { %s9343_s11 = sld [smem:[#allocation26_spill]]  ;;  %s9344_s15 = sld [smem:[#allocation30_spill]] }
 0x12d   : > { %6871 = vsyncadd (%p9342_p7), [#allocation5], 4294965248  ;;  %s477_s10 = sand.u32 1, %s6996_s17  }
 0x12e   : > { %s478_s28 = scalar_lea.sflag [#allocation7], %s477_s10 }
 0x132   : > { %s7341_s20 = sand.u32 1, %s9343_s11   ;;  %p9345_p13 = scmp.ne.s32.totalorder %s9344_s15, 0 }
 0x133   : > { %s6156_s25 = smul.u32 144, %s7341_s20 }
 0x135   : > { %s7344_s3 = scalar_lea.vmem [#allocation6], %s6156_s25 }
 0x136   : > { %6873 = dma.done.wait (%p9345_p13), %s478_s28, 2320  }
 0x137   : > { %6875 = vsyncadd (%p9345_p13), %s478_s28, 4294964976  ;;  %s489_s24 = scalar_lea.vmem [#allocation8], %s7341_s20  ;;  %s495_s19 = scalar_lea.sflag [#allocation10], %s477_s10 }
 0x138   : > { %s497_s22 = scalar_lea.vmem [#allocation9], %s7341_s20 }
 0x139   : > { %6877 = dma.done.wait (%p9345_p13), %s495_s19, 2320  }
 0x13a   : > { %6879 = vsyncadd (%p9345_p13), %s495_s19, 4294964976  ;;  %s7356_s14 = scalar_lea.vmem [#allocation11], %s6156_s25  ;;  %s512_s7 = scalar_lea.sflag [#allocation13], %s477_s10 }
 0x13b   : > { %s514_s26 = scalar_lea.vmem [#allocation12], %s7341_s20 }
 0x13c   : > { %6881 = dma.done.wait (%p9345_p13), %s512_s7, 32  }
 0x13d   : > { %6883 = vsyncadd (%p9345_p13), %s512_s7, 4294967264  ;;  %s522_s23 = scalar_lea.vmem [#allocation14], %s7341_s20  ;;  %p9346_p5 = pmov %p9342_p7 }
 0x13f   : > { %6885 = dma.done.wait (%p9346_p5), [#allocation16], 272   ;;  %p9347_p10 = pmov %p9346_p5 }
 0x140   : > { %p9348_p9 = pmov %p9346_p5 }
 0x141   : > { %6887 = vsyncadd (%p9347_p10), [#allocation16], 4294967024 }
 0x142   : > { %6889 = dma.done.wait (%p9348_p9), [#allocation19], 16   ;;  %p9349_p2 = pmov %p9346_p5 }
 0x143   : > { %p9350_p12 = scmp.ne.s32.totalorder %s6996_s17, 0 }
 0x144   : > { %6891 = vsyncadd (%p9349_p2), [#allocation19], 4294967280  ;;  %v592_v0 = vld [vmem:[#allocation4] sm:$0xff] (!%p9350_p12)  ;;  %vm608_vm0 = vcmask (!%p9350_p12), 261120   ;;  %v593_v1 = vld [vmem:[#allocation4 + $0x8] sm:$0xff] (!%p9350_p12) }
 0x145   : > { %591 = sbr.rel (%p9350_p12) target bundleno = 333 (0x14d), region = 104  ;;  %v594_v2 = vld [vmem:[#allocation4 + $0x10] sm:$0xff] (!%p9350_p12)  ;;  %609 = vst.msk [vmem:[#allocation2] sm:$0xff] (!%p9350_p12), %vm608_vm0, %v592_v0  ;;  %610 = vst.msk [vmem:[#allocation2 + $0x8] sm:$0xff] (!%p9350_p12), %vm608_vm0, %v593_v1  ;;  %v595_v3 = vld [vmem:[#allocation4 + $0x18] sm:$0xff] (!%p9350_p12) }
 0x146   : > { %611 = vst.msk [vmem:[#allocation2 + $0x10] sm:$0xff] (!%p9350_p12), %vm608_vm0, %v594_v2  ;;  %v596_v4 = vld [vmem:[#allocation4 + $0x20] sm:$0xff] (!%p9350_p12)  ;;  %v597_v5 = vld [vmem:[#allocation4 + $0x28] sm:$0xff] (!%p9350_p12)  ;;  %612 = vst.msk [vmem:[#allocation2 + $0x18] sm:$0xff] (!%p9350_p12), %vm608_vm0, %v595_v3 }
 0x147   : > { %613 = vst.msk [vmem:[#allocation2 + $0x20] sm:$0xff] (!%p9350_p12), %vm608_vm0, %v596_v4  ;;  %614 = vst.msk [vmem:[#allocation2 + $0x28] sm:$0xff] (!%p9350_p12), %vm608_vm0, %v597_v5  ;;  %v598_v6 = vld [vmem:[#allocation4 + $0x30] sm:$0xff] (!%p9350_p12)  ;;  %v599_v7 = vld [vmem:[#allocation4 + $0x38] sm:$0xff] (!%p9350_p12) }
 0x148   : > { %v600_v8 = vld [vmem:[#allocation4 + $0x40] sm:$0xff] (!%p9350_p12)  ;;  %615 = vst.msk [vmem:[#allocation2 + $0x30] sm:$0xff] (!%p9350_p12), %vm608_vm0, %v598_v6  ;;  %616 = vst.msk [vmem:[#allocation2 + $0x38] sm:$0xff] (!%p9350_p12), %vm608_vm0, %v599_v7  ;;  %v601_v9 = vld [vmem:[#allocation4 + $0x48] sm:$0xff] (!%p9350_p12) }
 0x149   : > { %617 = vst.msk [vmem:[#allocation2 + $0x40] sm:$0xff] (!%p9350_p12), %vm608_vm0, %v600_v8  ;;  %v602_v10 = vld [vmem:[#allocation4 + $0x50] sm:$0xff] (!%p9350_p12)  ;;  %v603_v11 = vld [vmem:[#allocation4 + $0x58] sm:$0xff] (!%p9350_p12)  ;;  %618 = vst.msk [vmem:[#allocation2 + $0x48] sm:$0xff] (!%p9350_p12), %vm608_vm0, %v601_v9 }
 0x14a   : > { %619 = vst.msk [vmem:[#allocation2 + $0x50] sm:$0xff] (!%p9350_p12), %vm608_vm0, %v602_v10  ;;  %620 = vst.msk [vmem:[#allocation2 + $0x58] sm:$0xff] (!%p9350_p12), %vm608_vm0, %v603_v11  ;;  %v604_v12 = vld [vmem:[#allocation4 + $0x60] sm:$0xff] (!%p9350_p12)  ;;  %v605_v13 = vld [vmem:[#allocation4 + $0x68] sm:$0xff] (!%p9350_p12) }
 0x14b   : > { %v606_v14 = vld [vmem:[#allocation4 + $0x70] sm:$0xff] (!%p9350_p12)  ;;  %621 = vst.msk [vmem:[#allocation2 + $0x60] sm:$0xff] (!%p9350_p12), %vm608_vm0, %v604_v12  ;;  %622 = vst.msk [vmem:[#allocation2 + $0x68] sm:$0xff] (!%p9350_p12), %vm608_vm0, %v605_v13  ;;  %v607_v15 = vld [vmem:[#allocation4 + $0x78] sm:$0xff] (!%p9350_p12) }
 0x14c   : > { %623 = vst.msk [vmem:[#allocation2 + $0x70] sm:$0xff] %vm608_vm0, %v606_v14  ;;  %624 = vst.msk [vmem:[#allocation2 + $0x78] sm:$0xff] %vm608_vm0, %v607_v15 }
 0x14d PF: > { %v6266_v16 = vld [vmem:[%s7344_s3 + $0x10] sm:$0xff]   ;;  %vm642_vm1 = vcmask 261120   ;;  %v6267_v17 = vld [vmem:[%s7344_s3 + $0x18] sm:$0xff]   ;;  %v6268_v20 = vld [vmem:[%s7344_s3] sm:$0xff]   ;;  %p5307_p1 = scmp.ne.s32.totalorder %s6996_s17, 20 }
 0x14e   : > { %5512 = vmatprep.subr.bf16.mxu0 %v6266_v16  ;;  %v7392_v18 = vld [vmem:[#allocation2] sm:$0xff]  ;;  %v7413_v21 = vld [vmem:[#allocation2 + $0x8] sm:$0xff]  ;;  %v7415_v22 = vld [vmem:[#allocation2 + $0x10] sm:$0xff] }
 0x14f   : > { %9351 = vst [vmem:[#allocation31_spill] sm:$0xff] %v7392_v18  ;;  %5513 = vmatpush3.bf16.msra.mxu0 %v6266_v16  ;;  %643 = vst.msk [vmem:[#allocation3 + $0x10] sm:$0xff] %vm642_vm1, %v7392_v18  ;;  %v7421_v23 = vld [vmem:[#allocation2 + $0x18] sm:$0xff]  ;;  %v7423_v24 = vld [vmem:[#allocation2 + $0x20] sm:$0xff] }
 0x150   : > { %v7394_v19 = vld [vmem:[#allocation2 + $0x38] sm:$0xff]  ;;  %659 = vst.msk [vmem:[#allocation3 + $0x18] sm:$0xff] %vm642_vm1, %v7392_v18  ;;  %680 = vst.msk [vmem:[#allocation3 + $0x90] sm:$0xff] %vm642_vm1, %v7392_v18  ;;  %5514 = vmatprep.subr.bf16.mxu0 %v6267_v17  ;;  %v7437_v25 = vld [vmem:[#allocation2 + $0x28] sm:$0xff] }
 0x151   : > { %9352 = vst [vmem:[#allocation32_spill] sm:$0xff] %v7394_v19  ;;  %675 = vst.msk [vmem:[#allocation3] sm:$0xff] %vm642_vm1, %v7394_v19  ;;  %v7439_v26 = vld [vmem:[#allocation2 + $0x30] sm:$0xff]  ;;  %v7441_v27 = vld [vmem:[#allocation2 + $0x40] sm:$0xff] }
 0x152   : > { %650 = vst.msk [vmem:[#allocation3 + $0x80] sm:$0xff] %vm642_vm1, %v7394_v19  ;;  %666 = vst.msk [vmem:[#allocation3 + $0x88] sm:$0xff] %vm642_vm1, %v7394_v19  ;;  %v7469_v29 = vld [vmem:[#allocation2 + $0x48] sm:$0xff]  ;;  %v7471_v30 = vld [vmem:[#allocation2 + $0x50] sm:$0xff] }
 0x153   : > { %677 = vst.msk [vmem:[#allocation3 + $0x8] sm:$0xff] %vm642_vm1, %v7394_v19  ;;  %682 = vst.msk [vmem:[#allocation3 + $0x98] sm:$0xff] %vm642_vm1, %v7392_v18  ;;  %v7451_v28 = vld [vmem:[#allocation2 + $0x78] sm:$0xff]  ;;  %5515 = vmatpush3.bf16.msra.mxu0 %v6267_v17  ;;  %v7483_v32 = vld [vmem:[#allocation2 + $0x60] sm:$0xff] }
 0x154   : > { %9353 = vst [vmem:[#allocation33_spill] sm:$0xff] %v7413_v21  ;;  %9354 = vst [vmem:[#allocation34_spill] sm:$0xff] %v7415_v22  ;;  %5532 = vmatprep.subr.bf16.mxu0 %v6268_v20  ;;  %v7481_v31 = vld [vmem:[#allocation2 + $0x58] sm:$0xff]  ;;  %v7485_v33 = vld [vmem:[#allocation2 + $0x68] sm:$0xff] }
 0x155   : > { %644 = vst.msk [vmem:[#allocation3 + $0x20] sm:$0xff] %vm642_vm1, %v7413_v21  ;;  %660 = vst.msk [vmem:[#allocation3 + $0x28] sm:$0xff] %vm642_vm1, %v7413_v21  ;;  %v7495_v34 = vld [vmem:[#allocation2 + $0x70] sm:$0xff]  ;;  %v6269_v44 = vld [vmem:[%s7344_s3 + $0x8] sm:$0xff]  }
 0x156   : > { %9355 = vst [vmem:[#allocation35_spill] sm:$0xff] %v7421_v23  ;;  %9356 = vst [vmem:[#allocation36_spill] sm:$0xff] %v7423_v24  ;;  %v7501_v36 = vld [vmem:[#allocation3 + $0x10] sm:$0xff]  ;;  %v6271_v5 = vld [vmem:[%s7344_s3 + $0x28] sm:$0xff]  }
 0x157   : > { %645 = vst.msk [vmem:[#allocation3 + $0x30] sm:$0xff] %vm642_vm1, %v7415_v22  ;;  %661 = vst.msk [vmem:[#allocation3 + $0x38] sm:$0xff] %vm642_vm1, %v7415_v22  ;;  %v6270_v49 = vld [vmem:[%s7344_s3 + $0x20] sm:$0xff]   ;;  %v6272_v11 = vld [vmem:[%s7344_s3 + $0x30] sm:$0xff]  }
 0x158   : > { %646 = vst.msk [vmem:[#allocation3 + $0x40] sm:$0xff] %vm642_vm1, %v7421_v23  ;;  %647 = vst.msk [vmem:[#allocation3 + $0x50] sm:$0xff] %vm642_vm1, %v7423_v24  ;;  %v712_v35 = vld [vmem:[#allocation3] sm:$0xff]  ;;  %v7569_v61 = vld [vmem:[#allocation3 + $0x17] sm:$0xff] }
 0x159   : > { %662 = vst.msk [vmem:[#allocation3 + $0x48] sm:$0xff] %vm642_vm1, %v7421_v23  ;;  %663 = vst.msk [vmem:[#allocation3 + $0x58] sm:$0xff] %vm642_vm1, %v7423_v24  ;;  %v728_v37 = vpack.c.bf16 %v7501_v36, %v712_v35 }
 0x15a   : > { %9357 = vst [vmem:[#allocation37_spill] sm:$0xff] %v7437_v25  ;;  %9358 = vst [vmem:[#allocation38_spill] sm:$0xff] %v7439_v26  ;;  %v684_v59 = vld [vmem:[#allocation3 + $0x7] sm:$0xff] }
 0x15b   : > { %9359 = vst [vmem:[#allocation39_spill] sm:$0xff] %v7441_v27  ;;  %648 = vst.msk [vmem:[#allocation3 + $0x60] sm:$0xff] %vm642_vm1, %v7437_v25  ;;  %5516 = vmatprep.mubr.msk.bf16.mxu0 %vm642_vm1, %v728_v37  ;;  %v700_v63 = vpack.c.bf16 %v7569_v61, %v684_v59 }
 0x15c   : > { %649 = vst.msk [vmem:[#allocation3 + $0x70] sm:$0xff] %vm642_vm1, %v7439_v26  ;;  %664 = vst.msk [vmem:[#allocation3 + $0x68] sm:$0xff] %vm642_vm1, %v7437_v25  ;;  %v7508_v38 = vld [vmem:[#allocation3 + $0x20] sm:$0xff] }
 0x15d   : > { %665 = vst.msk [vmem:[#allocation3 + $0x78] sm:$0xff] %vm642_vm1, %v7439_v26  ;;  %9360 = vst [vmem:[#allocation40_spill] sm:$0xff] %v7451_v28  ;;  %v7576_v0 = vld [vmem:[#allocation3 + $0x27] sm:$0xff] }
 0x15e   : > { %651 = vst.msk [vmem:[#allocation3 + $0xb0] sm:$0xff] %vm642_vm1, %v7441_v27  ;;  %667 = vst.msk [vmem:[#allocation3 + $0xb8] sm:$0xff] %vm642_vm1, %v7441_v27  ;;  %v7510_v39 = vld [vmem:[#allocation3 + $0x30] sm:$0xff]  ;;  %v1201_v23 = vpack.c.bf16 %v7576_v0, %v7569_v61 }
 0x15f   : > { %681 = vst.msk [vmem:[#allocation3 + $0x130] sm:$0xff] %vm642_vm1, %v7441_v27  ;;  %683 = vst.msk [vmem:[#allocation3 + $0x138] sm:$0xff] %vm642_vm1, %v7441_v27  ;;  %v7512_v40 = vld [vmem:[#allocation3 + $0x40] sm:$0xff]  ;;  %v7514_v41 = vld [vmem:[#allocation3 + $0x50] sm:$0xff]  ;;  %v7519_v42 = vpack.c.bf16 %v7510_v39, %v7508_v38 }
 0x160   : > { %676 = vst.msk [vmem:[#allocation3 + $0xa0] sm:$0xff] %vm642_vm1, %v7451_v28  ;;  %658 = vst.msk [vmem:[#allocation3 + $0x120] sm:$0xff] %vm642_vm1, %v7451_v28  ;;  %v7523_v43 = vpack.c.bf16 %v7514_v41, %v7512_v40  ;;  %v7578_v1 = vld [vmem:[#allocation3 + $0x37] sm:$0xff]  ;;  %v7582_v2 = vld [vmem:[#allocation3 + $0x47] sm:$0xff] }
 0x161   : > { %674 = vst.msk [vmem:[#allocation3 + $0x128] sm:$0xff] %vm642_vm1, %v7451_v28  ;;  %678 = vst.msk [vmem:[#allocation3 + $0xa8] sm:$0xff] %vm642_vm1, %v7451_v28  ;;  %5517 = vmatmul.mubr.msk.bf16.vlgmr.msra.gmra.mrb[0].mxu0 %vm642_vm1, %v7519_v42  ;;  %v7585_v3 = vld [vmem:[#allocation3 + $0x57] sm:$0xff]  ;;  %v7589_v4 = vpack.c.bf16 %v7578_v1, %v7576_v0  ;;  %v1202_v18 = vpack.c.bf16 %v7582_v2, %v7578_v1 }
 0x162   : > { %9361 = vst [vmem:[#allocation41_spill] sm:$0xff] %v7469_v29  ;;  %9362 = vst [vmem:[#allocation42_spill] sm:$0xff] %v7471_v30  ;;  %5533 = vmatpush3.bf16.msra.mxu0 %v6268_v20  ;;  %5520 = vmatprep.mubr.msk.bf16.mxu0 %vm642_vm1, %v7523_v43  ;;  %v7530_v45 = vld [vmem:[#allocation3 + $0x60] sm:$0xff]  ;;  %v7594_v6 = vpack.c.bf16 %v7585_v3, %v7582_v2  ;;  %v6273_v28 = vld [vmem:[%s7344_s3 + $0x38] sm:$0xff]   ;;  %v1379_v2 = vpack.c.bf16 %v7508_v38, %v7501_v36 }
 0x163   : > { %652 = vst.msk [vmem:[#allocation3 + $0xc0] sm:$0xff] %vm642_vm1, %v7469_v29  ;;  %653 = vst.msk [vmem:[#allocation3 + $0xd0] sm:$0xff] %vm642_vm1, %v7471_v30  ;;  %v7532_v46 = vld [vmem:[#allocation3 + $0x70] sm:$0xff]  ;;  %5534 = vmatprep.subr.bf16.mxu0 %v6269_v44  ;;  %v7596_v7 = vld [vmem:[#allocation3 + $0x67] sm:$0xff] }
 0x164   : > { %668 = vst.msk [vmem:[#allocation3 + $0xc8] sm:$0xff] %vm642_vm1, %v7469_v29  ;;  %669 = vst.msk [vmem:[#allocation3 + $0xd8] sm:$0xff] %vm642_vm1, %v7471_v30  ;;  %v7539_v50 = vpack.c.bf16 %v7532_v46, %v7530_v45  ;;  %v7598_v8 = vld [vmem:[#allocation3 + $0x77] sm:$0xff]  ;;  %v1203_v22 = vpack.c.bf16 %v7596_v7, %v7585_v3  ;;  %v1380_v3 = vpack.c.bf16 %v7512_v40, %v7510_v39 }
 0x165   : > { %9363 = vst [vmem:[#allocation43_spill] sm:$0xff] %v7481_v31  ;;  %9364 = vst [vmem:[#allocation44_spill] sm:$0xff] %v7483_v32  ;;  %v7534_v48 = vld [vmem:[#allocation3 + $0xb0] sm:$0xff]  ;;  %v7609_v12 = vpack.c.bf16 %v7598_v8, %v7596_v7  ;;  %v1381_v7 = vpack.c.bf16 %v7530_v45, %v7514_v41 }
 0x166   : > { %9365 = vst [vmem:[#allocation45_spill] sm:$0xff] %v7485_v33  ;;  %654 = vst.msk [vmem:[#allocation3 + $0xe0] sm:$0xff] %vm642_vm1, %v7481_v31  ;;  %5535 = vmatpush3.bf16.msra.mxu0 %v6269_v44  ;;  %v7602_v10 = vld [vmem:[#allocation3 + $0xb7] sm:$0xff] }
 0x167   : > { %655 = vst.msk [vmem:[#allocation3 + $0xf0] sm:$0xff] %vm642_vm1, %v7483_v32  ;;  %670 = vst.msk [vmem:[#allocation3 + $0xe8] sm:$0xff] %vm642_vm1, %v7481_v31  ;;  %v720_v47 = vld [vmem:[#allocation3 + $0xa0] sm:$0xff]  ;;  %5552 = vmatprep.subr.bf16.mxu0 %v6270_v49  ;;  %v7674_v29 = vld [vmem:[#allocation3 + $0xb1] sm:$0xff] }
 0x168   : > { %671 = vst.msk [vmem:[#allocation3 + $0xf8] sm:$0xff] %vm642_vm1, %v7483_v32  ;;  %9366 = vst [vmem:[#allocation46_spill] sm:$0xff] %v7495_v34  ;;  %v732_v51 = vpack.c.bf16 %v7534_v48, %v720_v47  ;;  %v692_v9 = vld [vmem:[#allocation3 + $0xa7] sm:$0xff]  ;;  %v7672_v32 = vld [vmem:[#allocation3 + $0x71] sm:$0xff] }
 0x169   : > { %656 = vst.msk [vmem:[#allocation3 + $0x100] sm:$0xff] %vm642_vm1, %v7485_v33  ;;  %672 = vst.msk [vmem:[#allocation3 + $0x108] sm:$0xff] %vm642_vm1, %v7485_v33  ;;  %5521 = vmatmul.mubr.msk.bf16.gmra.mrb[4].mxu0 %vm642_vm1, %v7539_v50  ;;  %v704_v13 = vpack.c.bf16 %v7602_v10, %v692_v9  ;;  %v1007_v47 = vld [vmem:[#allocation3 + $0x1] sm:$0xff] }
 0x16a   : > { %657 = vst.msk [vmem:[#allocation3 + $0x110] sm:$0xff] %vm642_vm1, %v7495_v34  ;;  %673 = vst.msk [vmem:[#allocation3 + $0x118] sm:$0xff] %vm642_vm1, %v7495_v34  ;;  %5524 = vmatprep.mubr.msk.bf16.mxu0 %vm642_vm1, %v732_v51  ;;  %v7545_v52 = vld [vmem:[#allocation3 + $0xc0] sm:$0xff]  ;;  %v7547_v53 = vld [vmem:[#allocation3 + $0xd0] sm:$0xff] }
 0x16b   : > { %v7555_v56 = vpack.c.bf16 %v7547_v53, %v7545_v52  ;;  %v7615_v14 = vld [vmem:[#allocation3 + $0xc7] sm:$0xff]  ;;  %v7617_v15 = vld [vmem:[#allocation3 + $0xd7] sm:$0xff] }
 0x16c   : > { %v7625_v20 = vpack.c.bf16 %v7617_v15, %v7615_v14  ;;  %v7653_v9 = vld [vmem:[#allocation3 + $0x41] sm:$0xff]  ;;  %v7687_v25 = vld [vmem:[#allocation3 + $0xd1] sm:$0xff] }
 0x16d   : > { %v7549_v54 = vld [vmem:[#allocation3 + $0xe0] sm:$0xff] }
 0x16e   : > { %v7551_v55 = vld [vmem:[#allocation3 + $0xf0] sm:$0xff]  ;;  %v7619_v16 = vld [vmem:[#allocation3 + $0xe7] sm:$0xff]  ;;  %v1384_v39 = vpack.c.bf16 %v7549_v54, %v7547_v53 }
 0x16f   : > { %v7559_v57 = vpack.c.bf16 %v7551_v55, %v7549_v54  ;;  %v7621_v17 = vld [vmem:[#allocation3 + $0xf7] sm:$0xff]  ;;  %v1015_v34 = vld [vmem:[#allocation3 + $0xa1] sm:$0xff] }
 0x170   : > { %v7563_v58 = vld [vmem:[#allocation3 + $0x100] sm:$0xff]  ;;  %v7629_v35 = vpack.c.bf16 %v7621_v17, %v7619_v16  ;;  %v1027_v30 = vpack.c.bf16 %v7674_v29, %v1015_v34  ;;  %v7691_v24 = vld [vmem:[#allocation3 + $0xf1] sm:$0xff] }
 0x171   : > { %5525 = vmatmul.mubr.msk.bf16.gmra.mrb[8].mxu0 %vm642_vm1, %v7555_v56  ;;  %v7567_v60 = vld [vmem:[#allocation3 + $0x110] sm:$0xff]  ;;  %v7635_v37 = vld [vmem:[#allocation3 + $0x107] sm:$0xff]  ;;  %v1385_v40 = vpack.c.bf16 %v7563_v58, %v7551_v55 }
 0x172   : > { %5528 = vmatprep.mubr.msk.bf16.mxu0 %vm642_vm1, %v7559_v57  ;;  %v7573_v62 = vpack.c.bf16 %v7567_v60, %v7563_v58  ;;  %v7637_v44 = vld [vmem:[#allocation3 + $0x117] sm:$0xff]  ;;  %v7689_v19 = vld [vmem:[#allocation3 + $0xe1] sm:$0xff] }
 0x173   : > { %v7643_v51 = vpack.c.bf16 %v7637_v44, %v7635_v37  ;;  %v6274_v31 = vld [vmem:[%s7344_s3 + $0x40] sm:$0xff]   ;;  %v6276_v61 = vld [vmem:[%s7344_s3 + $0x50] sm:$0xff]   ;;  %v6279_v53 = vld [vmem:[%s7344_s3 + $0x68] sm:$0xff]  }
 0x174   : > { %v7707_v34 = vld [vmem:[#allocation3 + $0x111] sm:$0xff]  ;;  %v1378_v41 = vld [vmem:[#allocation3 + $0x120] sm:$0xff] }
 0x175   : > { %v6278_v36 = vld [vmem:[%s7344_s3 + $0x60] sm:$0xff]   ;;  %v1386_v45 = vpack.c.bf16 %v1378_v41, %v7567_v60  ;;  %v6280_v55 = vld [vmem:[%s7344_s3 + $0x70] sm:$0xff]  }
 0x176   : > { %v1548_v54 = vld [vmem:[#allocation3 + $0x81] sm:$0xff] }
 0x177   : > { %v1560_v58 = vpack.c.bf16 %v1548_v54, %v7672_v32 }
 0x179   : > { %5529 = vmatmul.mubr.msk.bf16.gmra.mrb[12].mxu0 %vm642_vm1, %v7573_v62 }
 0x17a   : > { %5536 = vmatprep.mubr.msk.bf16.mxu0 %vm642_vm1, %v700_v63  ;;  %v7649_v63 = vld [vmem:[#allocation3 + $0x21] sm:$0xff] }
 0x181   : > { %5537 = vmatmul.mubr.msk.bf16.vlgmr.msra.gmra.mrb[0].mxu0 %vm642_vm1, %v7589_v4 }
 0x182   : > { %5553 = vmatpush3.bf16.msra.mxu0 %v6270_v49  ;;  %5540 = vmatprep.mubr.msk.bf16.mxu0 %vm642_vm1, %v7594_v6  ;;  %v7639_v49 = vld [vmem:[#allocation3 + $0x11] sm:$0xff] }
 0x183   : > { %5554 = vmatprep.subr.bf16.mxu0 %v6271_v5  ;;  %v1023_v59 = vpack.c.bf16 %v7639_v49, %v1007_v47 }
 0x186   : > { %5555 = vmatpush3.bf16.msra.mxu0 %v6271_v5  ;;  %v7651_v5 = vld [vmem:[#allocation3 + $0x31] sm:$0xff] }
 0x187   : > { %5572 = vmatprep.subr.bf16.mxu0 %v6272_v11  ;;  %v7659_v33 = vpack.c.bf16 %v7651_v5, %v7649_v63 }
 0x189   : > { %5541 = vmatmul.mubr.msk.bf16.gmra.mrb[4].mxu0 %vm642_vm1, %v7609_v12 }
 0x18a   : > { %5544 = vmatprep.mubr.msk.bf16.mxu0 %vm642_vm1, %v704_v13  ;;  %v7655_v13 = vld [vmem:[#allocation3 + $0x51] sm:$0xff] }
 0x18b   : > { %v7663_v47 = vpack.c.bf16 %v7655_v13, %v7653_v9 }
 0x191   : > { %5545 = vmatmul.mubr.msk.bf16.gmra.mrb[8].mxu0 %vm642_vm1, %v7625_v20 }
 0x192   : > { %5548 = vmatprep.mubr.msk.bf16.mxu0 %vm642_vm1, %v7629_v35 }
 0x199   : > { %5549 = vmatmul.mubr.msk.bf16.gmra.mrb[12].mxu0 %vm642_vm1, %v7643_v51 }
 0x19a   : > { %5556 = vmatprep.mubr.msk.bf16.mxu0 %vm642_vm1, %v1023_v59  ;;  %v7670_v59 = vld [vmem:[#allocation3 + $0x61] sm:$0xff] }
 0x19b   : > { %v7679_v27 = vpack.c.bf16 %v7672_v32, %v7670_v59  ;;  %v1556_v32 = vld [vmem:[#allocation3 + $0x121] sm:$0xff] }
 0x1a1   : > { %5557 = vmatmul.mubr.msk.bf16.vlgmr.msra.gmra.mrb[0].mxu0 %vm642_vm1, %v7659_v33 }
 0x1a2   : > { %5573 = vmatpush3.bf16.msra.mxu0 %v6272_v11  ;;  %5560 = vmatprep.mubr.msk.bf16.mxu0 %vm642_vm1, %v7663_v47  ;;  %v7685_v11 = vld [vmem:[#allocation3 + $0xc1] sm:$0xff] }
 0x1a3   : > { %5574 = vmatprep.subr.bf16.mxu0 %v6273_v28  ;;  %v7695_v26 = vpack.c.bf16 %v7687_v25, %v7685_v11  ;;  %v1561_v60 = vpack.c.bf16 %v7685_v11, %v7674_v29  ;;  %v1564_v29 = vpack.c.bf16 %v1556_v32, %v7707_v34 }
 0x1a5   : > { %9367 = vst [vmem:[#allocation47_spill] sm:$0xff] %v7695_v26 }
 0x1a6   : > { %5575 = vmatpush3.bf16.msra.mxu0 %v6273_v28  ;;  %v7699_v28 = vpack.c.bf16 %v7691_v24, %v7689_v19 }
 0x1a7   : > { %5592 = vmatprep.subr.bf16.mxu0 %v6274_v31 }
 0x1a8   : > { %9368 = vst [vmem:[#allocation48_spill] sm:$0xff] %v7699_v28 }
 0x1a9   : > { %5561 = vmatmul.mubr.msk.bf16.gmra.mrb[4].mxu0 %vm642_vm1, %v7679_v27 }
 0x1aa   : > { %5564 = vmatprep.mubr.msk.bf16.mxu0 %vm642_vm1, %v1027_v30  ;;  %v7705_v30 = vld [vmem:[#allocation3 + $0x101] sm:$0xff] }
 0x1ab   : > { %v7711_v21 = vpack.c.bf16 %v7707_v34, %v7705_v30 }
 0x1b1   : > { %5565 = vmatmul.mubr.msk.bf16.gmra.mrb[8].mxu0 %vm642_vm1, %v7695_v26  ;;  %v7725_v26 = vld [vmem:[#allocation3 + $0x87] sm:$0xff] }
 0x1b2   : > { %5568 = vmatprep.mubr.msk.bf16.mxu0 %vm642_vm1, %v7699_v28  ;;  %v6275_v28 = vld [vmem:[%s7344_s3 + $0x48] sm:$0xff]   ;;  %v1204_v0 = vpack.c.bf16 %v7725_v26, %v7598_v8  ;;  %v6277_v8 = vld [vmem:[%s7344_s3 + $0x58] sm:$0xff]  }
 0x1b9   : > { %5569 = vmatmul.mubr.msk.bf16.gmra.mrb[12].mxu0 %vm642_vm1, %v7711_v21 }
 0x1ba   : > { %5576 = vmatprep.mubr.msk.bf16.mxu0 %vm642_vm1, %v1201_v23  ;;  %v1205_v23 = vpack.c.bf16 %v7615_v14, %v7602_v10  ;;  %v7755_v10 = vld [vmem:[#allocation3 + $0x80] sm:$0xff]  ;;  %v1383_v14 = vpack.c.bf16 %v7545_v52, %v7534_v48  ;;  %v1558_v48 = vpack.c.bf16 %v7653_v9, %v7651_v5  ;;  %v1559_v52 = vpack.c.bf16 %v7670_v59, %v7655_v13 }
 0x1bb   : > { %v1382_v38 = vpack.c.bf16 %v7755_v10, %v7532_v46  ;;  %v1557_v46 = vpack.c.bf16 %v7649_v63, %v7639_v49  ;;  %v7852_v49 = vld [vmem:[%s489_s24] ss:$0 sm:$0xff] }
 0x1c1   : > { %5577 = vmatmul.mubr.msk.bf16.vlgmr.msra.gmra.mrb[0].mxu0 %vm642_vm1, %v1202_v18  ;;  %v1206_v18 = vpack.c.bf16 %v7619_v16, %v7617_v15  ;;  %v1562_v15 = vpack.c.bf16 %v7689_v19, %v7687_v25  ;;  %v1563_v16 = vpack.c.bf16 %v7705_v30, %v7691_v24  ;;  %v1727_v19 = vld [vmem:[#allocation3 + $0x97] sm:$0xff] }
 0x1c2   : > { %5593 = vmatpush3.bf16.msra.mxu0 %v6274_v31  ;;  %5580 = vmatprep.mubr.msk.bf16.mxu0 %vm642_vm1, %v1203_v22  ;;  %v1207_v22 = vpack.c.bf16 %v7635_v37, %v7621_v17  ;;  %v7740_v31 = vld [vmem:[#allocation3 + $0x127] sm:$0xff]  ;;  %v1739_v25 = vpack.c.bf16 %v1727_v19, %v7725_v26 }
 0x1c3   : > { %5594 = vmatprep.subr.bf16.mxu0 %v6275_v28  ;;  %v1208_v1 = vpack.c.bf16 %v7740_v31, %v7637_v44  ;;  %v6281_v17 = vld [vmem:[%s7344_s3 + $0x78] sm:$0xff]   ;;  %v6282_v24 = vld [vmem:[%s7344_s3 + $0x80] sm:$0xff]   ;;  %v6283_v26 = vld [vmem:[%s7344_s3 + $0x88] sm:$0xff]  }
 0x1c4   : > { %v6285_v37 = vld [vmem:[%s7356_s14 + $0x18] sm:$0xff]   ;;  %v7847_v44 = vld [vmem:[%s7356_s14] sm:$0xff]  }
 0x1c6   : > { %5595 = vmatpush3.bf16.msra.mxu0 %v6275_v28 }
 0x1c7   : > { %5612 = vmatprep.subr.bf16.mxu0 %v6276_v61 }
 0x1c9   : > { %5581 = vmatmul.mubr.msk.bf16.gmra.mrb[4].mxu0 %vm642_vm1, %v1204_v0 }
 0x1ca   : > { %5584 = vmatprep.mubr.msk.bf16.mxu0 %vm642_vm1, %v1205_v23 }
 0x1d1   : > { %5585 = vmatmul.mubr.msk.bf16.gmra.mrb[8].mxu0 %vm642_vm1, %v1206_v18 }
 0x1d2   : > { %5588 = vmatprep.mubr.msk.bf16.mxu0 %vm642_vm1, %v1207_v22 }
 0x1d9   : > { %5589 = vmatmul.mubr.msk.bf16.gmra.mrb[12].mxu0 %vm642_vm1, %v1208_v1 }
 0x1da   : > { %5596 = vmatprep.mubr.msk.bf16.mxu0 %vm642_vm1, %v1379_v2 }
 0x1e1   : > { %5597 = vmatmul.mubr.msk.bf16.vlgmr.msra.gmra.mrb[0].mxu0 %vm642_vm1, %v1380_v3 }
 0x1e2   : > { %5613 = vmatpush3.bf16.msra.mxu0 %v6276_v61  ;;  %5600 = vmatprep.mubr.msk.bf16.mxu0 %vm642_vm1, %v1381_v7 }
 0x1e3   : > { %5614 = vmatprep.subr.bf16.mxu0 %v6277_v8 }
 0x1e6   : > { %5615 = vmatpush3.bf16.msra.mxu0 %v6277_v8 }
 0x1e7   : > { %5632 = vmatprep.subr.bf16.mxu0 %v6278_v36 }
 0x1e9   : > { %5601 = vmatmul.mubr.msk.bf16.gmra.mrb[4].mxu0 %vm642_vm1, %v1382_v38 }
 0x1ea   : > { %5604 = vmatprep.mubr.msk.bf16.mxu0 %vm642_vm1, %v1383_v14 }
 0x1f1   : > { %5605 = vmatmul.mubr.msk.bf16.gmra.mrb[8].mxu0 %vm642_vm1, %v1384_v39 }
 0x1f2   : > { %5608 = vmatprep.mubr.msk.bf16.mxu0 %vm642_vm1, %v1385_v40 }
 0x1f9   : > { %5609 = vmatmul.mubr.msk.bf16.gmra.mrb[12].mxu0 %vm642_vm1, %v1386_v45 }
 0x1fa   : > { %5616 = vmatprep.mubr.msk.bf16.mxu0 %vm642_vm1, %v1557_v46 }
 0x201   : > { %5617 = vmatmul.mubr.msk.bf16.vlgmr.msra.gmra.mrb[0].mxu0 %vm642_vm1, %v1558_v48 }
 0x202   : > { %5633 = vmatpush3.bf16.msra.mxu0 %v6278_v36  ;;  %5620 = vmatprep.mubr.msk.bf16.mxu0 %vm642_vm1, %v1559_v52 }
 0x203   : > { %5634 = vmatprep.subr.bf16.mxu0 %v6279_v53 }
 0x206   : > { %5635 = vmatpush3.bf16.msra.mxu0 %v6279_v53 }
 0x207   : > { %5652 = vmatprep.subr.bf16.mxu0 %v6280_v55 }
 0x209   : > { %5621 = vmatmul.mubr.msk.bf16.gmra.mrb[4].mxu0 %vm642_vm1, %v1560_v58 }
 0x20a   : > { %5624 = vmatprep.mubr.msk.bf16.mxu0 %vm642_vm1, %v1561_v60 }
 0x211   : > { %5625 = vmatmul.mubr.msk.bf16.gmra.mrb[8].mxu0 %vm642_vm1, %v1562_v15 }
 0x212   : > { %5628 = vmatprep.mubr.msk.bf16.mxu0 %vm642_vm1, %v1563_v16 }
 0x219   : > { %5629 = vmatmul.mubr.msk.bf16.gmra.mrb[12].mxu0 %vm642_vm1, %v1564_v29 }
 0x21a   : > { %5636 = vmatprep.mubr.msk.bf16.mxu0 %vm642_vm1, %v7589_v4  ;;  %v1735_v4 = vld [vmem:[#allocation3 + $0x137] sm:$0xff] }
 0x221   : > { %5637 = vmatmul.mubr.msk.bf16.vlgmr.msra.gmra.mrb[0].mxu0 %vm642_vm1, %v7594_v6  ;;  %v1743_v6 = vpack.c.bf16 %v1735_v4, %v7740_v31 }
 0x222   : > { %5653 = vmatpush3.bf16.msra.mxu0 %v6280_v55  ;;  %5640 = vmatprep.mubr.msk.bf16.mxu0 %vm642_vm1, %v7609_v12  ;;  %v1905_v12 = vld [vmem:[#allocation3 + $0x90] sm:$0xff] }
 0x223   : > { %5654 = vmatprep.subr.bf16.mxu0 %v6281_v17 }
 0x226   : > { %5655 = vmatpush3.bf16.msra.mxu0 %v6281_v17  ;;  %v6291_v17 = vld [vmem:[%s7356_s14 + $0x38] sm:$0xff]  }
 0x227   : > { %5672 = vmatprep.subr.bf16.mxu0 %v6282_v24 }
 0x229   : > { %5641 = vmatmul.mubr.msk.bf16.gmra.mrb[4].mxu0 %vm642_vm1, %v1739_v25 }
 0x22a   : > { %5644 = vmatprep.mubr.msk.bf16.mxu0 %vm642_vm1, %v7625_v20  ;;  %v1917_v20 = vpack.c.bf16 %v1905_v12, %v7755_v10 }
 0x231   : > { %5645 = vmatmul.mubr.msk.bf16.gmra.mrb[8].mxu0 %vm642_vm1, %v7629_v35 }
 0x232   : > { %5648 = vmatprep.mubr.msk.bf16.mxu0 %vm642_vm1, %v7643_v51 }
 0x239   : > { %5649 = vmatmul.mubr.msk.bf16.gmra.mrb[12].mxu0 %vm642_vm1, %v1743_v6 }
 0x23a   : > { %5656 = vmatprep.mubr.msk.bf16.mxu0 %vm642_vm1, %v7519_v42  ;;  %v1913_v42 = vld [vmem:[#allocation3 + $0x130] sm:$0xff] }
 0x241   : > { %5657 = vmatmul.mubr.msk.bf16.vlgmr.msra.gmra.mrb[0].mxu0 %vm642_vm1, %v7523_v43  ;;  %v1921_v43 = vpack.c.bf16 %v1913_v42, %v1378_v41 }
 0x242   : > { %5673 = vmatpush3.bf16.msra.mxu0 %v6282_v24  ;;  %5660 = vmatprep.mubr.msk.bf16.mxu0 %vm642_vm1, %v7539_v50  ;;  %v2083_v50 = vld [vmem:[#allocation3 + $0x91] sm:$0xff] }
 0x243   : > { %5674 = vmatprep.subr.bf16.mxu0 %v6283_v26 }
 0x246   : > { %5675 = vmatpush3.bf16.msra.mxu0 %v6283_v26 }
 0x249   : > { %5661 = vmatmul.mubr.msk.bf16.gmra.mrb[4].mxu0 %vm642_vm1, %v1917_v20  ;;  %v6293_v20 = vld [vmem:[%s7356_s14 + $0x48] sm:$0xff]  }
 0x24a   : > { %5664 = vmatprep.mubr.msk.bf16.mxu0 %vm642_vm1, %v7555_v56  ;;  %v2095_v56 = vpack.c.bf16 %v2083_v50, %v1548_v54 }
 0x251   : > { %5665 = vmatmul.mubr.msk.bf16.gmra.mrb[8].mxu0 %vm642_vm1, %v7559_v57  ;;  %v9369_v57 = vld [vmem:[#allocation47_spill] sm:$0xff] }
 0x252   : > { %5668 = vmatprep.mubr.msk.bf16.mxu0 %vm642_vm1, %v7573_v62  ;;  %v9370_v62 = vld [vmem:[#allocation48_spill] sm:$0xff] }
 0x259   : > { %5669 = vmatmul.mubr.msk.bf16.gmra.mrb[12].mxu0 %vm642_vm1, %v1921_v43 }
 0x25a   : > { %5676 = vmatprep.mubr.msk.bf16.mxu0 %vm642_vm1, %v7659_v33  ;;  %v2091_v33 = vld [vmem:[#allocation3 + $0x131] sm:$0xff] }
 0x25b   : > { %v2099_v35 = vpack.c.bf16 %v2091_v33, %v1556_v32 }
 0x261   : > { %5677 = vmatmul.mubr.msk.bf16.vlgmr.msra.gmra.mrb[0].mxu0 %vm642_vm1, %v7663_v47 }
 0x262   : > { %5680 = vmatprep.mubr.msk.bf16.mxu0 %vm642_vm1, %v7679_v27  ;;  %v6284_v27 = vld [vmem:[%s7356_s14 + $0x10] sm:$0xff]  }
 0x263   : > { %5692 = vmatprep.subr.bf16.mxu1 %v6284_v27 }
 0x264   : > { %5693 = vmatpush3.bf16.msra.mxu1 %v6284_v27 }
 0x265   : > { %5694 = vmatprep.subr.bf16.mxu1 %v6285_v37 }
 0x268   : > { %5695 = vmatpush3.bf16.msra.mxu1 %v6285_v37 }
 0x269   : > { %5681 = vmatmul.mubr.msk.bf16.gmra.mrb[4].mxu0 %vm642_vm1, %v2095_v56  ;;  %5712 = vmatprep.subr.bf16.mxu1 %v7847_v44 }
 0x26a   : > { %5684 = vmatprep.mubr.msk.bf16.mxu0 %vm642_vm1, %v9369_v57 }
 0x271   : > { %5685 = vmatmul.mubr.msk.bf16.gmra.mrb[8].mxu0 %vm642_vm1, %v9370_v62 }
 0x272   : > { %5688 = vmatprep.mubr.msk.bf16.mxu0 %vm642_vm1, %v7711_v21  ;;  %v7856_v21 = vld [vmem:[%s497_s22] ss:$0 sm:$0xff] }
 0x279   : > { %5689 = vmatmul.mubr.msk.bf16.gmra.mrb[12].mxu0 %vm642_vm1, %v2099_v35 }
 0x334   : > { %v5678_v51 = vpop.f32.mrb[0].mxu0 }
 0x335   : > { %v2263_v63 = vmul.f32 %v5678_v51, %v7852_v49  ;;  %v2175_v5 = vpop.f32.mrb[1].mxu0 }
 0x336   : > { %v2261_v9 = vmul.f32 %v7852_v49, %v2175_v5  ;;  %v5679_v13 = vpop.f32.mrb[2].mxu0 }
 0x337   : > { %v2286_v47 = vadd.f32 %v7856_v21, %v2263_v63  ;;  %v2264_v59 = vmul.f32 %v5679_v13, %v7852_v49  ;;  %v2178_v11 = vpop.f32.mrb[3].mxu0 }
 0x338   : > { %v2284_v28 = vadd.f32 %v7856_v21, %v2261_v9  ;;  %v2262_v30 = vmul.f32 %v7852_v49, %v2178_v11 }
 0x339   : > { %v2302_v34 = vmax.f32 %v2286_v47, 0.0  ;;  %v2287_v61 = vadd.f32 %v7856_v21, %v2264_v59 }
 0x33a   : > { %v2300_v0 = vmax.f32 %v2284_v28, 0.0  ;;  %v2285_v23 = vadd.f32 %v7856_v21, %v2262_v30  ;;  %v6287_v30 = vld [vmem:[%s7356_s14 + $0x8] sm:$0xff]  }
 0x33b   : > { %2334 = vst.msk [vmem:[#allocation3 + $0x38] sm:$0xff] %vm642_vm1, %v2302_v34  ;;  %2318 = vst.msk [vmem:[#allocation3 + $0x30] sm:$0xff] %vm642_vm1, %v2302_v34  ;;  %v2303_v18 = vmax.f32 %v2287_v61, 0.0 }
 0x33c   : > { %2332 = vst.msk [vmem:[#allocation3 + $0x18] sm:$0xff] %vm642_vm1, %v2300_v0  ;;  %2352 = vst.msk [vmem:[#allocation3 + $0x90] sm:$0xff] %vm642_vm1, %v2300_v0  ;;  %v2301_v22 = vmax.f32 %v2285_v23, 0.0  ;;  %v5682_v31 = vpop.f32.mrb[4].mxu0 }
 0x33d   : > { %2354 = vst.msk [vmem:[#allocation3 + $0x98] sm:$0xff] %vm642_vm1, %v2300_v0  ;;  %2316 = vst.msk [vmem:[#allocation3 + $0x10] sm:$0xff] %vm642_vm1, %v2300_v0  ;;  %v2267_v1 = vmul.f32 %v5682_v31, %v7852_v49  ;;  %v2191_v2 = vpop.f32.mrb[5].mxu0 }
 0x33e   : > { %2319 = vst.msk [vmem:[#allocation3 + $0x40] sm:$0xff] %vm642_vm1, %v2303_v18  ;;  %2335 = vst.msk [vmem:[#allocation3 + $0x48] sm:$0xff] %vm642_vm1, %v2303_v18  ;;  %v2265_v3 = vmul.f32 %v7852_v49, %v2191_v2  ;;  %v5683_v7 = vpop.f32.mrb[6].mxu0 }
 0x33f   : > { %2333 = vst.msk [vmem:[#allocation3 + $0x28] sm:$0xff] %vm642_vm1, %v2301_v22  ;;  %2317 = vst.msk [vmem:[#allocation3 + $0x20] sm:$0xff] %vm642_vm1, %v2301_v22  ;;  %v2290_v8 = vadd.f32 %v7856_v21, %v2267_v1  ;;  %v2268_v10 = vmul.f32 %v5683_v7, %v7852_v49  ;;  %v2194_v36 = vpop.f32.mrb[7].mxu0 }
 0x340   : > { %v2288_v38 = vadd.f32 %v7856_v21, %v2265_v3  ;;  %v2266_v14 = vmul.f32 %v7852_v49, %v2194_v36  ;;  %v6288_v36 = vld [vmem:[%s7356_s14 + $0x20] sm:$0xff]  }
 0x341   : > { %v2306_v39 = vmax.f32 %v2290_v8, 0.0  ;;  %v2291_v40 = vadd.f32 %v7856_v21, %v2268_v10 }
 0x342   : > { %v2304_v41 = vmax.f32 %v2288_v38, 0.0  ;;  %v2289_v45 = vadd.f32 %v7856_v21, %v2266_v14  ;;  %v7886_v48 = vld [vmem:[#allocation3 + $0x30] sm:$0xff] }
 0x343   : > { %2322 = vst.msk [vmem:[#allocation3 + $0x70] sm:$0xff] %vm642_vm1, %v2306_v39  ;;  %2338 = vst.msk [vmem:[#allocation3 + $0x78] sm:$0xff] %vm642_vm1, %v2306_v39  ;;  %v2307_v46 = vmax.f32 %v2291_v40, 0.0  ;;  %v7892_v55 = vld [vmem:[#allocation3 + $0x31] sm:$0xff] }
 0x344   : > { %2320 = vst.msk [vmem:[#allocation3 + $0x50] sm:$0xff] %vm642_vm1, %v2304_v41  ;;  %2336 = vst.msk [vmem:[#allocation3 + $0x58] sm:$0xff] %vm642_vm1, %v2304_v41  ;;  %v2305_v52 = vmax.f32 %v2289_v45, 0.0  ;;  %v5686_v53 = vpop.f32.mrb[8].mxu0  ;;  %v7912_v25 = vld [vmem:[#allocation3 + $0x10] sm:$0xff] }
 0x345   : > { %v7890_v54 = vld [vmem:[#allocation3 + $0x40] sm:$0xff]  ;;  %2339 = vst.msk [vmem:[#allocation3 + $0x88] sm:$0xff] %vm642_vm1, %v2307_v46  ;;  %2348 = vst.msk [vmem:[#allocation3] sm:$0xff] %vm642_vm1, %v2307_v46  ;;  %v2271_v60 = vmul.f32 %v5686_v53, %v7852_v49  ;;  %v2207_v15 = vpop.f32.mrb[9].mxu0  ;;  %v7916_v12 = vld [vmem:[#allocation3 + $0x11] sm:$0xff] }
 0x346   : > { %v7894_v58 = vld [vmem:[#allocation3 + $0x41] sm:$0xff]  ;;  %2350 = vst.msk [vmem:[#allocation3 + $0x8] sm:$0xff] %vm642_vm1, %v2307_v46  ;;  %2323 = vst.msk [vmem:[#allocation3 + $0x80] sm:$0xff] %vm642_vm1, %v2307_v46  ;;  %v2269_v19 = vmul.f32 %v7852_v49, %v2207_v15  ;;  %v5687_v24 = vpop.f32.mrb[10].mxu0 }
 0x347   : > { %v7901_v16 = vld [vmem:[#allocation3 + $0x20] sm:$0xff]  ;;  %2321 = vst.msk [vmem:[#allocation3 + $0x60] sm:$0xff] %vm642_vm1, %v2305_v52  ;;  %2337 = vst.msk [vmem:[#allocation3 + $0x68] sm:$0xff] %vm642_vm1, %v2305_v52  ;;  %v2294_v4 = vadd.f32 %v7856_v21, %v2271_v60  ;;  %v2272_v6 = vmul.f32 %v5687_v24, %v7852_v49  ;;  %v2210_v26 = vpop.f32.mrb[11].mxu0 }
 0x348   : > { %v7903_v32 = vld [vmem:[#allocation3 + $0x21] sm:$0xff]  ;;  %v2292_v42 = vadd.f32 %v7856_v21, %v2269_v19  ;;  %v2270_v43 = vmul.f32 %v7852_v49, %v2210_v26  ;;  %v7945_v28 = vpack.c.bf16 %v7886_v48, %v7901_v16 }
 0x349   : > { %v2310_v56 = vmax.f32 %v2294_v4, 0.0  ;;  %v2295_v57 = vadd.f32 %v7856_v21, %v2272_v6  ;;  %v8090_v8 = vpack.c.bf16 %v7892_v55, %v7903_v32 }
 0x34a   : > { %v2308_v62 = vmax.f32 %v2292_v42, 0.0  ;;  %v2293_v33 = vadd.f32 %v7856_v21, %v2270_v43 }
 0x34b   : > { %2326 = vst.msk [vmem:[#allocation3 + $0xd0] sm:$0xff] %vm642_vm1, %v2310_v56  ;;  %2342 = vst.msk [vmem:[#allocation3 + $0xd8] sm:$0xff] %vm642_vm1, %v2310_v56  ;;  %v2311_v35 = vmax.f32 %v2295_v57, 0.0  ;;  %v7932_v63 = vld [vmem:[#allocation3 + $0x50] sm:$0xff] }
 0x34c   : > { %2340 = vst.msk [vmem:[#allocation3 + $0xb8] sm:$0xff] %vm642_vm1, %v2308_v62  ;;  %2353 = vst.msk [vmem:[#allocation3 + $0x130] sm:$0xff] %vm642_vm1, %v2308_v62  ;;  %v2309_v27 = vmax.f32 %v2293_v33, 0.0  ;;  %v5690_v37 = vpop.f32.mrb[12].mxu0  ;;  %v2384_v51 = vld [vmem:[#allocation3] sm:$0xff]  ;;  %v7955_v18 = vpack.c.bf16 %v7932_v63, %v7890_v54  ;;  %v7961_v1 = vld [vmem:[#allocation3 + $0x51] sm:$0xff] }
 0x34d   : > { %2355 = vst.msk [vmem:[#allocation3 + $0x138] sm:$0xff] %vm642_vm1, %v2308_v62  ;;  %2324 = vst.msk [vmem:[#allocation3 + $0xb0] sm:$0xff] %vm642_vm1, %v2308_v62  ;;  %v2275_v5 = vmul.f32 %v5690_v37, %v7852_v49  ;;  %v2223_v9 = vpop.f32.mrb[13].mxu0  ;;  %v2400_v13 = vpack.c.bf16 %v7912_v25, %v2384_v51  ;;  %v2356_v37 = vld [vmem:[#allocation3 + $0x7] sm:$0xff]  ;;  %v8095_v50 = vpack.c.bf16 %v7961_v1, %v7894_v58 }
 0x34e   : > { %2327 = vst.msk [vmem:[#allocation3 + $0xe0] sm:$0xff] %vm642_vm1, %v2311_v35  ;;  %2343 = vst.msk [vmem:[#allocation3 + $0xe8] sm:$0xff] %vm642_vm1, %v2311_v35  ;;  %v7938_v47 = vld [vmem:[#allocation3 + $0x60] sm:$0xff]  ;;  %v2273_v59 = vmul.f32 %v7852_v49, %v2223_v9  ;;  %v5691_v11 = vpop.f32.mrb[14].mxu0  ;;  %v8047_v9 = vld [vmem:[#allocation3 + $0x17] sm:$0xff] }
 0x34f   : > { %2325 = vst.msk [vmem:[#allocation3 + $0xc0] sm:$0xff] %vm642_vm1, %v2309_v27  ;;  %2341 = vst.msk [vmem:[#allocation3 + $0xc8] sm:$0xff] %vm642_vm1, %v2309_v27  ;;  %v7948_v34 = vld [vmem:[#allocation3 + $0x61] sm:$0xff]  ;;  %v2298_v61 = vadd.f32 %v7856_v21, %v2275_v5  ;;  %v2276_v0 = vmul.f32 %v5691_v11, %v7852_v49  ;;  %v2226_v23 = vpop.f32.mrb[15].mxu0  ;;  %5696 = vmatprep.mubr.msk.bf16.mxu1 %vm642_vm1, %v2400_v13  ;;  %v2372_v13 = vpack.c.bf16 %v8047_v9, %v2356_v37  ;;  %v8053_v11 = vld [vmem:[#allocation3 + $0x57] sm:$0xff] }
 0x350   : > { %v2296_v22 = vadd.f32 %v7856_v21, %v2273_v59  ;;  %v2274_v31 = vmul.f32 %v7852_v49, %v2226_v23  ;;  %5697 = vmatmul.mubr.msk.bf16.vlgmr.msra.gmra.mrb[0].mxu1 %vm642_vm1, %v7945_v28  ;;  %v2358_v59 = vld [vmem:[#allocation3 + $0x27] sm:$0xff] }
 0x351   : > { %v2314_v3 = vmax.f32 %v2298_v61, 0.0  ;;  %v2299_v7 = vadd.f32 %v7856_v21, %v2276_v0  ;;  %5713 = vmatpush3.bf16.msra.mxu1 %v7847_v44  ;;  %5700 = vmatprep.mubr.msk.bf16.mxu1 %vm642_vm1, %v7955_v18  ;;  %v2360_v0 = vld [vmem:[#allocation3 + $0x47] sm:$0xff]  ;;  %v2873_v2 = vpack.c.bf16 %v2358_v59, %v8047_v9 }
 0x352   : > { %v2312_v49 = vmax.f32 %v2296_v22, 0.0  ;;  %v2297_v10 = vadd.f32 %v7856_v21, %v2274_v31  ;;  %5714 = vmatprep.subr.bf16.mxu1 %v6287_v30  ;;  %v7975_v14 = vld [vmem:[#allocation3 + $0xd0] sm:$0xff]  ;;  %v8062_v22 = vpack.c.bf16 %v8053_v11, %v2360_v0 }
 0x353   : > { %2330 = vst.msk [vmem:[#allocation3 + $0x110] sm:$0xff] %vm642_vm1, %v2314_v3  ;;  %2346 = vst.msk [vmem:[#allocation3 + $0x118] sm:$0xff] %vm642_vm1, %v2314_v3  ;;  %v2315_v38 = vmax.f32 %v2299_v7, 0.0  ;;  %v7981_v40 = vld [vmem:[#allocation3 + $0xd1] sm:$0xff]  ;;  %v2362_v3 = vld [vmem:[#allocation3 + $0x67] sm:$0xff] }
 0x354   : > { %2328 = vst.msk [vmem:[#allocation3 + $0xf0] sm:$0xff] %vm642_vm1, %v2312_v49  ;;  %2344 = vst.msk [vmem:[#allocation3 + $0xf8] sm:$0xff] %vm642_vm1, %v2312_v49  ;;  %v2313_v44 = vmax.f32 %v2297_v10, 0.0  ;;  %v7989_v21 = vld [vmem:[#allocation3 + $0x70] sm:$0xff] }
 0x355   : > { %v7979_v39 = vld [vmem:[#allocation3 + $0xe0] sm:$0xff]  ;;  %2347 = vst.msk [vmem:[#allocation3 + $0x128] sm:$0xff] %vm642_vm1, %v2315_v38  ;;  %2349 = vst.msk [vmem:[#allocation3 + $0xa0] sm:$0xff] %vm642_vm1, %v2315_v38  ;;  %5715 = vmatpush3.bf16.msra.mxu1 %v6287_v30  ;;  %v8003_v60 = vpack.c.bf16 %v7989_v21, %v7938_v47  ;;  %v8005_v15 = vld [vmem:[#allocation3 + $0xb0] sm:$0xff] }
 0x356   : > { %v7983_v41 = vld [vmem:[#allocation3 + $0xe1] sm:$0xff]  ;;  %2351 = vst.msk [vmem:[#allocation3 + $0xa8] sm:$0xff] %vm642_vm1, %v2315_v38  ;;  %2331 = vst.msk [vmem:[#allocation3 + $0x120] sm:$0xff] %vm642_vm1, %v2315_v38  ;;  %5732 = vmatprep.subr.bf16.mxu1 %v6288_v36  ;;  %v8007_v19 = vld [vmem:[#allocation3 + $0xb1] sm:$0xff] }
 0x357   : > { %v7991_v45 = vld [vmem:[#allocation3 + $0xc0] sm:$0xff]  ;;  %2329 = vst.msk [vmem:[#allocation3 + $0x100] sm:$0xff] %vm642_vm1, %v2313_v44  ;;  %2345 = vst.msk [vmem:[#allocation3 + $0x108] sm:$0xff] %vm642_vm1, %v2313_v44  ;;  %v8055_v30 = vld [vmem:[#allocation3 + $0x37] sm:$0xff] }
 0x358   : > { %v7993_v46 = vld [vmem:[#allocation3 + $0xc1] sm:$0xff]  ;;  %5701 = vmatmul.mubr.msk.bf16.gmra.mrb[4].mxu1 %vm642_vm1, %v8003_v60  ;;  %v8024_v57 = vpack.c.bf16 %v7975_v14, %v7991_v45  ;;  %v8058_v61 = vpack.c.bf16 %v8055_v30, %v2358_v59  ;;  %v2363_v49 = vld [vmem:[#allocation3 + $0x77] sm:$0xff]  ;;  %v2874_v29 = vpack.c.bf16 %v2360_v0, %v8055_v30 }
 0x359   : > { %v6289_v23 = vld [vmem:[%s7356_s14 + $0x28] sm:$0xff]   ;;  %v6290_v31 = vld [vmem:[%s7356_s14 + $0x30] sm:$0xff]   ;;  %v8069_v10 = vpack.c.bf16 %v2363_v49, %v2362_v3  ;;  %v6295_v0 = vld [vmem:[%s7356_s14 + $0x58] sm:$0xff]  }
 0x35a   : > { %v8041_v51 = vld [vmem:[#allocation3 + $0x110] sm:$0xff] }
 0x35b   : > { %v8015_v26 = vld [vmem:[#allocation3 + $0xf0] sm:$0xff] }
 0x35c   : > { %v2392_v6 = vld [vmem:[#allocation3 + $0xa0] sm:$0xff]  ;;  %v8026_v62 = vld [vmem:[#allocation3 + $0xf1] sm:$0xff]  ;;  %v8031_v33 = vpack.c.bf16 %v8015_v26, %v7979_v39 }
 0x35d   : > { %v2404_v42 = vpack.c.bf16 %v8005_v15, %v2392_v6  ;;  %v2364_v7 = vld [vmem:[#allocation3 + $0xa7] sm:$0xff]  ;;  %v2365_v38 = vld [vmem:[#allocation3 + $0xb7] sm:$0xff] }
 0x35e   : > { %v8018_v43 = vld [vmem:[#allocation3 + $0x100] sm:$0xff]  ;;  %v2376_v44 = vpack.c.bf16 %v2365_v38, %v2364_v7  ;;  %v2369_v6 = vld [vmem:[#allocation3 + $0xf7] sm:$0xff] }
 0x35f   : > { %v8020_v56 = vld [vmem:[#allocation3 + $0x101] sm:$0xff]  ;;  %5704 = vmatprep.mubr.msk.bf16.mxu1 %vm642_vm1, %v2404_v42  ;;  %v8045_v5 = vpack.c.bf16 %v8041_v51, %v8018_v43  ;;  %v2367_v42 = vld [vmem:[#allocation3 + $0xd7] sm:$0xff] }
 0x360   : > { %5705 = vmatmul.mubr.msk.bf16.gmra.mrb[8].mxu1 %vm642_vm1, %v8024_v57  ;;  %v2679_v7 = vld [vmem:[#allocation3 + $0x1] sm:$0xff]  ;;  %v2371_v53 = vld [vmem:[#allocation3 + $0x117] sm:$0xff] }
 0x361   : > { %5708 = vmatprep.mubr.msk.bf16.mxu1 %vm642_vm1, %v8031_v33  ;;  %v2695_v4 = vpack.c.bf16 %v7916_v12, %v2679_v7  ;;  %v6292_v7 = vld [vmem:[%s7356_s14 + $0x40] sm:$0xff]  }
 0x362   : > { %v2687_v35 = vld [vmem:[#allocation3 + $0xa1] sm:$0xff] }
 0x363   : > { %v2699_v24 = vpack.c.bf16 %v8007_v19, %v2687_v35  ;;  %v8124_v35 = vld [vmem:[#allocation3 + $0x111] sm:$0xff] }
 0x368   : > { %5709 = vmatmul.mubr.msk.bf16.gmra.mrb[12].mxu1 %vm642_vm1, %v8045_v5 }
 0x369   : > { %5716 = vmatprep.mubr.msk.bf16.mxu1 %vm642_vm1, %v2372_v13  ;;  %v2368_v13 = vld [vmem:[#allocation3 + $0xe7] sm:$0xff] }
 0x36a   : > { %v8076_v27 = vpack.c.bf16 %v2369_v6, %v2368_v13 }
 0x370   : > { %5717 = vmatmul.mubr.msk.bf16.vlgmr.msra.gmra.mrb[0].mxu1 %vm642_vm1, %v8058_v61 }
 0x371   : > { %5733 = vmatpush3.bf16.msra.mxu1 %v6288_v36  ;;  %5720 = vmatprep.mubr.msk.bf16.mxu1 %vm642_vm1, %v8062_v22  ;;  %v2366_v36 = vld [vmem:[#allocation3 + $0xc7] sm:$0xff] }
 0x372   : > { %5734 = vmatprep.subr.bf16.mxu1 %v6289_v23  ;;  %v8074_v37 = vpack.c.bf16 %v2367_v42, %v2366_v36  ;;  %v2877_v59 = vpack.c.bf16 %v2366_v36, %v2365_v38  ;;  %v3042_v38 = vld [vmem:[#allocation3 + $0x80] sm:$0xff] }
 0x375   : > { %5735 = vmatpush3.bf16.msra.mxu1 %v6289_v23  ;;  %v2370_v23 = vld [vmem:[#allocation3 + $0x107] sm:$0xff] }
 0x376   : > { %5752 = vmatprep.subr.bf16.mxu1 %v6290_v31 }
 0x378   : > { %5721 = vmatmul.mubr.msk.bf16.gmra.mrb[4].mxu1 %vm642_vm1, %v8069_v10 }
 0x379   : > { %5724 = vmatprep.mubr.msk.bf16.mxu1 %vm642_vm1, %v2376_v44  ;;  %v8082_v44 = vpack.c.bf16 %v2371_v53, %v2370_v23 }
 0x380   : > { %5725 = vmatmul.mubr.msk.bf16.gmra.mrb[8].mxu1 %vm642_vm1, %v8074_v37 }
 0x381   : > { %5728 = vmatprep.mubr.msk.bf16.mxu1 %vm642_vm1, %v8076_v27 }
 0x388   : > { %5729 = vmatmul.mubr.msk.bf16.gmra.mrb[12].mxu1 %vm642_vm1, %v8082_v44 }
 0x389   : > { %5736 = vmatprep.mubr.msk.bf16.mxu1 %vm642_vm1, %v2695_v4  ;;  %v8102_v4 = vld [vmem:[#allocation3 + $0x71] sm:$0xff] }
 0x38a   : > { %v8106_v52 = vpack.c.bf16 %v8102_v4, %v7948_v34 }
 0x38c   : > { %9371 = vst [vmem:[#allocation47_spill] sm:$0xff] %v8106_v52 }
 0x390   : > { %5737 = vmatmul.mubr.msk.bf16.vlgmr.msra.gmra.mrb[0].mxu1 %vm642_vm1, %v8090_v8 }
 0x391   : > { %5753 = vmatpush3.bf16.msra.mxu1 %v6290_v31  ;;  %5740 = vmatprep.mubr.msk.bf16.mxu1 %vm642_vm1, %v8095_v50  ;;  %v8114_v31 = vpack.c.bf16 %v7981_v40, %v7993_v46 }
 0x392   : > { %5754 = vmatprep.subr.bf16.mxu1 %v6291_v17 }
 0x393   : > { %9372 = vst [vmem:[#allocation48_spill] sm:$0xff] %v8114_v31 }
 0x395   : > { %5755 = vmatpush3.bf16.msra.mxu1 %v6291_v17  ;;  %v8118_v17 = vpack.c.bf16 %v8026_v62, %v7983_v41 }
 0x396   : > { %5772 = vmatprep.subr.bf16.mxu1 %v6292_v7 }
 0x397   : > { %9373 = vst [vmem:[#allocation49_spill] sm:$0xff] %v8118_v17 }
 0x398   : > { %5741 = vmatmul.mubr.msk.bf16.gmra.mrb[4].mxu1 %vm642_vm1, %v8106_v52  ;;  %v2864_v52 = vld [vmem:[#allocation3 + $0x87] sm:$0xff] }
 0x399   : > { %5744 = vmatprep.mubr.msk.bf16.mxu1 %vm642_vm1, %v2699_v24  ;;  %v8128_v24 = vpack.c.bf16 %v8124_v35, %v8020_v56  ;;  %v2876_v9 = vpack.c.bf16 %v2864_v52, %v2363_v49  ;;  %v9376_v49 = vpack.c.bf16 %v7938_v47, %v7932_v63  ;;  %v3050_v63 = vld [vmem:[#allocation3 + $0x120] sm:$0xff] }
 0x39a   : > { %v3058_v47 = vpack.c.bf16 %v3050_v63, %v8041_v51  ;;  %v9387_v51 = vld [vmem:[#allocation48_spill] sm:$0xff] }
 0x3a0   : > { %5745 = vmatmul.mubr.msk.bf16.gmra.mrb[8].mxu1 %vm642_vm1, %v8114_v31  ;;  %v2875_v31 = vpack.c.bf16 %v2362_v3, %v8053_v11  ;;  %v2879_v11 = vpack.c.bf16 %v2370_v23, %v2369_v6  ;;  %v9375_v3 = vpack.c.bf16 %v7890_v54, %v7886_v48  ;;  %v9377_v48 = vpack.c.bf16 %v7991_v45, %v8005_v15  ;;  %v6297_v45 = vld [vmem:[%s7356_s14 + $0x68] sm:$0xff]   ;;  %v6298_v15 = vld [vmem:[%s7356_s14 + $0x70] sm:$0xff]  }
 0x3a1   : > { %5748 = vmatprep.mubr.msk.bf16.mxu1 %vm642_vm1, %v8118_v17  ;;  %v6294_v17 = vld [vmem:[%s7356_s14 + $0x50] sm:$0xff]   ;;  %v9378_v54 = vpack.c.bf16 %v7979_v39, %v7975_v14  ;;  %v9381_v14 = vpack.c.bf16 %v7894_v58, %v7892_v55  ;;  %v9382_v39 = vpack.c.bf16 %v7948_v34, %v7961_v1  ;;  %v9383_v55 = vpack.c.bf16 %v7993_v46, %v8007_v19  ;;  %v6299_v46 = vld [vmem:[%s7356_s14 + $0x78] sm:$0xff]  }
 0x3a2   : > { %v9384_v58 = vpack.c.bf16 %v7983_v41, %v7981_v40  ;;  %v3228_v34 = vld [vmem:[#allocation3 + $0x121] sm:$0xff]  ;;  %v3398_v41 = vld [vmem:[#allocation3 + $0x97] sm:$0xff] }
 0x3a3   : > { %v3236_v1 = vpack.c.bf16 %v3228_v34, %v8124_v35  ;;  %v6300_v40 = vld [vmem:[%s7356_s14 + $0x80] sm:$0xff]   ;;  %v3410_v19 = vpack.c.bf16 %v3398_v41, %v2864_v52  ;;  %v6301_v52 = vld [vmem:[%s7356_s14 + $0x88] sm:$0xff]  }
 0x3a8   : > { %5749 = vmatmul.mubr.msk.bf16.gmra.mrb[12].mxu1 %vm642_vm1, %v8128_v24 }
 0x3a9   : > { %5756 = vmatprep.mubr.msk.bf16.mxu1 %vm642_vm1, %v2873_v2  ;;  %v2878_v2 = vpack.c.bf16 %v2368_v13, %v2367_v42 }
 0x3b0   : > { %5757 = vmatmul.mubr.msk.bf16.vlgmr.msra.gmra.mrb[0].mxu1 %vm642_vm1, %v2874_v29  ;;  %v2872_v29 = vld [vmem:[#allocation3 + $0x127] sm:$0xff] }
 0x3b1   : > { %5773 = vmatpush3.bf16.msra.mxu1 %v6292_v7  ;;  %5760 = vmatprep.mubr.msk.bf16.mxu1 %vm642_vm1, %v2875_v31  ;;  %v2880_v30 = vpack.c.bf16 %v2872_v29, %v2371_v53  ;;  %v6296_v53 = vld [vmem:[%s7356_s14 + $0x60] sm:$0xff]  }
 0x3b2   : > { %5774 = vmatprep.subr.bf16.mxu1 %v6293_v20  ;;  %v9389_v31 = vld [vmem:[#allocation34_spill] sm:$0xff] }
 0x3b5   : > { %5775 = vmatpush3.bf16.msra.mxu1 %v6293_v20  ;;  %v9374_v20 = vpack.c.bf16 %v7901_v16, %v7912_v25  ;;  %v3054_v16 = vpack.c.bf16 %v3042_v38, %v7989_v21  ;;  %v9379_v25 = vpack.c.bf16 %v8018_v43, %v8015_v26  ;;  %v9380_v21 = vpack.c.bf16 %v7903_v32, %v7916_v12  ;;  %v3220_v26 = vld [vmem:[#allocation3 + $0x81] sm:$0xff]  ;;  %v3406_v43 = vld [vmem:[#allocation3 + $0x137] sm:$0xff] }
 0x3b6   : > { %5792 = vmatprep.subr.bf16.mxu1 %v6294_v17  ;;  %v3232_v32 = vpack.c.bf16 %v3220_v26, %v8102_v4  ;;  %v9385_v12 = vpack.c.bf16 %v8020_v56, %v8026_v62  ;;  %v3414_v56 = vpack.c.bf16 %v3406_v43, %v2872_v29  ;;  %v3576_v62 = vld [vmem:[#allocation3 + $0x90] sm:$0xff] }
 0x3b8   : > { %5761 = vmatmul.mubr.msk.bf16.gmra.mrb[4].mxu1 %vm642_vm1, %v2876_v9 }
 0x3b9   : > { %5764 = vmatprep.mubr.msk.bf16.mxu1 %vm642_vm1, %v2877_v59 }
 0x3c0   : > { %5765 = vmatmul.mubr.msk.bf16.gmra.mrb[8].mxu1 %vm642_vm1, %v2878_v2 }
 0x3c1   : > { %5768 = vmatprep.mubr.msk.bf16.mxu1 %vm642_vm1, %v2879_v11  ;;  %v9391_v11 = vld [vmem:[#allocation35_spill] sm:$0xff] }
 0x3c8   : > { %5769 = vmatmul.mubr.msk.bf16.gmra.mrb[12].mxu1 %vm642_vm1, %v2880_v30 }
 0x3c9   : > { %5776 = vmatprep.mubr.msk.bf16.mxu1 %vm642_vm1, %v9374_v20  ;;  %v9392_v20 = vld [vmem:[#allocation33_spill] sm:$0xff] }
 0x3d0   : > { %5777 = vmatmul.mubr.msk.bf16.vlgmr.msra.gmra.mrb[0].mxu1 %vm642_vm1, %v9375_v3 }
 0x3d1   : > { %5793 = vmatpush3.bf16.msra.mxu1 %v6294_v17  ;;  %5780 = vmatprep.mubr.msk.bf16.mxu1 %vm642_vm1, %v9376_v49 }
 0x3d2   : > { %5794 = vmatprep.subr.bf16.mxu1 %v6295_v0 }
 0x3d5   : > { %5795 = vmatpush3.bf16.msra.mxu1 %v6295_v0 }
 0x3d6   : > { %5812 = vmatprep.subr.bf16.mxu1 %v6296_v53 }
 0x3d8   : > { %5781 = vmatmul.mubr.msk.bf16.gmra.mrb[4].mxu1 %vm642_vm1, %v3054_v16 }
 0x3d9   : > { %5784 = vmatprep.mubr.msk.bf16.mxu1 %vm642_vm1, %v9377_v48 }
 0x3e0   : > { %5785 = vmatmul.mubr.msk.bf16.gmra.mrb[8].mxu1 %vm642_vm1, %v9378_v54 }
 0x3e1   : > { %5788 = vmatprep.mubr.msk.bf16.mxu1 %vm642_vm1, %v9379_v25 }
 0x3e8   : > { %5789 = vmatmul.mubr.msk.bf16.gmra.mrb[12].mxu1 %vm642_vm1, %v3058_v47 }
 0x3e9   : > { %5796 = vmatprep.mubr.msk.bf16.mxu1 %vm642_vm1, %v9380_v21 }
 0x3f0   : > { %5797 = vmatmul.mubr.msk.bf16.vlgmr.msra.gmra.mrb[0].mxu1 %vm642_vm1, %v9381_v14  ;;  %v9393_v14 = vld [vmem:[#allocation38_spill] sm:$0xff] }
 0x3f1   : > { %5813 = vmatpush3.bf16.msra.mxu1 %v6296_v53  ;;  %5800 = vmatprep.mubr.msk.bf16.mxu1 %vm642_vm1, %v9382_v39 }
 0x3f2   : > { %5814 = vmatprep.subr.bf16.mxu1 %v6297_v45 }
 0x3f5   : > { %5815 = vmatpush3.bf16.msra.mxu1 %v6297_v45 }
 0x3f6   : > { %5832 = vmatprep.subr.bf16.mxu1 %v6298_v15 }
 0x3f8   : > { %5801 = vmatmul.mubr.msk.bf16.gmra.mrb[4].mxu1 %vm642_vm1, %v3232_v32 }
 0x3f9   : > { %5804 = vmatprep.mubr.msk.bf16.mxu1 %vm642_vm1, %v9383_v55 }
 0x400   : > { %5805 = vmatmul.mubr.msk.bf16.gmra.mrb[8].mxu1 %vm642_vm1, %v9384_v58 }
 0x401   : > { %5808 = vmatprep.mubr.msk.bf16.mxu1 %vm642_vm1, %v9385_v12  ;;  %v9395_v12 = vld [vmem:[#allocation32_spill] sm:$0xff] }
 0x408   : > { %5809 = vmatmul.mubr.msk.bf16.gmra.mrb[12].mxu1 %vm642_vm1, %v3236_v1 }
 0x409   : > { %5816 = vmatprep.mubr.msk.bf16.mxu1 %vm642_vm1, %v8058_v61 }
 0x410   : > { %5817 = vmatmul.mubr.msk.bf16.vlgmr.msra.gmra.mrb[0].mxu1 %vm642_vm1, %v8062_v22 }
 0x411   : > { %5833 = vmatpush3.bf16.msra.mxu1 %v6298_v15  ;;  %5820 = vmatprep.mubr.msk.bf16.mxu1 %vm642_vm1, %v8069_v10  ;;  %v8256_v10 = vld [vmem:[%s522_s23] ss:$0 sm:$0xff] }
 0x412   : > { %5834 = vmatprep.subr.bf16.mxu1 %v6299_v46 }
 0x415   : > { %5835 = vmatpush3.bf16.msra.mxu1 %v6299_v46  ;;  %v9396_v46 = vld [vmem:[#allocation37_spill] sm:$0xff] }
 0x416   : > { %5852 = vmatprep.subr.bf16.mxu1 %v6300_v40 }
 0x418   : > { %5821 = vmatmul.mubr.msk.bf16.gmra.mrb[4].mxu1 %vm642_vm1, %v3410_v19 }
 0x419   : > { %5824 = vmatprep.mubr.msk.bf16.mxu1 %vm642_vm1, %v8074_v37 }
 0x420   : > { %5825 = vmatmul.mubr.msk.bf16.gmra.mrb[8].mxu1 %vm642_vm1, %v8076_v27  ;;  %v3588_v27 = vpack.c.bf16 %v3576_v62, %v3042_v38 }
 0x421   : > { %5828 = vmatprep.mubr.msk.bf16.mxu1 %vm642_vm1, %v8082_v44 }
 0x428   : > { %5829 = vmatmul.mubr.msk.bf16.gmra.mrb[12].mxu1 %vm642_vm1, %v3414_v56 }
 0x429   : > { %5836 = vmatprep.mubr.msk.bf16.mxu1 %vm642_vm1, %v7945_v28  ;;  %v3584_v28 = vld [vmem:[#allocation3 + $0x130] sm:$0xff] }
 0x430   : > { %5837 = vmatmul.mubr.msk.bf16.vlgmr.msra.gmra.mrb[0].mxu1 %vm642_vm1, %v7955_v18  ;;  %v3592_v18 = vpack.c.bf16 %v3584_v28, %v3050_v63 }
 0x431   : > { %5853 = vmatpush3.bf16.msra.mxu1 %v6300_v40  ;;  %5840 = vmatprep.mubr.msk.bf16.mxu1 %vm642_vm1, %v8003_v60  ;;  %v9386_v60 = vld [vmem:[#allocation47_spill] sm:$0xff] }
 0x432   : > { %5854 = vmatprep.subr.bf16.mxu1 %v6301_v52 }
 0x435   : > { %5855 = vmatpush3.bf16.msra.mxu1 %v6301_v52 }
 0x438   : > { %5841 = vmatmul.mubr.msk.bf16.gmra.mrb[4].mxu1 %vm642_vm1, %v3588_v27 }
 0x439   : > { %5844 = vmatprep.mubr.msk.bf16.mxu1 %vm642_vm1, %v8024_v57  ;;  %v3754_v57 = vld [vmem:[#allocation3 + $0x91] sm:$0xff] }
 0x440   : > { %5845 = vmatmul.mubr.msk.bf16.gmra.mrb[8].mxu1 %vm642_vm1, %v8031_v33  ;;  %v3766_v33 = vpack.c.bf16 %v3754_v57, %v3220_v26  ;;  %v9394_v26 = vld [vmem:[#allocation36_spill] sm:$0xff] }
 0x441   : > { %5848 = vmatprep.mubr.msk.bf16.mxu1 %vm642_vm1, %v8045_v5  ;;  %v9388_v5 = vld [vmem:[#allocation49_spill] sm:$0xff] }
 0x448   : > { %5849 = vmatmul.mubr.msk.bf16.gmra.mrb[12].mxu1 %vm642_vm1, %v3592_v18 }
 0x449   : > { %5856 = vmatprep.mubr.msk.bf16.mxu1 %vm642_vm1, %v8090_v8  ;;  %v3762_v8 = vld [vmem:[#allocation3 + $0x131] sm:$0xff] }
 0x44a   : > { %v3770_v61 = vpack.c.bf16 %v3762_v8, %v3228_v34 }
 0x450   : > { %5857 = vmatmul.mubr.msk.bf16.vlgmr.msra.gmra.mrb[0].mxu1 %vm642_vm1, %v8095_v50  ;;  %v8252_v50 = vld [vmem:[%s514_s26] ss:$0 sm:$0xff] }
 0x451   : > { %5860 = vmatprep.mubr.msk.bf16.mxu1 %vm642_vm1, %v9386_v60 }
 0x458   : > { %5861 = vmatmul.mubr.msk.bf16.gmra.mrb[4].mxu1 %vm642_vm1, %v3766_v33 }
 0x459   : > { %5864 = vmatprep.mubr.msk.bf16.mxu1 %vm642_vm1, %v9387_v51  ;;  %v9397_v51 = vld [vmem:[#allocation42_spill] sm:$0xff] }
 0x460   : > { %5865 = vmatmul.mubr.msk.bf16.gmra.mrb[8].mxu1 %vm642_vm1, %v9388_v5 }
 0x461   : > { %5868 = vmatprep.mubr.msk.bf16.mxu1 %vm642_vm1, %v8128_v24  ;;  %v9390_v24 = vld [vmem:[#allocation31_spill] sm:$0xff] }
 0x468   : > { %5869 = vmatmul.mubr.msk.bf16.gmra.mrb[12].mxu1 %vm642_vm1, %v3770_v61  ;;  %v9398_v61 = vld [vmem:[#allocation39_spill] sm:$0xff] }
 0x523   : > { %v5858_v22 = vpop.f32.mrb[0].mxu1 }
 0x524   : > { %v3934_v36 = vmul.f32 %v5858_v22, %v8252_v50  ;;  %v3846_v6 = vpop.f32.mrb[1].mxu1 }
 0x525   : > { %v3932_v42 = vmul.f32 %v8252_v50, %v3846_v6  ;;  %v5859_v37 = vpop.f32.mrb[2].mxu1 }
 0x526   : > { %v3957_v13 = vadd.f32 %v8256_v10, %v3934_v36  ;;  %v3935_v23 = vmul.f32 %v5859_v37, %v8252_v50  ;;  %v3849_v44 = vpop.f32.mrb[3].mxu1 }
 0x527   : > { %v3955_v7 = vadd.f32 %v8256_v10, %v3932_v42  ;;  %v3933_v4 = vmul.f32 %v8252_v50, %v3849_v44  ;;  %v9399_v42 = vld [vmem:[#allocation43_spill] sm:$0xff] }
 0x528   : > { %v8265_v17 = vadd.f32 %v3957_v13, %v9389_v31  ;;  %v3958_v35 = vadd.f32 %v8256_v10, %v3935_v23  ;;  %v9400_v23 = vld [vmem:[#allocation41_spill] sm:$0xff] }
 0x529   : > { %v8269_v9 = vadd.f32 %v3955_v7, %v9390_v24  ;;  %v3956_v59 = vadd.f32 %v8256_v10, %v3933_v4 }
 0x52a   : > { %v3989_v2 = vmax.f32 %v8265_v17, 0.0  ;;  %v8274_v29 = vadd.f32 %v3958_v35, %v9391_v11 }
 0x52b   : > { %v3987_v30 = vmax.f32 %v8269_v9, 0.0  ;;  %v8278_v0 = vadd.f32 %v3956_v59, %v9392_v20  ;;  %v5862_v3 = vpop.f32.mrb[4].mxu1 }
 0x52c   : > { %4005 = vst.msk [vmem:[#allocation2 + $0x10] sm:$0xff] %vm642_vm1, %v3989_v2  ;;  %v3990_v49 = vmax.f32 %v8274_v29, 0.0  ;;  %v3938_v53 = vmul.f32 %v5862_v3, %v8252_v50  ;;  %v3862_v38 = vpop.f32.mrb[5].mxu1 }
 0x52d   : > { %4003 = vst.msk [vmem:[#allocation2] sm:$0xff] %vm642_vm1, %v3987_v30  ;;  %v3988_v16 = vmax.f32 %v8278_v0, 0.0  ;;  %v3936_v48 = vmul.f32 %v8252_v50, %v3862_v38  ;;  %v5863_v54 = vpop.f32.mrb[6].mxu1 }
 0x52e   : > { %4006 = vst.msk [vmem:[#allocation2 + $0x18] sm:$0xff] %vm642_vm1, %v3990_v49  ;;  %v3961_v25 = vadd.f32 %v8256_v10, %v3938_v53  ;;  %v3939_v63 = vmul.f32 %v5863_v54, %v8252_v50  ;;  %v3865_v47 = vpop.f32.mrb[7].mxu1  ;;  %v9401_v54 = vld [vmem:[#allocation46_spill] sm:$0xff] }
 0x52f   : > { %4004 = vst.msk [vmem:[#allocation2 + $0x8] sm:$0xff] %vm642_vm1, %v3988_v16  ;;  %v3959_v21 = vadd.f32 %v8256_v10, %v3936_v48  ;;  %v3937_v45 = vmul.f32 %v8252_v50, %v3865_v47  ;;  %v9402_v47 = vld [vmem:[#allocation44_spill] sm:$0xff] }
 0x530   : > { %v8301_v39 = vadd.f32 %v3961_v25, %v9393_v14  ;;  %v3962_v15 = vadd.f32 %v8256_v10, %v3939_v63 }
 0x531   : > { %v8305_v32 = vadd.f32 %v3959_v21, %v9394_v26  ;;  %v3960_v55 = vadd.f32 %v8256_v10, %v3937_v45 }
 0x532   : > { %v3993_v58 = vmax.f32 %v8301_v39, 0.0  ;;  %v8310_v34 = vadd.f32 %v3962_v15, %v9395_v12  ;;  %v9403_v15 = vld [vmem:[#allocation40_spill] sm:$0xff]  ;;  %v9404_v12 = vld [vmem:[#allocation45_spill] sm:$0xff] }
 0x533   : > { %v3991_v1 = vmax.f32 %v8305_v32, 0.0  ;;  %v8314_v40 = vadd.f32 %v3960_v55, %v9396_v46  ;;  %v5866_v41 = vpop.f32.mrb[8].mxu1 }
 0x534   : > { %4009 = vst.msk [vmem:[#allocation2 + $0x30] sm:$0xff] %vm642_vm1, %v3993_v58  ;;  %v3994_v19 = vmax.f32 %v8310_v34, 0.0  ;;  %v3942_v43 = vmul.f32 %v5866_v41, %v8252_v50  ;;  %v3878_v56 = vpop.f32.mrb[9].mxu1 }
 0x535   : > { %4007 = vst.msk [vmem:[#allocation2 + $0x20] sm:$0xff] %vm642_vm1, %v3991_v1  ;;  %v3992_v52 = vmax.f32 %v8314_v40, 0.0  ;;  %v3940_v62 = vmul.f32 %v8252_v50, %v3878_v56  ;;  %v5867_v27 = vpop.f32.mrb[10].mxu1 }
 0x536   : > { %4010 = vst.msk [vmem:[#allocation2 + $0x38] sm:$0xff] %vm642_vm1, %v3994_v19  ;;  %v3965_v28 = vadd.f32 %v8256_v10, %v3942_v43  ;;  %v3943_v18 = vmul.f32 %v5867_v27, %v8252_v50  ;;  %v3881_v60 = vpop.f32.mrb[11].mxu1 }
 0x537   : > { %4008 = vst.msk [vmem:[#allocation2 + $0x28] sm:$0xff] %vm642_vm1, %v3992_v52  ;;  %v3963_v57 = vadd.f32 %v8256_v10, %v3940_v62  ;;  %v3941_v33 = vmul.f32 %v8252_v50, %v3881_v60 }
 0x538   : > { %v3981_v5 = vadd.f32 %v3965_v28, %v9397_v51  ;;  %v3966_v8 = vadd.f32 %v8256_v10, %v3943_v18 }
 0x539   : > { %v3979_v22 = vadd.f32 %v3963_v57, %v9398_v61  ;;  %v3964_v36 = vadd.f32 %v8256_v10, %v3941_v33 }
 0x53a   : > { %v3997_v6 = vmax.f32 %v3981_v5, 0.0  ;;  %v3982_v37 = vadd.f32 %v3966_v8, %v9399_v42 }
 0x53b   : > { %v3995_v13 = vmax.f32 %v3979_v22, 0.0  ;;  %v3980_v44 = vadd.f32 %v3964_v36, %v9400_v23  ;;  %v5870_v7 = vpop.f32.mrb[12].mxu1 }
 0x53c   : > { %4013 = vst.msk [vmem:[#allocation2 + $0x50] sm:$0xff] %vm642_vm1, %v3997_v6  ;;  %v3998_v4 = vmax.f32 %v3982_v37, 0.0  ;;  %v3946_v31 = vmul.f32 %v5870_v7, %v8252_v50  ;;  %v3894_v35 = vpop.f32.mrb[13].mxu1 }
 0x53d   : > { %4011 = vst.msk [vmem:[#allocation2 + $0x40] sm:$0xff] %vm642_vm1, %v3995_v13  ;;  %v3996_v24 = vmax.f32 %v3980_v44, 0.0  ;;  %v3944_v59 = vmul.f32 %v8252_v50, %v3894_v35  ;;  %v5871_v11 = vpop.f32.mrb[14].mxu1 }
 0x53e   : > { %4014 = vst.msk [vmem:[#allocation2 + $0x58] sm:$0xff] %vm642_vm1, %v3998_v4  ;;  %v3969_v20 = vadd.f32 %v8256_v10, %v3946_v31  ;;  %v3947_v3 = vmul.f32 %v5871_v11, %v8252_v50  ;;  %v3897_v53 = vpop.f32.mrb[15].mxu1 }
 0x53f   : > { %4012 = vst.msk [vmem:[#allocation2 + $0x48] sm:$0xff] %vm642_vm1, %v3996_v24  ;;  %v3967_v38 = vadd.f32 %v8256_v10, %v3944_v59  ;;  %v3945_v48 = vmul.f32 %v8252_v50, %v3897_v53 }
 0x540   : > { %v3985_v25 = vadd.f32 %v3969_v20, %v9401_v54  ;;  %v3970_v63 = vadd.f32 %v8256_v10, %v3947_v3 }
 0x541   : > { %v3983_v21 = vadd.f32 %v3967_v38, %v9402_v47  ;;  %v3968_v45 = vadd.f32 %v8256_v10, %v3945_v48  ;;  %4022 = sbr.rel (%p5307_p1) target bundleno = 2021 (0x7e5), region = 108 }
 0x542   : > { %v4001_v14 = vmax.f32 %v3985_v25, 0.0  ;;  %v3986_v26 = vadd.f32 %v3970_v63, %v9403_v15 }
 0x543   : > { %v3999_v55 = vmax.f32 %v3983_v21, 0.0  ;;  %v3984_v46 = vadd.f32 %v3968_v45, %v9404_v12 }
 0x544   : > { %4017 = vst.msk [vmem:[#allocation2 + $0x70] sm:$0xff] %vm642_vm1, %v4001_v14  ;;  %v4002_v41 = vmax.f32 %v3986_v26, 0.0 }
 0x545   : > { %4015 = vst.msk [vmem:[#allocation2 + $0x60] sm:$0xff] %vm642_vm1, %v3999_v55  ;;  %v4000_v50 = vmax.f32 %v3984_v46, 0.0 }
 0x546   : > { %4018 = vst.msk [vmem:[#allocation2 + $0x78] sm:$0xff] %vm642_vm1, %v4002_v41 }
 0x547   : > { %4016 = vst.msk [vmem:[#allocation2 + $0x68] sm:$0xff] %vm642_vm1, %v4000_v50 }
 0x548   : > { %v6302_v10 = vld [vmem:[#allocation15] sm:$0xff]   ;;  %v6303_v43 = vld [vmem:[#allocation15 + $0x8] sm:$0xff]   ;;  %v4023_v56 = vpack.c.bf16 %v3988_v16, %v3987_v30  ;;  %v4027_v62 = vpack.c.bf16 %v3996_v24, %v3995_v13  ;;  %v4024_v27 = vpack.c.bf16 %v3990_v49, %v3989_v2  ;;  %v4028_v9 = vpack.c.bf16 %v3998_v4, %v3997_v6  ;;  %v8387_v49 = vld [vmem:[#allocation17] ss:$0 sm:$0xff]  ;;  %s9433_s12 = sld [smem:[#allocation72_spill]] }
 0x549   : > { %5872 = vmatprep.subr.bf16.mxu0 %v6302_v10  ;;  %6148 = vmatprep.subr.bf16.mxu1 %v6302_v10  ;;  %v4025_v30 = vpack.c.bf16 %v3992_v52, %v3991_v1  ;;  %v4029_v0 = vpack.c.bf16 %v4000_v50, %v3999_v55  ;;  %v4026_v17 = vpack.c.bf16 %v3994_v19, %v3993_v58  ;;  %v4214_v29 = vlaneseq  ;;  %v8391_v1 = vld [vmem:[#allocation18] ss:$0 sm:$0xff] }
 0x54a   : > { %5873 = vmatpush3.bf16.msra.mxu0 %v6302_v10  ;;  %6150 = vmatpush3.bf16.msra.mxu1 %v6302_v10  ;;  %v4030_v2 = vpack.c.bf16 %v4002_v41, %v4001_v14 }
 0x54b   : > { %5874 = vmatprep.subr.bf16.mxu0 %v6303_v43  ;;  %6149 = vmatprep.subr.bf16.mxu1 %v6303_v43  ;;  %v8389_v16 = vand.u32 127, %v4214_v29 }
 0x54c   : > { %5876 = vmatprep.mubr.msk.bf16.mxu0 %vm642_vm1, %v4023_v56  ;;  %5884 = vmatprep.mubr.msk.bf16.mxu1 %vm642_vm1, %v4027_v62 }
 0x54d   : > { %9405 = vst [vmem:[#allocation50_spill] sm:$0xff] %v8389_v16  ;;  %vm4217_vm2 = vcmp.lt.s32.totalorder %v8389_v16, 12  ;;  %vm4475_vm3 = vcmp.ge.s32.totalorder %v8389_v16, 15  ;;  %vm4476_vm4 = vcmp.lt.s32.totalorder %v8389_v16, 20  ;;  %vm4638_vm6 = vcmp.ge.s32.totalorder %v8389_v16, 20 }
 0x54e   : > { %5875 = vmatpush3.bf16.msra.mxu0 %v6303_v43  ;;  %6151 = vmatpush3.bf16.msra.mxu1 %v6303_v43  ;;  %vm8425_vm5 = vmand %vm4475_vm3, %vm4476_vm4  ;;  %vm4639_vm7 = vcmp.lt.s32.totalorder %v8389_v16, 28 }
 0x54f   : > { %vm8469_vm8 = vmand %vm4638_vm6, %vm4639_vm7 }
 0x551   : > { %5877 = vmatmul.mubr.msk.bf16.vlgmr.msra.gmra.mrb[0].mxu0 %vm642_vm1, %v4024_v27  ;;  %5885 = vmatmul.mubr.msk.bf16.vlgmr.msra.gmra.mrb[0].mxu1 %vm642_vm1, %v4028_v9 }
 0x552   : > { %5880 = vmatprep.mubr.msk.bf16.mxu0 %vm642_vm1, %v4025_v30  ;;  %5888 = vmatprep.mubr.msk.bf16.mxu1 %vm642_vm1, %v4029_v0 }
 0x559   : > { %5881 = vmatmul.mubr.msk.bf16.gmra.mrb[4].mxu0 %vm642_vm1, %v4026_v17  ;;  %5889 = vmatmul.mubr.msk.bf16.gmra.mrb[4].mxu1 %vm642_vm1, %v4030_v2 }
 0x624   : > { %v5878_v32 = vpop.f32.mrb[0].mxu0  ;;  %v5886_v40 = vpop.f32.mrb[0].mxu1 }
 0x625   : > { %v4177_v52 = vmul.f32 %v5878_v32, %v8387_v49  ;;  %v4185_v39 = vmul.f32 %v5886_v40, %v8387_v49  ;;  %v4105_v34 = vpop.f32.mrb[1].mxu0  ;;  %v4137_v58 = vpop.f32.mrb[1].mxu1 }
 0x626   : > { %v4175_v19 = vmul.f32 %v8387_v49, %v4105_v34  ;;  %v5879_v28 = vpop.f32.mrb[2].mxu0  ;;  %v5887_v18 = vpop.f32.mrb[2].mxu1  ;;  %v4183_v5 = vmul.f32 %v8387_v49, %v4137_v58 }
 0x627   : > { %v8398_v60 = vadd.f32 %v8391_v1, %v4177_v52  ;;  %v8401_v57 = vadd.f32 %v8391_v1, %v4185_v39  ;;  %v4108_v33 = vpop.f32.mrb[3].mxu0  ;;  %v8403_v51 = vpop.f32.mrb[3].mxu1  ;;  %v4178_v23 = vmul.f32 %v5879_v28, %v8387_v49  ;;  %v4186_v53 = vmul.f32 %v5887_v18, %v8387_v49 }
 0x628   : > { %v8414_v61 = vadd.f32 %v8391_v1, %v4175_v19  ;;  %v8430_v6 = vadd.f32 %v8391_v1, %v4183_v5  ;;  %v4176_v15 = vmul.f32 %v8387_v49, %v4108_v33  ;;  %v4184_v0 = vmul.f32 %v8387_v49, %v8403_v51 }
 0x629   : > { %9406 = vst [vmem:[#allocation51_spill] sm:$0xff] %v8401_v57  ;;  %v8411_v8 = vsel %vm4217_vm2, %v8401_v57, -inf  ;;  %v8420_v22 = vsel %vm4217_vm2, %v8398_v60, -inf  ;;  %v8442_v44 = vsel %vm8425_vm5, %v8398_v60, -inf  ;;  %v8454_v59 = vsel %vm8425_vm5, %v8401_v57, -inf }
 0x62a   : > { %9407 = vst [vmem:[#allocation52_spill] sm:$0xff] %v8414_v61  ;;  %4255 = vmax.xlane.f32.xlu0 %v8411_v8  ;;  %4239 = vmax.xlane.f32.xlu1 %v8420_v22  ;;  %9410 = vst [vmem:[#allocation53_spill] sm:$0xff] %v8430_v6  ;;  %v8447_v7 = vsel %vm4217_vm2, %v8414_v61, -inf  ;;  %v8459_v11 = vsel %vm4217_vm2, %v8430_v6, -inf  ;;  %v8464_v3 = vadd.f32 %v8391_v1, %v4178_v23  ;;  %v8479_v54 = vsel %vm8469_vm8, %v8398_v60, -inf }
 0x62b   : > { %v8474_v48 = vadd.f32 %v8391_v1, %v4186_v53  ;;  %v8493_v21 = vsel %vm8469_vm8, %v8401_v57, -inf  ;;  %v8507_v26 = vsel %vm8425_vm5, %v8414_v61, -inf  ;;  %v8527_v10 = vadd.f32 %v8391_v1, %v4176_v15 }
 0x62c   : > { %v8432_v42 = vpop.f32.mrb[4].mxu0  ;;  %v8434_v37 = vpop.f32.mrb[4].mxu1  ;;  %9411 = vst [vmem:[#allocation54_spill] sm:$0xff] %v8464_v3  ;;  %v8484_v25 = vsel %vm8425_vm5, %v8464_v3, -inf  ;;  %v8512_v55 = vsel %vm8469_vm8, %v8464_v3, -inf  ;;  %v8532_v43 = vsel %vm8425_vm5, %v8430_v6, -inf  ;;  %v8603_v19 = vadd.f32 %v8391_v1, %v4184_v0 }
 0x62d   : > { %v8436_v13 = vpop.f32.mrb[5].mxu0  ;;  %v4153_v4 = vpop.f32.mrb[5].mxu1  ;;  %9414 = vst [vmem:[#allocation55_spill] sm:$0xff] %v8474_v48  ;;  %v8498_v45 = vsel %vm8425_vm5, %v8474_v48, -inf  ;;  %9418 = vst [vmem:[#allocation59_spill] sm:$0xff] %v8527_v10  ;;  %v8537_v56 = vsel %vm8469_vm8, %v8474_v48, -inf  ;;  %v4181_v5 = vmul.f32 %v8432_v42, %v8387_v49  ;;  %v4189_v42 = vmul.f32 %v8434_v37, %v8387_v49 }
 0x62e   : > { %v5883_v31 = vpop.f32.mrb[6].mxu0  ;;  %4498 = vmax.xlane.f32.xlu1 %v8442_v44  ;;  %4235 = vmax.xlane.f32.xlu0 %v8447_v7  ;;  %v5891_v24 = vpop.f32.mrb[6].mxu1  ;;  %v4187_v14 = vmul.f32 %v8387_v49, %v4153_v4  ;;  %v8563_v2 = vsel %vm8469_vm8, %v8414_v61, -inf  ;;  %v8568_v29 = vsel %vm4217_vm2, %v8527_v10, -inf  ;;  %9421 = vst [vmem:[#allocation62_spill] sm:$0xff] %v8603_v19  ;;  %v8608_v28 = vsel %vm8469_vm8, %v8430_v6, -inf }
 0x62f   : > { %v4124_v35 = vpop.f32.mrb[7].mxu0  ;;  %v4156_v20 = vpop.f32.mrb[7].mxu1  ;;  %v4182_v63 = vmul.f32 %v5883_v31, %v8387_v49  ;;  %v4190_v50 = vmul.f32 %v5891_v24, %v8387_v49  ;;  %v8613_v18 = vsel %vm8425_vm5, %v8527_v10, -inf  ;;  %v8620_v33 = vsel %vm4217_vm2, %v8464_v3, -inf }
 0x630   : > { %v4180_v47 = vmul.f32 %v8387_v49, %v4124_v35  ;;  %v8523_v41 = vadd.f32 %v8391_v1, %v4187_v14  ;;  %v4188_v62 = vmul.f32 %v8387_v49, %v4156_v20  ;;  %v8625_v51 = vsel %vm8425_vm5, %v8603_v19, -inf }
 0x631   : > { %v8517_v12 = vadd.f32 %v8391_v1, %v4182_v63  ;;  %v8543_v27 = vadd.f32 %v8391_v1, %v4190_v50  ;;  %v8634_v23 = vsel %vm4217_vm2, %v8474_v48, -inf  ;;  %v8639_v4 = vsel %vm8469_vm8, %v8527_v10, -inf }
 0x632   : > { %4514 = vmax.xlane.f32.xlu1 %v8454_v59  ;;  %4251 = vmax.xlane.f32.xlu0 %v8459_v11  ;;  %v8520_v46 = vadd.f32 %v8391_v1, %v4180_v47  ;;  %9417 = vst [vmem:[#allocation58_spill] sm:$0xff] %v8523_v41  ;;  %v8548_v9 = vsel %vm8425_vm5, %v8523_v41, -inf  ;;  %v8551_v30 = vadd.f32 %v8391_v1, %v4188_v62  ;;  %v8573_v32 = vsel %vm8469_vm8, %v8523_v41, -inf }
 0x633   : > { %9415 = vst [vmem:[#allocation56_spill] sm:$0xff] %v8517_v12  ;;  %9419 = vst [vmem:[#allocation60_spill] sm:$0xff] %v8543_v27  ;;  %v8558_v17 = vsel %vm8425_vm5, %v8543_v27, -inf  ;;  %v8578_v40 = vsel %vm8469_vm8, %v8543_v27, -inf  ;;  %v8644_v31 = vadd.f32 %v8391_v1, %v4181_v5  ;;  %v8651_v35 = vsel %vm4217_vm2, %v8603_v19, -inf }
 0x634   : > { %9416 = vst [vmem:[#allocation57_spill] sm:$0xff] %v8520_v46  ;;  %9420 = vst [vmem:[#allocation61_spill] sm:$0xff] %v8551_v30  ;;  %v8585_v52 = vsel %vm8425_vm5, %v8520_v46, -inf  ;;  %v8590_v39 = vsel %vm8425_vm5, %v8551_v30, -inf  ;;  %v8595_v34 = vsel %vm8469_vm8, %v8520_v46, -inf  ;;  %v8600_v58 = vsel %vm8469_vm8, %v8551_v30, -inf }
 0x635   : > { %9422 = vst [vmem:[#allocation63_spill] sm:$0xff] %v8644_v31  ;;  %v8656_v24 = vsel %vm8469_vm8, %v8603_v19, -inf  ;;  %v8661_v20 = vadd.f32 %v8391_v1, %v4189_v42  ;;  %v8666_v37 = vsel %vm8425_vm5, %v8644_v31, -inf  ;;  %v8671_v53 = vsel %vm4217_vm2, %v8644_v31, -inf }
 0x636   : > { %4661 = vmax.xlane.f32.xlu1 %v8479_v54  ;;  %4500 = vmax.xlane.f32.xlu0 %v8484_v25  ;;  %v4179_v63 = vmul.f32 %v8387_v49, %v8436_v13  ;;  %v8695_v49 = vsel %vm8469_vm8, %v8644_v31, -inf  ;;  %v8712_v50 = vsel %vm4217_vm2, %v8523_v41, -inf  ;;  %v8724_v0 = vsel %vm8425_vm5, %v8517_v12, -inf }
 0x637   : > { %9423 = vst [vmem:[#allocation64_spill] sm:$0xff] %v8661_v20  ;;  %v8683_v14 = vsel %vm8425_vm5, %v8661_v20, -inf  ;;  %v8688_v15 = vsel %vm4217_vm2, %v8661_v20, -inf  ;;  %v8707_v13 = vsel %vm8469_vm8, %v8661_v20, -inf  ;;  %v8738_v42 = vsel %vm8469_vm8, %v8517_v12, -inf }
 0x638   : > { %v8678_v47 = vadd.f32 %v8391_v1, %v4179_v63  ;;  %v8747_v36 = vsel %vm4217_vm2, %v8517_v12, -inf  ;;  %v8754_v38 = vsel %vm4217_vm2, %v8543_v27, -inf  ;;  %v8761_v63 = vsel %vm4217_vm2, %v8520_v46, -inf }
 0x639   : > { %v8768_v12 = vsel %vm4217_vm2, %v8551_v30, -inf }
 0x63a   : > { %4677 = vmax.xlane.f32.xlu1 %v8493_v21  ;;  %4516 = vmax.xlane.f32.xlu0 %v8498_v45  ;;  %9424 = vst [vmem:[#allocation65_spill] sm:$0xff] %v8678_v47  ;;  %v8700_v1 = vsel %vm4217_vm2, %v8678_v47, -inf  ;;  %v8719_v62 = vsel %vm8425_vm5, %v8678_v47, -inf  ;;  %v8733_v5 = vsel %vm8469_vm8, %v8678_v47, -inf }
 0x63e   : > { %4494 = vmax.xlane.f32.xlu1 %v8507_v26  ;;  %4663 = vmax.xlane.f32.xlu0 %v8512_v55 }
 0x642   : > { %4510 = vmax.xlane.f32.xlu1 %v8532_v43  ;;  %4679 = vmax.xlane.f32.xlu0 %v8537_v56 }
 0x646   : > { %4657 = vmax.xlane.f32.xlu1 %v8563_v2  ;;  %4237 = vmax.xlane.f32.xlu0 %v8568_v29 }
 0x64a   : > { %4673 = vmax.xlane.f32.xlu1 %v8608_v28  ;;  %4496 = vmax.xlane.f32.xlu0 %v8613_v18 }
 0x64e   : > { %4241 = vmax.xlane.f32.xlu1 %v8620_v33  ;;  %4512 = vmax.xlane.f32.xlu0 %v8625_v51 }
 0x652   : > { %4257 = vmax.xlane.f32.xlu1 %v8634_v23  ;;  %4659 = vmax.xlane.f32.xlu0 %v8639_v4 }
 0x656   : > { %4253 = vmax.xlane.f32.xlu1 %v8651_v35  ;;  %4675 = vmax.xlane.f32.xlu0 %v8656_v24 }
 0x65a   : > { %4506 = vmax.xlane.f32.xlu1 %v8666_v37  ;;  %4247 = vmax.xlane.f32.xlu0 %v8671_v53 }
 0x65e   : > { %4522 = vmax.xlane.f32.xlu1 %v8683_v14  ;;  %4263 = vmax.xlane.f32.xlu0 %v8688_v15 }
 0x662   : > { %4669 = vmax.xlane.f32.xlu1 %v8695_v49  ;;  %4243 = vmax.xlane.f32.xlu0 %v8700_v1 }
 0x666   : > { %4685 = vmax.xlane.f32.xlu1 %v8707_v13  ;;  %4259 = vmax.xlane.f32.xlu0 %v8712_v50 }
 0x66a   : > { %4502 = vmax.xlane.f32.xlu1 %v8719_v62  ;;  %4508 = vmax.xlane.f32.xlu0 %v8724_v0 }
 0x66e   : > { %4518 = vmax.xlane.f32.xlu1 %v8548_v9  ;;  %4524 = vmax.xlane.f32.xlu0 %v8558_v17 }
 0x672   : > { %4665 = vmax.xlane.f32.xlu1 %v8733_v5  ;;  %4671 = vmax.xlane.f32.xlu0 %v8738_v42 }
 0x676   : > { %4681 = vmax.xlane.f32.xlu1 %v8573_v32  ;;  %4687 = vmax.xlane.f32.xlu0 %v8578_v40 }
 0x67a   : > { %4249 = vmax.xlane.f32.xlu1 %v8747_v36  ;;  %4504 = vmax.xlane.f32.xlu0 %v8585_v52 }
 0x67e   : > { %4265 = vmax.xlane.f32.xlu1 %v8754_v38  ;;  %4520 = vmax.xlane.f32.xlu0 %v8590_v39 }
 0x682   : > { %4667 = vmax.xlane.f32.xlu0 %v8595_v34  ;;  %4245 = vmax.xlane.f32.xlu1 %v8761_v63 }
 0x686   : > { %4683 = vmax.xlane.f32.xlu0 %v8600_v58  ;;  %4261 = vmax.xlane.f32.xlu1 %v8768_v12 }
 0x6b7   : > { %v4256_v27 = vpop.xlane.xlu0 %4255  ;;  %v4240_v20 = vpop.xlane.xlu1 %4239 }
 0x6b8   : > { %v4269_v41 = vsub.f32 %v8420_v22, %v4240_v20 }
 0x6ba   : > { %v4287_v47 = vmul.f32 1.442695, %v4269_v41 }
 0x6bb   : > { %v4499_v46 = vpop.xlane.xlu1 %4498  ;;  %v4236_v19 = vpop.xlane.xlu0 %4235 }
 0x6bc   : > { %6304 = vpow2.f32 %v4287_v47  ;;  %v4528_v31 = vsub.f32 %v8442_v44, %v4499_v46  ;;  %v4277_v44 = vsub.f32 %v8411_v8, %v4256_v27 }
 0x6be   : > { %v4546_v10 = vmul.f32 1.442695, %v4528_v31 }
 0x6bf   : > { %v4515_v48 = vpop.xlane.xlu1 %4514  ;;  %v8774_v3 = vpop.xlane.xlu0 %4251 }
 0x6c0   : > { %6306 = vpow2.f32 %v4546_v10  ;;  %v4536_v30 = vsub.f32 %v8454_v59, %v4515_v48 }
 0x6c2   : > { %v4562_v16 = vmul.f32 1.442695, %v4536_v30 }
 0x6c3   : > { %v4662_v6 = vpop.xlane.xlu1 %4661  ;;  %v4501_v61 = vpop.xlane.xlu0 %4500 }
 0x6c4   : > { %6308 = vpow2.f32 %v4562_v16  ;;  %v4691_v57 = vsub.f32 %v8479_v54, %v4662_v6  ;;  %v4303_v16 = vmul.f32 1.442695, %v4277_v44  ;;  %v4267_v6 = vsub.f32 %v8447_v7, %v4236_v19 }
 0x6c6   : > { %v8778_v22 = vpop.eup %6304  ;;  %v4709_v41 = vmul.f32 1.442695, %v4691_v57  ;;  %v4283_v8 = vmul.f32 1.442695, %v4267_v6  ;;  %v4529_v6 = vsub.f32 %v8484_v25, %v4501_v61 }
 0x6c7   : > { %v4678_v20 = vpop.xlane.xlu1 %4677  ;;  %v4517_v47 = vpop.xlane.xlu0 %4516  ;;  %4319 = vadd.xlane.f32.xlu0 %v8778_v22 }
 0x6c8   : > { %6310 = vpow2.f32 %v4709_v41  ;;  %v4699_v46 = vsub.f32 %v8493_v21, %v4678_v20 }
 0x6ca   : > { %v8783_v10 = vpop.eup %6306  ;;  %v4725_v59 = vmul.f32 1.442695, %v4699_v46 }
 0x6cb   : > { %v4495_v48 = vpop.xlane.xlu1 %4494  ;;  %v4664_v30 = vpop.xlane.xlu0 %4663  ;;  %4578 = vadd.xlane.f32.xlu0 %v8783_v10 }
 0x6cc   : > { %6312 = vpow2.f32 %v4725_v59  ;;  %v4526_v21 = vsub.f32 %v8507_v26, %v4495_v48 }
 0x6cd   : > { %6314 = vpow2.f32 %v4303_v16 }
 0x6ce   : > { %v8787_v57 = vpop.eup %6308  ;;  %6316 = vpow2.f32 %v4283_v8  ;;  %v4542_v7 = vmul.f32 1.442695, %v4526_v21 }
 0x6cf   : > { %9425 = vst [vmem:[#allocation66_spill] sm:$0xff] %v8787_v57  ;;  %v4511_v54 = vpop.xlane.xlu1 %4510  ;;  %v4680_v31 = vpop.xlane.xlu0 %4679  ;;  %4594 = vadd.xlane.f32.xlu0 %v8787_v57 }
 0x6d0   : > { %v4534_v19 = vsub.f32 %v8532_v43, %v4511_v54  ;;  %6318 = vpow2.f32 %v4542_v7  ;;  %v4275_v7 = vsub.f32 %v8459_v11, %v8774_v3 }
 0x6d2   : > { %v8791_v27 = vpop.eup %6310  ;;  %v4558_v26 = vmul.f32 1.442695, %v4534_v19  ;;  %v4548_v19 = vmul.f32 1.442695, %v4529_v6 }
 0x6d3   : > { %v4658_v41 = vpop.xlane.xlu1 %4657  ;;  %v8793_v20 = vpop.xlane.xlu0 %4237  ;;  %4741 = vadd.xlane.f32.xlu0 %v8791_v27 }
 0x6d4   : > { %v4689_v46 = vsub.f32 %v8563_v2, %v4658_v41  ;;  %6320 = vpow2.f32 %v4558_v26 }
 0x6d6   : > { %v8797_v44 = vpop.eup %6312  ;;  %v4705_v57 = vmul.f32 1.442695, %v4689_v46  ;;  %v4537_v46 = vsub.f32 %v8498_v45, %v4517_v47  ;;  %v4700_v47 = vsub.f32 %v8537_v56, %v4680_v31 }
 0x6d7   : > { %v4674_v59 = vpop.xlane.xlu1 %4673  ;;  %v8800_v16 = vpop.xlane.xlu0 %4496  ;;  %4757 = vadd.xlane.f32.xlu0 %v8797_v44 }
 0x6d8   : > { %v8803_v48 = vpop.eup %6314  ;;  %v4697_v43 = vsub.f32 %v8608_v28, %v4674_v59  ;;  %6322 = vpow2.f32 %v4705_v57  ;;  %v4692_v59 = vsub.f32 %v8512_v55, %v4664_v30  ;;  %v4564_v3 = vmul.f32 1.442695, %v4537_v46 }
 0x6d9   : > { %v8811_v54 = vpop.eup %6316 }
 0x6da   : > { %v4721_v26 = vmul.f32 1.442695, %v4697_v43  ;;  %v8819_v28 = vpop.eup %6318  ;;  %v4711_v45 = vmul.f32 1.442695, %v4692_v59  ;;  %v4268_v59 = vsub.f32 %v8568_v29, %v8793_v20  ;;  %v4527_v29 = vsub.f32 %v8613_v18, %v8800_v16 }
 0x6db   : > { %v4242_v8 = vpop.xlane.xlu1 %4241  ;;  %v8806_v21 = vpop.xlane.xlu0 %4512  ;;  %4335 = vadd.xlane.f32.xlu0 %v8803_v48 }
 0x6dc   : > { %v4270_v2 = vsub.f32 %v8620_v33, %v4242_v8  ;;  %v4299_v33 = vmul.f32 1.442695, %v4275_v7  ;;  %v4727_v7 = vmul.f32 1.442695, %v4700_v47  ;;  %v4544_v18 = vmul.f32 1.442695, %v4527_v29 }
 0x6dd   : > { %v4535_v16 = vsub.f32 %v8625_v51, %v8806_v21 }
 0x6de   : > { %v4289_v41 = vmul.f32 1.442695, %v4270_v2  ;;  %v8827_v57 = vpop.eup %6320 }
 0x6df   : > { %v4258_v61 = vpop.xlane.xlu1 %4257  ;;  %v8815_v25 = vpop.xlane.xlu0 %4659  ;;  %4315 = vadd.xlane.f32.xlu0 %v8811_v54 }
 0x6e0   : > { %6324 = vpow2.f32 %v4289_v41 }
 0x6e1   : > { %6326 = vpow2.f32 %v4548_v19  ;;  %v4278_v19 = vsub.f32 %v8634_v23, %v4258_v61 }
 0x6e2   : > { %6328 = vpow2.f32 %v4721_v26  ;;  %v8832_v30 = vpop.eup %6322 }
 0x6e3   : > { %v8822_v8 = vpop.xlane.xlu1 %4253  ;;  %v8824_v11 = vpop.xlane.xlu0 %4675  ;;  %4574 = vadd.xlane.f32.xlu0 %v8819_v28  ;;  %6330 = vpow2.f32 %v4299_v33  ;;  %v4305_v23 = vmul.f32 1.442695, %v4278_v19 }
 0x6e4   : > { %6332 = vpow2.f32 %v4564_v3 }
 0x6e5   : > { %6334 = vpow2.f32 %v4711_v45 }
 0x6e7   : > { %v4507_v6 = vpop.xlane.xlu1 %4506  ;;  %v4248_v43 = vpop.xlane.xlu0 %4247  ;;  %4590 = vadd.xlane.f32.xlu0 %v8827_v57 }
 0x6e8   : > { %v4532_v55 = vsub.f32 %v8666_v37, %v4507_v6 }
 0x6ea   : > { %v8834_v2 = vpop.eup %6324  ;;  %v4554_v41 = vmul.f32 1.442695, %v4532_v55  ;;  %v4285_v55 = vmul.f32 1.442695, %v4268_v59 }
 0x6eb   : > { %v4523_v46 = vpop.xlane.xlu1 %4522  ;;  %v8837_v26 = vpop.xlane.xlu0 %4263  ;;  %4737 = vadd.xlane.f32.xlu0 %v8832_v30  ;;  %4321 = vadd.xlane.f32.xlu1 %v8834_v2 }
 0x6ec   : > { %6336 = vpow2.f32 %v4554_v41  ;;  %v4540_v56 = vsub.f32 %v8683_v14, %v4523_v46  ;;  %v8842_v37 = vpop.eup %6326  ;;  %v4273_v41 = vsub.f32 %v8671_v53, %v4248_v43 }
 0x6ed   : > { %v8844_v31 = vpop.eup %6328  ;;  %6338 = vpow2.f32 %v4727_v7 }
 0x6ee   : > { %v4570_v33 = vmul.f32 1.442695, %v4540_v56  ;;  %v8853_v45 = vpop.eup %6330  ;;  %v4295_v53 = vmul.f32 1.442695, %v4273_v41 }
 0x6ef   : > { %v4670_v61 = vpop.xlane.xlu1 %4669  ;;  %v8848_v3 = vpop.xlane.xlu0 %4243  ;;  %4753 = vadd.xlane.f32.xlu0 %v8844_v31  ;;  %4580 = vadd.xlane.f32.xlu1 %v8842_v37 }
 0x6f0   : > { %6340 = vpow2.f32 %v4570_v33  ;;  %v4695_v14 = vsub.f32 %v8695_v49, %v4670_v61  ;;  %v8855_v47 = vpop.eup %6332  ;;  %v4690_v61 = vsub.f32 %v8639_v4, %v8815_v25 }
 0x6f1   : > { %6342 = vpow2.f32 %v4305_v23  ;;  %v8863_v7 = vpop.eup %6334  ;;  %v4560_v23 = vmul.f32 1.442695, %v4535_v16 }
 0x6f2   : > { %v4717_v6 = vmul.f32 1.442695, %v4695_v14  ;;  %v4707_v29 = vmul.f32 1.442695, %v4690_v61 }
 0x6f3   : > { %v4686_v20 = vpop.xlane.xlu1 %4685  ;;  %4331 = vadd.xlane.f32.xlu0 %v8853_v45  ;;  %4596 = vadd.xlane.f32.xlu1 %v8855_v47  ;;  %v8865_v19 = vpop.xlane.xlu0 %4259 }
 0x6f4   : > { %6344 = vpow2.f32 %v4717_v6  ;;  %v4703_v49 = vsub.f32 %v8707_v13, %v4686_v20  ;;  %v4698_v20 = vsub.f32 %v8656_v24, %v8824_v11 }
 0x6f5   : > { %6346 = vpow2.f32 %v4285_v55 }
 0x6f6   : > { %v8867_v46 = vpop.eup %6336  ;;  %v4733_v56 = vmul.f32 1.442695, %v4703_v49  ;;  %v4723_v16 = vmul.f32 1.442695, %v4698_v20  ;;  %v4281_v20 = vsub.f32 %v8688_v15, %v8837_v26 }
 0x6f7   : > { %v4503_v33 = vpop.xlane.xlu1 %4502  ;;  %4586 = vadd.xlane.f32.xlu0 %v8867_v46  ;;  %4743 = vadd.xlane.f32.xlu1 %v8863_v7  ;;  %v8874_v43 = vpop.eup %6338 }
 0x6f8   : > { %6348 = vpow2.f32 %v4733_v56  ;;  %v4530_v13 = vsub.f32 %v8719_v62, %v4503_v33  ;;  %v4509_v14 = vpop.xlane.xlu0 %4508 }
 0x6f9   : > { %6350 = vpow2.f32 %v4544_v18  ;;  %v4276_v18 = vsub.f32 %v8651_v35, %v8822_v8  ;;  %v4533_v8 = vsub.f32 %v8724_v0, %v4509_v14 }
 0x6fa   : > { %v8876_v59 = vpop.eup %6340  ;;  %6352 = vpow2.f32 %v4295_v53  ;;  %v4550_v21 = vmul.f32 1.442695, %v4530_v13 }
 0x6fb   : > { %v4519_v51 = vpop.xlane.xlu1 %4518  ;;  %4602 = vadd.xlane.f32.xlu0 %v8876_v59  ;;  %4759 = vadd.xlane.f32.xlu1 %v8874_v43  ;;  %v8883_v62 = vpop.eup %6342  ;;  %6354 = vpow2.f32 %v4560_v23  ;;  %v4301_v13 = vmul.f32 1.442695, %v4276_v18  ;;  %v4271_v23 = vsub.f32 %v8700_v1, %v8848_v3  ;;  %v4556_v1 = vmul.f32 1.442695, %v4533_v8 }
 0x6fc   : > { %v4538_v6 = vsub.f32 %v8548_v9, %v4519_v51  ;;  %6356 = vpow2.f32 %v4550_v21  ;;  %v4525_v9 = vpop.xlane.xlu0 %4524 }
 0x6fd   : > { %6358 = vpow2.f32 %v4707_v29  ;;  %v4291_v21 = vmul.f32 1.442695, %v4271_v23  ;;  %v4541_v3 = vsub.f32 %v8558_v17, %v4525_v9 }
 0x6fe   : > { %v8885_v55 = vpop.eup %6344  ;;  %v4566_v25 = vmul.f32 1.442695, %v4538_v6  ;;  %v4279_v6 = vsub.f32 %v8712_v50, %v8865_v19 }
 0x6ff   : > { %v4666_v4 = vpop.xlane.xlu1 %4665  ;;  %4749 = vadd.xlane.f32.xlu0 %v8885_v55  ;;  %4337 = vadd.xlane.f32.xlu1 %v8883_v62  ;;  %v8892_v49 = vpop.eup %6346  ;;  %v4572_v50 = vmul.f32 1.442695, %v4541_v3 }
 0x700   : > { %v4693_v41 = vsub.f32 %v8733_v5, %v4666_v4  ;;  %6360 = vpow2.f32 %v4566_v25  ;;  %v4672_v35 = vpop.xlane.xlu0 %4671  ;;  %v4307_v4 = vmul.f32 1.442695, %v4279_v6 }
 0x701   : > { %6362 = vpow2.f32 %v4723_v16  ;;  %v4696_v19 = vsub.f32 %v8738_v42, %v4672_v35 }
 0x702   : > { %v8894_v56 = vpop.eup %6348  ;;  %v4713_v11 = vmul.f32 1.442695, %v4693_v41  ;;  %v4311_v41 = vmul.f32 1.442695, %v4281_v20 }
 0x703   : > { %v4682_v24 = vpop.xlane.xlu1 %4681  ;;  %4765 = vadd.xlane.f32.xlu0 %v8894_v56  ;;  %4317 = vadd.xlane.f32.xlu1 %v8892_v49  ;;  %v8901_v5 = vpop.eup %6350  ;;  %v4719_v15 = vmul.f32 1.442695, %v4696_v19 }
 0x704   : > { %v4701_v33 = vsub.f32 %v8573_v32, %v4682_v24  ;;  %v8903_v53 = vpop.eup %6352  ;;  %6364 = vpow2.f32 %v4713_v11  ;;  %v4688_v14 = vpop.xlane.xlu0 %4687 }
 0x705   : > { %v8910_v51 = vpop.eup %6354  ;;  %6366 = vpow2.f32 %v4301_v13  ;;  %v4704_v26 = vsub.f32 %v8578_v40, %v4688_v14 }
 0x706   : > { %v4729_v61 = vmul.f32 1.442695, %v4701_v33  ;;  %v8912_v32 = vpop.eup %6356 }
 0x707   : > { %4327 = vadd.xlane.f32.xlu0 %v8903_v53  ;;  %4576 = vadd.xlane.f32.xlu1 %v8901_v5  ;;  %v8919_v0 = vpop.eup %6358  ;;  %v4250_v16 = vpop.xlane.xlu1 %4249  ;;  %v4735_v42 = vmul.f32 1.442695, %v4704_v26 }
 0x708   : > { %6368 = vpow2.f32 %v4729_v61  ;;  %v4505_v9 = vpop.xlane.xlu0 %4504  ;;  %v4274_v11 = vsub.f32 %v8747_v36, %v4250_v16 }
 0x709   : > { %6370 = vpow2.f32 %v4291_v21  ;;  %v4531_v35 = vsub.f32 %v8585_v52, %v4505_v9 }
 0x70a   : > { %v8921_v29 = vpop.eup %6360  ;;  %6372 = vpow2.f32 %v4556_v1  ;;  %v4297_v40 = vmul.f32 1.442695, %v4274_v11 }
 0x70b   : > { %4582 = vadd.xlane.f32.xlu0 %v8912_v32  ;;  %4592 = vadd.xlane.f32.xlu1 %v8910_v51  ;;  %v8928_v17 = vpop.eup %6362  ;;  %6374 = vpow2.f32 %v4307_v4  ;;  %v4552_v36 = vmul.f32 1.442695, %v4531_v35  ;;  %v4266_v3 = vpop.xlane.xlu1 %4265 }
 0x70c   : > { %6376 = vpow2.f32 %v4572_v50  ;;  %v4521_v13 = vpop.xlane.xlu0 %4520 }
 0x70d   : > { %6378 = vpow2.f32 %v4311_v41  ;;  %v4539_v6 = vsub.f32 %v8590_v39, %v4521_v13 }
 0x70e   : > { %v8930_v25 = vpop.eup %6364  ;;  %6380 = vpow2.f32 %v4719_v15 }
 0x70f   : > { %4598 = vadd.xlane.f32.xlu0 %v8921_v29  ;;  %4739 = vadd.xlane.f32.xlu1 %v8919_v0  ;;  %v8935_v18 = vpop.eup %6366  ;;  %6382 = vpow2.f32 %v4735_v42  ;;  %v4568_v52 = vmul.f32 1.442695, %v4539_v6  ;;  %v4246_v19 = vpop.xlane.xlu1 %4245  ;;  %v4381_v6 = vsub.f32 0.0, %v8398_v60 }
 0x710   : > { %v4668_v21 = vpop.xlane.xlu0 %4667  ;;  %6384 = vpow2.f32 %v4297_v40  ;;  %v4272_v15 = vsub.f32 %v8761_v63, %v4246_v19 }
 0x711   : > { %6386 = vpow2.f32 %v4552_v36  ;;  %v4694_v20 = vsub.f32 %v8595_v34, %v4668_v21 }
 0x712   : > { %v8937_v24 = vpop.eup %6368  ;;  %6388 = vpow2.f32 %v4568_v52  ;;  %v4293_v42 = vmul.f32 1.442695, %v4272_v15  ;;  %v9427_v52 = vld [vmem:[#allocation51_spill] sm:$0xff] }
 0x713   : > { %4745 = vadd.xlane.f32.xlu0 %v8930_v25  ;;  %4755 = vadd.xlane.f32.xlu1 %v8928_v17  ;;  %v8942_v33 = vpop.eup %6370  ;;  %v4715_v39 = vmul.f32 1.442695, %v4694_v20  ;;  %v4262_v16 = vpop.xlane.xlu1 %4261  ;;  %v4389_v20 = vsub.f32 0.0, %v9427_v52  ;;  %v9429_v52 = vld [vmem:[#allocation53_spill] sm:$0xff] }
 0x714   : > { %v8944_v23 = vpop.eup %6372  ;;  %v4684_v4 = vpop.xlane.xlu0 %4683  ;;  %v4280_v11 = vsub.f32 %v8768_v12, %v4262_v16 }
 0x715   : > { %v8949_v8 = vpop.eup %6374  ;;  %v4702_v41 = vsub.f32 %v8600_v58, %v4684_v4  ;;  %6390 = vpow2.f32 %v4715_v39  ;;  %v4282_v58 = vsub.f32 %v8754_v38, %v4266_v3  ;;  %v4399_v3 = vmul.f32 1.442695, %v4381_v6 }
 0x716   : > { %v8951_v61 = vpop.eup %6376  ;;  %v4309_v40 = vmul.f32 1.442695, %v4280_v11  ;;  %v4415_v19 = vmul.f32 1.442695, %v4389_v20  ;;  %v9428_v11 = vld [vmem:[#allocation52_spill] sm:$0xff]  ;;  %v4387_v20 = vsub.f32 0.0, %v9429_v52 }
 0x717   : > { %4761 = vadd.xlane.f32.xlu0 %v8937_v24  ;;  %4333 = vadd.xlane.f32.xlu1 %v8935_v18  ;;  %v8956_v1 = vpop.eup %6378  ;;  %v4731_v26 = vmul.f32 1.442695, %v4702_v41  ;;  %v4313_v63 = vmul.f32 1.442695, %v4282_v58  ;;  %v4379_v58 = vsub.f32 0.0, %v9428_v11 }
 0x718   : > { %v8958_v14 = vpop.eup %6380  ;;  %v4411_v11 = vmul.f32 1.442695, %v4387_v20 }
 0x719   : > { %v8963_v50 = vpop.eup %6382  ;;  %6392 = vpow2.f32 %v4731_v26 }
 0x71a   : > { %v8967_v9 = vpop.eup %6384  ;;  %6394 = vpow2.f32 %v4293_v42 }
 0x71b   : > { %4323 = vadd.xlane.f32.xlu0 %v8942_v33  ;;  %4588 = vadd.xlane.f32.xlu1 %v8944_v23  ;;  %v8971_v34 = vpop.eup %6386  ;;  %6396 = vpow2.f32 %v4309_v40 }
 0x71c   : > { %v8975_v13 = vpop.eup %6388  ;;  %6398 = vpow2.f32 %v4313_v63  ;;  %v4395_v63 = vmul.f32 1.442695, %v4379_v58  ;;  %v9431_v58 = vld [vmem:[#allocation54_spill] sm:$0xff] }
 0x71d   : > { %6400 = vpow2.f32 %v4399_v3 }
 0x71e   : > { %6402 = vpow2.f32 %v4415_v19 }
 0x71f   : > { %4339 = vadd.xlane.f32.xlu0 %v8949_v8  ;;  %4604 = vadd.xlane.f32.xlu1 %v8951_v61  ;;  %v8979_v35 = vpop.eup %6390 }
 0x723   : > { %4343 = vadd.xlane.f32.xlu0 %v8956_v1  ;;  %4751 = vadd.xlane.f32.xlu1 %v8958_v14  ;;  %v8982_v21 = vpop.eup %6392 }
 0x724   : > { %v8985_v12 = vpop.eup %6394 }
 0x725   : > { %v8988_v36 = vpop.eup %6396 }
 0x726   : > { %v8991_v38 = vpop.eup %6398 }
 0x727   : > { %4767 = vadd.xlane.f32.xlu1 %v8963_v50  ;;  %9426 = vst [vmem:[#allocation67_spill] sm:$0xff] %v8991_v38  ;;  %v6401_v15 = vpop.eup %6400 }
 0x728   : > { %v4429_v26 = vadd.f32 1.0, %v6401_v15  ;;  %v6403_v42 = vpop.eup %6402  ;;  %v9430_v15 = vld [vmem:[#allocation50_spill] sm:$0xff] }
 0x729   : > { %v4437_v40 = vadd.f32 1.0, %v6403_v42  ;;  %vm4801_vm9 = vcmp.lt.s32.totalorder %v9430_v15, 15 }
 0x72b   : > { %4329 = vadd.xlane.f32.xlu1 %v8967_v9 }
 0x72f   : > { %4584 = vadd.xlane.f32.xlu1 %v8971_v34 }
 0x733   : > { %4600 = vadd.xlane.f32.xlu1 %v8975_v13 }
 0x737   : > { %4747 = vadd.xlane.f32.xlu1 %v8979_v35 }
 0x73b   : > { %4763 = vadd.xlane.f32.xlu1 %v8982_v21 }
 0x73f   : > { %4325 = vadd.xlane.f32.xlu1 %v8985_v12 }
 0x743   : > { %4341 = vadd.xlane.f32.xlu1 %v8988_v36 }
 0x747   : > { %4345 = vadd.xlane.f32.xlu1 %v8991_v38 }
 0x754   : > { %v4320_v4 = vpop.xlane.xlu0 %4319 }
 0x758   : > { %v4579_v39 = vpop.xlane.xlu0 %4578 }
 0x759   : > { %6404 = vrcp.f32 %v4579_v39 }
 0x75a   : > { %6406 = vrcp.f32 %v4320_v4 }
 0x75c   : > { %v4595_v41 = vpop.xlane.xlu0 %4594 }
 0x760   : > { %v4742_v16 = vpop.xlane.xlu0 %4741 }
 0x761   : > { %6408 = vrcp.f32 %v4742_v16 }
 0x762   : > { %6410 = vrcp.f32 %v4595_v41 }
 0x763   : > { %6412 = vrcp.f32 %v4429_v26  ;;  %v6405_v3 = vpop.eup %6404 }
 0x764   : > { %v4758_v60 = vpop.xlane.xlu0 %4757  ;;  %v6407_v19 = vpop.eup %6406  ;;  %v4611_v4 = vmul.f32 %v6405_v3, %v8783_v10  ;;  %v9432_v10 = vld [vmem:[#allocation66_spill] sm:$0xff] }
 0x765   : > { %6414 = vrcp.f32 %v4758_v60  ;;  %v4382_v60 = vsub.f32 0.0, %v9431_v58  ;;  %v4352_v38 = vmul.f32 %v6407_v19, %v8778_v22  ;;  %v9434_v19 = vld [vmem:[#allocation55_spill] sm:$0xff] }
 0x767   : > { %v4401_v22 = vmul.f32 1.442695, %v4382_v60 }
 0x768   : > { %v4336_v6 = vpop.xlane.xlu0 %4335 }
 0x769   : > { %6416 = vrcp.f32 %v4336_v6 }
 0x76a   : > { %6418 = vrcp.f32 %v4437_v40 }
 0x76b   : > { %v6409_v39 = vpop.eup %6408  ;;  %6420 = vpow2.f32 %v4395_v63 }
 0x76c   : > { %v4774_v41 = vmul.f32 %v6409_v39, %v8791_v27  ;;  %v4316_v26 = vpop.xlane.xlu0 %4315  ;;  %v6411_v16 = vpop.eup %6410  ;;  %6422 = vpow2.f32 %v4411_v11  ;;  %v4390_v39 = vsub.f32 0.0, %v9434_v19 }
 0x76d   : > { %v6413_v42 = vpop.eup %6412  ;;  %v4627_v3 = vmul.f32 %v6411_v16, %v9432_v10  ;;  %6424 = vpow2.f32 %v4401_v22 }
 0x76e   : > { %v4804_v6 = vsel %vm4476_vm4, %v4611_v4, %v4774_v41  ;;  %v4417_v11 = vmul.f32 1.442695, %v4390_v39 }
 0x76f   : > { %v6415_v40 = vpop.eup %6414  ;;  %v4820_v63 = vsel %vm4801_vm9, %v6413_v42, %v4804_v6 }
 0x770   : > { %v4836_v27 = vsel %vm4217_vm2, %v4352_v38, %v4820_v63  ;;  %v4790_v52 = vmul.f32 %v6415_v40, %v8797_v44  ;;  %v4575_v20 = vpop.xlane.xlu0 %4574  ;;  %v9435_v40 = vld [vmem:[#allocation59_spill] sm:$0xff] }
 0x771   : > { %4852 = vst [vmem:[%s9433_s12 + $0x10] sm:$0xff] %v4836_v27  ;;  %6426 = vrcp.f32 %v4575_v20  ;;  %v4380_v63 = vsub.f32 0.0, %v9435_v40  ;;  %v9436_v27 = vld [vmem:[#allocation63_spill] sm:$0xff] }
 0x772   : > { %v4812_v4 = vsel %vm4476_vm4, %v4627_v3, %v4790_v52  ;;  %6428 = vrcp.f32 %v4316_v26  ;;  %v4385_v52 = vsub.f32 0.0, %v9436_v27 }
 0x773   : > { %v6417_v41 = vpop.eup %6416  ;;  %v4397_v22 = vmul.f32 1.442695, %v4380_v63 }
 0x774   : > { %v6419_v42 = vpop.eup %6418  ;;  %v4368_v16 = vmul.f32 %v6417_v41, %v8803_v48  ;;  %v4591_v58 = vpop.xlane.xlu0 %4590  ;;  %v9437_v41 = vld [vmem:[#allocation62_spill] sm:$0xff] }
 0x775   : > { %v6421_v38 = vpop.eup %6420  ;;  %v4828_v44 = vsel %vm4801_vm9, %v6419_v42, %v4812_v4  ;;  %v4388_v20 = vsub.f32 0.0, %v9437_v41  ;;  %v4407_v42 = vmul.f32 1.442695, %v4385_v52 }
 0x776   : > { %v4844_v6 = vsel %vm4217_vm2, %v4368_v16, %v4828_v44  ;;  %v4427_v60 = vadd.f32 1.0, %v6421_v38  ;;  %v6423_v3 = vpop.eup %6422 }
 0x777   : > { %4860 = vst [vmem:[%s9433_s12 + $0x50] sm:$0xff] %v4844_v6  ;;  %v4435_v4 = vadd.f32 1.0, %v6423_v3  ;;  %v6425_v16 = vpop.eup %6424  ;;  %v4413_v40 = vmul.f32 1.442695, %v4388_v20 }
 0x778   : > { %v4738_v48 = vpop.xlane.xlu0 %4737  ;;  %v4322_v10 = vpop.xlane.xlu1 %4321  ;;  %v4430_v52 = vadd.f32 1.0, %v6425_v16 }
 0x779   : > { %6430 = vrcp.f32 %v4738_v48 }
 0x77a   : > { %6432 = vpow2.f32 %v4417_v11 }
 0x77b   : > { %6434 = vrcp.f32 %v4591_v58  ;;  %v6427_v44 = vpop.eup %6426 }
 0x77c   : > { %6436 = vrcp.f32 %v4427_v60  ;;  %v4754_v19 = vpop.xlane.xlu0 %4753  ;;  %v4581_v39 = vpop.xlane.xlu1 %4580  ;;  %v4607_v60 = vmul.f32 %v6427_v44, %v8819_v28 }
 0x77d   : > { %6438 = vrcp.f32 %v4754_v19  ;;  %v6429_v11 = vpop.eup %6428 }
 0x77e   : > { %6440 = vpow2.f32 %v4397_v22  ;;  %v4348_v19 = vmul.f32 %v6429_v11, %v8811_v54 }
 0x780   : > { %v4332_v26 = vpop.xlane.xlu0 %4331  ;;  %v4597_v38 = vpop.xlane.xlu1 %4596 }
 0x781   : > { %6442 = vrcp.f32 %v4332_v26 }
 0x782   : > { %6444 = vrcp.f32 %v4435_v4 }
 0x783   : > { %v6431_v6 = vpop.eup %6430  ;;  %6446 = vpow2.f32 %v4407_v42 }
 0x784   : > { %v6433_v58 = vpop.eup %6432  ;;  %v4770_v63 = vmul.f32 %v6431_v6, %v8832_v30  ;;  %6448 = vrcp.f32 %v4581_v39  ;;  %v4587_v48 = vpop.xlane.xlu0 %4586 }
 0x785   : > { %v4744_v3 = vpop.xlane.xlu1 %4743  ;;  %v6435_v27 = vpop.eup %6434  ;;  %6450 = vrcp.f32 %v4322_v10  ;;  %v4438_v20 = vadd.f32 1.0, %v6433_v58 }
 0x786   : > { %v6437_v22 = vpop.eup %6436  ;;  %v4802_v4 = vsel %vm4476_vm4, %v4607_v60, %v4770_v63  ;;  %6452 = vrcp.f32 %v4744_v3  ;;  %v4623_v30 = vmul.f32 %v6435_v27, %v8827_v57 }
 0x787   : > { %v6439_v41 = vpop.eup %6438  ;;  %6454 = vpow2.f32 %v4413_v40  ;;  %v4818_v28 = vsel %vm4801_vm9, %v6437_v22, %v4802_v4 }
 0x788   : > { %v4834_v39 = vsel %vm4217_vm2, %v4348_v19, %v4818_v28  ;;  %v4786_v10 = vmul.f32 %v6439_v41, %v8844_v31  ;;  %6456 = vrcp.f32 %v4597_v38  ;;  %v9039_v42 = vpop.xlane.xlu0 %4602  ;;  %v6441_v16 = vpop.eup %6440 }
 0x789   : > { %v4760_v54 = vpop.xlane.xlu1 %4759  ;;  %6458 = vrcp.f32 %v4430_v52  ;;  %4850 = vst [vmem:[%s9433_s12] sm:$0xff] %v4834_v39  ;;  %v9439_v39 = vld [vmem:[#allocation58_spill] sm:$0xff] }
 0x78a   : > { %v4810_v26 = vsel %vm4476_vm4, %v4623_v30, %v4786_v10  ;;  %6460 = vrcp.f32 %v4760_v54  ;;  %v4391_v10 = vsub.f32 0.0, %v9439_v39 }
 0x78b   : > { %v6443_v57 = vpop.eup %6442  ;;  %6462 = vrcp.f32 %v4438_v20 }
 0x78c   : > { %v6445_v44 = vpop.eup %6444  ;;  %v4364_v11 = vmul.f32 %v6443_v57, %v8853_v45  ;;  %v4750_v31 = vpop.xlane.xlu0 %4749  ;;  %v9438_v45 = vld [vmem:[#allocation65_spill] sm:$0xff]  ;;  %v4428_v57 = vadd.f32 1.0, %v6441_v16 }
 0x78d   : > { %v4338_v38 = vpop.xlane.xlu1 %4337  ;;  %v6447_v6 = vpop.eup %6446  ;;  %v4826_v40 = vsel %vm4801_vm9, %v6445_v44, %v4810_v26  ;;  %6464 = vrcp.f32 %v4750_v31  ;;  %v4383_v27 = vsub.f32 0.0, %v9438_v45 }
 0x78e   : > { %v6449_v58 = vpop.eup %6448  ;;  %v4842_v60 = vsel %vm4217_vm2, %v4364_v11, %v4826_v40  ;;  %6466 = vrcp.f32 %v4338_v38  ;;  %v4433_v28 = vadd.f32 1.0, %v6447_v6 }
 0x78f   : > { %v6451_v63 = vpop.eup %6450  ;;  %4858 = vst [vmem:[%s9433_s12 + $0x40] sm:$0xff] %v4842_v60  ;;  %6468 = vrcp.f32 %v4587_v48  ;;  %v4613_v4 = vmul.f32 %v6449_v58, %v8842_v37  ;;  %v4403_v44 = vmul.f32 1.442695, %v4383_v27  ;;  %v9440_v58 = vld [vmem:[#allocation64_spill] sm:$0xff] }
 0x790   : > { %v6453_v3 = vpop.eup %6452  ;;  %v9055_v52 = vpop.xlane.xlu0 %4765  ;;  %v4354_v54 = vmul.f32 %v6451_v63, %v8834_v2  ;;  %v4393_v60 = vsub.f32 0.0, %v9440_v58  ;;  %v4419_v63 = vmul.f32 1.442695, %v4391_v10 }
 0x791   : > { %v4318_v22 = vpop.xlane.xlu1 %4317  ;;  %v6455_v19 = vpop.eup %6454  ;;  %v4776_v41 = vmul.f32 %v6453_v3, %v8863_v7 }
 0x792   : > { %v6457_v20 = vpop.eup %6456  ;;  %v4436_v40 = vadd.f32 1.0, %v6455_v19 }
 0x793   : > { %v6459_v30 = vpop.eup %6458  ;;  %v4805_v48 = vsel %vm4476_vm4, %v4613_v4, %v4776_v41  ;;  %v4629_v7 = vmul.f32 %v6457_v20, %v8855_v47  ;;  %v4423_v20 = vmul.f32 1.442695, %v4393_v60 }
 0x794   : > { %v6461_v26 = vpop.eup %6460  ;;  %v4821_v11 = vsel %vm4801_vm9, %v6459_v30, %v4805_v48  ;;  %v4328_v31 = vpop.xlane.xlu0 %4327  ;;  %v9441_v30 = vld [vmem:[#allocation56_spill] sm:$0xff] }
 0x795   : > { %v4577_v37 = vpop.xlane.xlu1 %4576  ;;  %v4837_v38 = vsel %vm4217_vm2, %v4354_v54, %v4821_v11  ;;  %v4792_v6 = vmul.f32 %v6461_v26, %v8874_v43  ;;  %6470 = vrcp.f32 %v4328_v31  ;;  %v6463_v2 = vpop.eup %6462  ;;  %v4386_v39 = vsub.f32 0.0, %v9441_v30 }
 0x796   : > { %6472 = vrcp.f32 %v4433_v28  ;;  %4853 = vst [vmem:[%s9433_s12 + $0x18] sm:$0xff] %v4837_v38 }
 0x797   : > { %v6465_v16 = vpop.eup %6464  ;;  %v4813_v47 = vsel %vm4476_vm4, %v4629_v7, %v4792_v6  ;;  %6474 = vrcp.f32 %v4428_v57  ;;  %v4409_v57 = vmul.f32 1.442695, %v4386_v39 }
 0x798   : > { %v6467_v3 = vpop.eup %6466  ;;  %v4583_v45 = vpop.xlane.xlu0 %4582  ;;  %6476 = vpow2.f32 %v4403_v44  ;;  %v4782_v4 = vmul.f32 %v6465_v16, %v8885_v55  ;;  %v4829_v41 = vsel %vm4801_vm9, %v6463_v2, %v4813_v47 }
 0x799   : > { %v4593_v27 = vpop.xlane.xlu1 %4592  ;;  %v6469_v43 = vpop.eup %6468  ;;  %v4370_v19 = vmul.f32 %v6467_v3, %v8883_v62  ;;  %6478 = vrcp.f32 %v4436_v40 }
 0x79a   : > { %6480 = vpow2.f32 %v4419_v63  ;;  %v4619_v10 = vmul.f32 %v6469_v43, %v8867_v46 }
 0x79b   : > { %v4845_v28 = vsel %vm4217_vm2, %v4370_v19, %v4829_v41  ;;  %6482 = vrcp.f32 %v4577_v37 }
 0x79c   : > { %4861 = vst [vmem:[%s9433_s12 + $0x58] sm:$0xff] %v4845_v28  ;;  %v4599_v62 = vpop.xlane.xlu0 %4598  ;;  %6484 = vrcp.f32 %v4318_v22  ;;  %v4808_v55 = vsel %vm4476_vm4, %v4619_v10, %v4782_v4 }
 0x79d   : > { %v4740_v54 = vpop.xlane.xlu1 %4739 }
 0x79e   : > { %6486 = vrcp.f32 %v4740_v54 }
 0x79f   : > { %v6471_v48 = vpop.eup %6470  ;;  %6488 = vpow2.f32 %v4423_v20 }
 0x7a0   : > { %v6473_v26 = vpop.eup %6472  ;;  %v4360_v44 = vmul.f32 %v6471_v48, %v8903_v53  ;;  %6490 = vrcp.f32 %v4593_v27  ;;  %v4746_v46 = vpop.xlane.xlu0 %4745 }
 0x7a1   : > { %v4756_v11 = vpop.xlane.xlu1 %4755  ;;  %v4824_v31 = vsel %vm4801_vm9, %v6473_v26, %v4808_v55  ;;  %6492 = vrcp.f32 %v4746_v46  ;;  %v6475_v37 = vpop.eup %6474 }
 0x7a2   : > { %v4840_v22 = vsel %vm4217_vm2, %v4360_v44, %v4824_v31  ;;  %6494 = vrcp.f32 %v4756_v11  ;;  %v6477_v7 = vpop.eup %6476 }
 0x7a3   : > { %4856 = vst [vmem:[%s9433_s12 + $0x30] sm:$0xff] %v4840_v22  ;;  %6496 = vrcp.f32 %v4583_v45  ;;  %v6479_v38 = vpop.eup %6478  ;;  %v4431_v16 = vadd.f32 1.0, %v6477_v7 }
 0x7a4   : > { %6498 = vpow2.f32 %v4409_v57  ;;  %v4762_v53 = vpop.xlane.xlu0 %4761  ;;  %v6481_v2 = vpop.eup %6480 }
 0x7a5   : > { %v4334_v6 = vpop.xlane.xlu1 %4333  ;;  %6500 = vrcp.f32 %v4762_v53  ;;  %v6483_v40 = vpop.eup %6482  ;;  %v4439_v19 = vadd.f32 1.0, %v6481_v2  ;;  %v9442_v2 = vld [vmem:[#allocation57_spill] sm:$0xff] }
 0x7a6   : > { %6502 = vrcp.f32 %v4334_v6  ;;  %v6485_v58 = vpop.eup %6484  ;;  %v4609_v27 = vmul.f32 %v6483_v40, %v8901_v5  ;;  %v4384_v40 = vsub.f32 0.0, %v9442_v2 }
 0x7a7   : > { %6504 = vrcp.f32 %v4599_v62  ;;  %v4350_v41 = vmul.f32 %v6485_v58, %v8892_v49 }
 0x7a8   : > { %v6487_v60 = vpop.eup %6486  ;;  %6506 = vrcp.f32 %v9055_v52  ;;  %v4324_v63 = vpop.xlane.xlu0 %4323 }
 0x7a9   : > { %v4589_v47 = vpop.xlane.xlu1 %4588  ;;  %v6489_v3 = vpop.eup %6488  ;;  %v4772_v45 = vmul.f32 %v6487_v60, %v8919_v0  ;;  %6508 = vrcp.f32 %v4324_v63 }
 0x7aa   : > { %v6491_v43 = vpop.eup %6490  ;;  %6510 = vrcp.f32 %v4431_v16  ;;  %v4441_v28 = vadd.f32 1.0, %v6489_v3 }
 0x7ab   : > { %v6493_v4 = vpop.eup %6492  ;;  %6512 = vrcp.f32 %v9039_v42  ;;  %v4803_v20 = vsel %vm4476_vm4, %v4609_v27, %v4772_v45  ;;  %v4625_v10 = vmul.f32 %v6491_v43, %v8910_v51  ;;  %v4405_v45 = vmul.f32 1.442695, %v4384_v40  ;;  %v9443_v43 = vld [vmem:[#allocation61_spill] sm:$0xff] }
 0x7ac   : > { %v6495_v52 = vpop.eup %6494  ;;  %v4819_v30 = vsel %vm4801_vm9, %v6475_v37, %v4803_v20  ;;  %v4340_v5 = vpop.xlane.xlu0 %4339  ;;  %v4778_v54 = vmul.f32 %v6493_v4, %v8930_v25 }
 0x7ad   : > { %v9105_v39 = vpop.xlane.xlu1 %4604  ;;  %v6497_v0 = vpop.eup %6496  ;;  %v4835_v62 = vsel %vm4217_vm2, %v4350_v41, %v4819_v30  ;;  %v4788_v42 = vmul.f32 %v6495_v52, %v8928_v17  ;;  %6514 = vrcp.f32 %v4340_v5 }
 0x7ae   : > { %v6499_v49 = vpop.eup %6498  ;;  %6516 = vrcp.f32 %v4439_v19  ;;  %4851 = vst [vmem:[%s9433_s12 + $0x8] sm:$0xff] %v4835_v62  ;;  %v4615_v51 = vmul.f32 %v6497_v0, %v8912_v32 }
 0x7af   : > { %v6501_v55 = vpop.eup %6500  ;;  %v4811_v48 = vsel %vm4476_vm4, %v4625_v10, %v4788_v42  ;;  %6518 = vrcp.f32 %v4441_v28  ;;  %v4434_v16 = vadd.f32 1.0, %v6499_v49 }
 0x7b0   : > { %v6503_v26 = vpop.eup %6502  ;;  %v4344_v57 = vpop.xlane.xlu0 %4343  ;;  %v4806_v31 = vsel %vm4476_vm4, %v4615_v51, %v4778_v54  ;;  %v4794_v25 = vmul.f32 %v6501_v55, %v8937_v24  ;;  %v4827_v37 = vsel %vm4801_vm9, %v6479_v38, %v4811_v48 }
 0x7b1   : > { %v4752_v44 = vpop.xlane.xlu1 %4751  ;;  %v6505_v17 = vpop.eup %6504  ;;  %v4366_v46 = vmul.f32 %v6503_v26, %v8935_v18  ;;  %6520 = vrcp.f32 %v4344_v57 }
 0x7b2   : > { %v6507_v11 = vpop.eup %6506  ;;  %6522 = vrcp.f32 %v4752_v44  ;;  %v4631_v53 = vmul.f32 %v6505_v17, %v8921_v29 }
 0x7b3   : > { %v6509_v22 = vpop.eup %6508  ;;  %v4843_v32 = vsel %vm4217_vm2, %v4366_v46, %v4827_v37  ;;  %6524 = vrcp.f32 %v4589_v47  ;;  %v4798_v58 = vmul.f32 %v6507_v11, %v8894_v56  ;;  %v4392_v56 = vsub.f32 0.0, %v9443_v43 }
 0x7b4   : > { %v6511_v7 = vpop.eup %6510  ;;  %4859 = vst [vmem:[%s9433_s12 + $0x48] sm:$0xff] %v4843_v32  ;;  %v4356_v18 = vmul.f32 %v6509_v22, %v8942_v33  ;;  %v4814_v60 = vsel %vm4476_vm4, %v4631_v53, %v4794_v25 }
 0x7b5   : > { %v4768_v6 = vpop.xlane.xlu1 %4767  ;;  %v6513_v24 = vpop.eup %6512  ;;  %v4822_v38 = vsel %vm4801_vm9, %v6511_v7, %v4806_v31  ;;  %v4421_v10 = vmul.f32 1.442695, %v4392_v56 }
 0x7b6   : > { %v4838_v29 = vsel %vm4217_vm2, %v4356_v18, %v4822_v38  ;;  %v4635_v47 = vmul.f32 %v6513_v24, %v8876_v59 }
 0x7b7   : > { %v6515_v63 = vpop.eup %6514  ;;  %4854 = vst [vmem:[%s9433_s12 + $0x20] sm:$0xff] %v4838_v29 }
 0x7b8   : > { %v6517_v33 = vpop.eup %6516  ;;  %v4372_v3 = vmul.f32 %v6515_v63, %v8949_v8  ;;  %v4816_v41 = vsel %vm4476_vm4, %v4635_v47, %v4798_v58  ;;  %v9444_v8 = vld [vmem:[#allocation60_spill] sm:$0xff] }
 0x7b9   : > { %v4330_v27 = vpop.xlane.xlu1 %4329  ;;  %v4830_v19 = vsel %vm4801_vm9, %v6517_v33, %v4814_v60  ;;  %v6519_v4 = vpop.eup %6518  ;;  %v4394_v28 = vsub.f32 0.0, %v9444_v8 }
 0x7ba   : > { %6526 = vrcp.f32 %v4330_v27  ;;  %v4846_v20 = vsel %vm4217_vm2, %v4372_v3, %v4830_v19  ;;  %v4832_v62 = vsel %vm4801_vm9, %v6519_v4, %v4816_v41  ;;  %v9445_v4 = vld [vmem:[#allocation67_spill] sm:$0xff] }
 0x7bb   : > { %6528 = vrcp.f32 %v4434_v16  ;;  %v6521_v52 = vpop.eup %6520  ;;  %4862 = vst [vmem:[%s9433_s12 + $0x60] sm:$0xff] %v4846_v20  ;;  %v4425_v54 = vmul.f32 1.442695, %v4394_v28 }
 0x7bc   : > { %v6523_v59 = vpop.eup %6522  ;;  %v4376_v30 = vmul.f32 %v6521_v52, %v8956_v1  ;;  %6530 = vpow2.f32 %v4405_v45 }
 0x7bd   : > { %v4585_v5 = vpop.xlane.xlu1 %4584  ;;  %v6525_v0 = vpop.eup %6524  ;;  %v4784_v49 = vmul.f32 %v6523_v59, %v8958_v14  ;;  %6532 = vpow2.f32 %v4421_v10 }
 0x7be   : > { %v4848_v42 = vsel %vm4217_vm2, %v4376_v30, %v4832_v62  ;;  %v4621_v55 = vmul.f32 %v6525_v0, %v8944_v23  ;;  %6534 = vpow2.f32 %v4425_v54 }
 0x7bf   : > { %4864 = vst [vmem:[%s9433_s12 + $0x70] sm:$0xff] %v4848_v42 }
 0x7c0   : > { %v4809_v48 = vsel %vm4476_vm4, %v4621_v55, %v4784_v49 }
 0x7c1   : > { %v4601_v1 = vpop.xlane.xlu1 %4600 }
 0x7c4   : > { %v6527_v26 = vpop.eup %6526 }
 0x7c5   : > { %v6529_v51 = vpop.eup %6528  ;;  %v4362_v57 = vmul.f32 %v6527_v26, %v8967_v9  ;;  %v4748_v44 = vpop.xlane.xlu1 %4747 }
 0x7c6   : > { %v4825_v14 = vsel %vm4801_vm9, %v6529_v51, %v4809_v48  ;;  %6536 = vrcp.f32 %v4748_v44  ;;  %v6531_v46 = vpop.eup %6530 }
 0x7c7   : > { %v4841_v17 = vsel %vm4217_vm2, %v4362_v57, %v4825_v14  ;;  %6538 = vrcp.f32 %v4585_v5  ;;  %v4432_v11 = vadd.f32 1.0, %v6531_v46  ;;  %v6533_v31 = vpop.eup %6532 }
 0x7c8   : > { %4857 = vst [vmem:[%s9433_s12 + $0x38] sm:$0xff] %v4841_v17  ;;  %v6535_v25 = vpop.eup %6534  ;;  %v4440_v37 = vadd.f32 1.0, %v6533_v31 }
 0x7c9   : > { %v4764_v23 = vpop.xlane.xlu1 %4763  ;;  %v4442_v53 = vadd.f32 1.0, %v6535_v25 }
 0x7ca   : > { %6540 = vrcp.f32 %v4764_v23 }
 0x7cb   : > { %6542 = vrcp.f32 %v4601_v1 }
 0x7cc   : > { %6544 = vrcp.f32 %v4768_v6 }
 0x7cd   : > { %v4326_v9 = vpop.xlane.xlu1 %4325 }
 0x7ce   : > { %6546 = vrcp.f32 %v4326_v9 }
 0x7cf   : > { %6548 = vrcp.f32 %v4432_v11 }
 0x7d0   : > { %v6537_v22 = vpop.eup %6536  ;;  %6550 = vrcp.f32 %v9105_v39 }
 0x7d1   : > { %v4342_v32 = vpop.xlane.xlu1 %4341  ;;  %v6539_v7 = vpop.eup %6538  ;;  %v4780_v18 = vmul.f32 %v6537_v22, %v8979_v35 }
 0x7d2   : > { %6552 = vrcp.f32 %v4342_v32  ;;  %v4617_v2 = vmul.f32 %v6539_v7, %v8971_v34 }
 0x7d3   : > { %6554 = vrcp.f32 %v4440_v37 }
 0x7d4   : > { %v6541_v24 = vpop.eup %6540  ;;  %v4807_v16 = vsel %vm4476_vm4, %v4617_v2, %v4780_v18 }
 0x7d5   : > { %v4346_v40 = vpop.xlane.xlu1 %4345  ;;  %v6543_v6 = vpop.eup %6542  ;;  %v4796_v39 = vmul.f32 %v6541_v24, %v8982_v21 }
 0x7d6   : > { %6556 = vrcp.f32 %v4346_v40  ;;  %v6545_v38 = vpop.eup %6544  ;;  %v4633_v29 = vmul.f32 %v6543_v6, %v8975_v13 }
 0x7d7   : > { %6558 = vrcp.f32 %v4442_v53  ;;  %v4800_v33 = vmul.f32 %v6545_v38, %v8963_v50 }
 0x7d8   : > { %v6547_v58 = vpop.eup %6546  ;;  %v4815_v47 = vsel %vm4476_vm4, %v4633_v29, %v4796_v39 }
 0x7d9   : > { %v6549_v60 = vpop.eup %6548  ;;  %v4358_v63 = vmul.f32 %v6547_v58, %v8985_v12 }
 0x7da   : > { %v6551_v35 = vpop.eup %6550  ;;  %v4823_v34 = vsel %vm4801_vm9, %v6549_v60, %v4807_v16 }
 0x7db   : > { %v4839_v3 = vsel %vm4217_vm2, %v4358_v63, %v4823_v34  ;;  %v4637_v21 = vmul.f32 %v6551_v35, %v8951_v61 }
 0x7dc   : > { %v6553_v27 = vpop.eup %6552  ;;  %4855 = vst [vmem:[%s9433_s12 + $0x28] sm:$0xff] %v4839_v3 }
 0x7dd   : > { %v6555_v13 = vpop.eup %6554  ;;  %v4374_v12 = vmul.f32 %v6553_v27, %v8988_v36  ;;  %v4817_v50 = vsel %vm4476_vm4, %v4637_v21, %v4800_v33 }
 0x7de   : > { %v4831_v45 = vsel %vm4801_vm9, %v6555_v13, %v4815_v47 }
 0x7df   : > { %v4847_v43 = vsel %vm4217_vm2, %v4374_v12, %v4831_v45 }
 0x7e0   : > { %v6557_v56 = vpop.eup %6556  ;;  %4863 = vst [vmem:[%s9433_s12 + $0x68] sm:$0xff] %v4847_v43 }
 0x7e1   : > { %v6559_v19 = vpop.eup %6558  ;;  %v4378_v41 = vmul.f32 %v6557_v56, %v9445_v4 }
 0x7e2   : > { %v4833_v61 = vsel %vm4801_vm9, %v6559_v19, %v4817_v50 }
 0x7e3   : > { %v4849_v36 = vsel %vm4217_vm2, %v4378_v41, %v4833_v61 }
 0x7e4   : > { %4865 = vst [vmem:[%s9433_s12 + $0x78] sm:$0xff] %v4849_v36 }
 0x7e5 PF: > { %s9446_s16 = sld [smem:[#allocation28_spill]]  ;;  %s9447_s13 = sld [smem:[#allocation26_spill]] }
 0x7e6   : > { %s9448_s14 = sld [smem:[#allocation27_spill]]  ;;  %s9449_s15 = sld [smem:[#allocation29_spill]] }
 0x7eb   : > { %p29_p3 = scmp.ge.s32.totalorder %s9446_s16, 23  }
 0x7ed   :  { %31 = sbr.rel (!%p29_p3) target bundleno = 16 (0x10), region = 199 }
 0x7f4   :  { %4877 = vsyncpa [#allocation5], 1 }
 0x7f5   :  { %4879 = vsyncpa [#allocation5 + $0x1], 1 }
 0x7f6   :  { %4880 = vsyncpa [#allocation7], 1 }
 0x7f7   :  { %4882 = vsyncpa [#allocation7 + $0x1], 1 }
 0x7f8   :  { %4883 = vsyncpa [#allocation10], 1 }
 0x7f9   :  { %4885 = vsyncpa [#allocation10 + $0x1], 1 }
 0x7fa   :  { %4886 = vsyncpa [#allocation13], 1 }
 0x7fb   :  { %4888 = vsyncpa [#allocation13 + $0x1], 1 }
 0x7fc   :  { %4889 = vsyncpa [#allocation16], 1 }
 0x7fd   :  { %4890 = vsyncpa [#allocation19], 1 }

</bundles_post_ra>
